<compile_context>
chip_gen: v6e
topology: v6e:2x2x1
jax: 0.10.0
libtpu: 0.0.40
codegen_flags: <defaults>
</compile_context>

<pallas_src>
import functools

import numpy as np
import jax
import jax.numpy as jnp
from jax import lax
from jax.experimental import pallas as pl
from jax.experimental.pallas import tpu as pltpu

_EPS = 1e-5
_PAD = 128   # lane-aligned left/right padding for the 3x3 shift scratch
_CPARAMS = pltpu.CompilerParams(dimension_semantics=("arbitrary",))


def _spec(shape):
    return pl.BlockSpec(shape, lambda i: (0, 0))


def _bn_relu(x):
    # Training-mode BatchNorm2d (batch stats over the lane axis M = N*H*W,
    # biased variance, gamma=1 / beta=0 folded away) fused with ReLU.
    # x: (C, M) f32, channel-major.
    mean = jnp.mean(x, axis=1, keepdims=True)
    var = jnp.mean(jnp.square(x - mean), axis=1, keepdims=True)
    return jnp.maximum((x - mean) * lax.rsqrt(var + _EPS), 0.0)


# ----------------------------------------------------------------------------
# Pallas kernels (all activations channel-major (C, M), M on lanes)
# ----------------------------------------------------------------------------
def _stem_kernel(pat_ref, w_ref, o_ref):
    # conv0 (GEMM over pre-extracted stride-2 7x7 patches) + norm0 + relu0.
    y = jnp.dot(w_ref[...], pat_ref[...], preferred_element_type=jnp.float32)
    o_ref[...] = _bn_relu(y)


def _dense_block_kernel(x_ref, mask_ref, *rest, c0, g, cb, m, offs, n_layers):
    # One whole DenseNet block, fused. For each layer:
    #   norm1+relu1+conv1(1x1) -> norm2+relu2+conv2(3x3,pad=1)
    # The 3x3 conv is a single GEMM with K=9*cb over a lane-shifted,
    # boundary-masked operand assembled from a lane-aligned VMEM scratch.
    # New channels are written into sublane slices of the output feature map,
    # which doubles as the dense-connectivity concat buffer.
    out_ref = rest[2 * n_layers]
    pad_ref = rest[2 * n_layers + 1]

    out_ref[0:c0, :] = x_ref[...]                       # raw input features
    pad_ref[...] = jnp.zeros(pad_ref.shape, pad_ref.dtype)   # zero borders once

    for l in range(n_layers):
        cin = c0 + l * g
        xn = _bn_relu(out_ref[0:cin, :])                          # (cin, M)
        w1 = rest[2 * l][...]                                     # (cb, cin) bf16
        bott = jnp.dot(w1, xn.astype(jnp.bfloat16),
                       preferred_element_type=jnp.float32)        # (cb, M)
        bno = _bn_relu(bott)                                      # (cb, M)

        # Lane-aligned store of the bottleneck; borders stay zero.
        pad_ref[:, _PAD:_PAD + m] = bno
        # 9 shifted taps (static lane windows), assembled into (9*cb, M),
        # zeroed with the precomputed row/image boundary mask BEFORE the GEMM.
        taps = [pad_ref[:, _PAD + off:_PAD + off + m] for off in offs]
        opnd = jnp.concatenate(taps, axis=0) * mask_ref[...]      # (9cb, M)

        w2 = rest[2 * l + 1][...]                                 # (g, 9cb) bf16
        new = jnp.dot(w2, opnd.astype(jnp.bfloat16),
                      preferred_element_type=jnp.float32)         # (g, M)
        out_ref[cin:cin + g, :] = new


def _transition_kernel(x_ref, pool_ref, w_ref, o_ref):
    # norm + relu + 2x2 avg-pool + 1x1 conv, fused.  The pool is commuted
    # before the (linear, pointwise) 1x1 conv -- exact -- so the conv GEMM
    # runs on 4x fewer columns.
    xn = _bn_relu(x_ref[...])                                     # (Cin, M)
    pooled = jnp.dot(xn.astype(jnp.bfloat16), pool_ref[...],
                     preferred_element_type=jnp.float32)          # (Cin, M/4)
    o_ref[...] = jnp.dot(w_ref[...], pooled.astype(jnp.bfloat16),
                         preferred_element_type=jnp.float32)      # (Cout, M/4)


def _head_kernel(x_ref, poolg_ref, drop_ref, w_ref, b_ref, o_ref):
    # norm5 + F.relu + adaptive_avg_pool2d(1,1) + relu + relu + dropout(0.4)
    # + relu + both classifier Linears merged into one GEMM.
    xn = _bn_relu(x_ref[...])                                     # (C, M)
    pooled = jnp.dot(xn.astype(jnp.bfloat16), poolg_ref[...],
                     preferred_element_type=jnp.float32)          # (C, N)
    # The two F.relu calls here are no-ops: pooled >= 0 (mean of ReLU outputs).
    z = pooled * drop_ref[...]                                    # dropout mask
    # F.relu after dropout is also a no-op: z >= 0 since the mask is >= 0.
    o_ref[...] = jnp.dot(w_ref[...], z.astype(jnp.bfloat16),
                         preferred_element_type=jnp.float32) + b_ref[...]


# ----------------------------------------------------------------------------
# pallas_call wrappers
# ----------------------------------------------------------------------------
def stem_conv_bn_relu(pat_t, w0):
    k, m = pat_t.shape
    c = w0.shape[0]
    return pl.pallas_call(
        _stem_kernel,
        out_shape=jax.ShapeDtypeStruct((c, m), jnp.float32),
        grid=(1,),
        in_specs=[_spec((k, m)), _spec((c, k))],
        out_specs=_spec((c, m)),
        compiler_params=_CPARAMS,
    )(pat_t, w0)


def dense_block(x, mask_big, layer_ws, *, g, cb, m, w, n_layers):
    c0 = x.shape[0]
    c_out = c0 + n_layers * g
    offs = tuple(dy * w + dx for dy in (-1, 0, 1) for dx in (-1, 0, 1))
    flat_ws = [a for pair in layer_ws for a in pair]
    kern = functools.partial(_dense_block_kernel, c0=c0, g=g, cb=cb, m=m,
                             offs=offs, n_layers=n_layers)
    return pl.pallas_call(
        kern,
        out_shape=jax.ShapeDtypeStruct((c_out, m), jnp.float32),
        grid=(1,),
        in_specs=[_spec(x.shape), _spec(mask_big.shape)]
                 + [_spec(a.shape) for a in flat_ws],
        out_specs=_spec((c_out, m)),
        scratch_shapes=[pltpu.VMEM((cb, m + 2 * _PAD), jnp.float32)],
        compiler_params=_CPARAMS,
    )(x, mask_big, *flat_ws)


def transition(x, pool_t, wt):
    cin, m = x.shape
    mo = pool_t.shape[1]
    cout = wt.shape[0]
    return pl.pallas_call(
        _transition_kernel,
        out_shape=jax.ShapeDtypeStruct((cout, mo), jnp.float32),
        grid=(1,),
        in_specs=[_spec((cin, m)), _spec((m, mo)), _spec((cout, cin))],
        out_specs=_spec((cout, mo)),
        compiler_params=_CPARAMS,
    )(x, pool_t, wt)


def head(x, poolg, drop, w, b):
    c, m = x.shape
    nb = poolg.shape[1]
    co = w.shape[0]
    return pl.pallas_call(
        _head_kernel,
        out_shape=jax.ShapeDtypeStruct((co, nb), jnp.float32),
        grid=(1,),
        in_specs=[_spec((c, m)), _spec((m, nb)), _spec((c, nb)),
                  _spec((co, c)), _spec((co, 1))],
        out_specs=_spec((co, nb)),
        compiler_params=_CPARAMS,
    )(x, poolg, drop, w, b)


# ----------------------------------------------------------------------------
# Host-precomputed constants (masks & pooling matrices)
# ----------------------------------------------------------------------------
def _tap_mask_big(n, h, w, cb):
    # (9*cb, M) 0/1 mask: tap (dy,dx) at output pixel (y,x) is valid iff the
    # neighbor (y+dy, x+dx) lies inside the SAME image (no row/image wrap).
    m = n * h * w
    idx = np.arange(m)
    yy = (idx // w) % h
    xx = idx % w
    rows = []
    for dy in (-1, 0, 1):
        for dx in (-1, 0, 1):
            v = ((yy + dy >= 0) & (yy + dy < h) &
                 (xx + dx >= 0) & (xx + dx < w)).astype(np.float32)
            rows.append(np.broadcast_to(v, (cb, m)))
    return jnp.asarray(np.concatenate(rows, axis=0))


def _avgpool2x2_matrix(n, h, w):
    ho, wo = h // 2, w // 2
    P = np.zeros((n * h * w, n * ho * wo), np.float32)
    for ni in range(n):
        for y in range(h):
            for x in range(w):
                mi = ni * h * w + y * w + x
                mo = ni * ho * wo + (y // 2) * wo + (x // 2)
                P[mi, mo] = 0.25
    return jnp.asarray(P, jnp.bfloat16)        # 0.25 exact in bf16


def _global_pool_matrix(n, hw):
    P = np.zeros((n * hw, n), np.float32)
    for ni in range(n):
        P[ni * hw:(ni + 1) * hw, ni] = 1.0 / hw
    return jnp.asarray(P, jnp.bfloat16)        # 1/16 exact in bf16


# ----------------------------------------------------------------------------
# Model definition (small, deterministic parameters)
# ----------------------------------------------------------------------------
class Cfg:
    growth = 8
    blocks = (2, 2)
    init_feat = 16
    bn_size = 2
    num_classes = 10


def final_feature_count(cfg):
    num = cfg.init_feat
    for bi, nl in enumerate(cfg.blocks):
        num += nl * cfg.growth
        if bi != len(cfg.blocks) - 1:
            num //= 2
    return num


def init_params(key, cfg):
    params = {}
    keys = iter(jax.random.split(key, 64))

    def kaiming(k, shape):  # (KH, KW, Cin, Cout); fan_in mode, gain sqrt(2)
        fan_in = shape[0] * shape[1] * shape[2]
        return jax.random.normal(k, shape, jnp.float32) * np.sqrt(2.0 / fan_in)

    cb = cfg.bn_size * cfg.growth
    w0 = kaiming(next(keys), (7, 7, 3, cfg.init_feat)).reshape(147, cfg.init_feat)
    params["conv0_w"] = jnp.transpose(w0).astype(jnp.bfloat16)          # (C0,147)
    num = cfg.init_feat
    for bi, nl in enumerate(cfg.blocks):
        for li in range(nl):
            cin = num + li * cfg.growth
            w1 = kaiming(next(keys), (1, 1, cin, cb)).reshape(cin, cb)
            params[f"b{bi}_l{li}_w1"] = jnp.transpose(w1).astype(jnp.bfloat16)
            w2 = kaiming(next(keys), (3, 3, cb, cfg.growth)).reshape(9 * cb,
                                                                     cfg.growth)
            params[f"b{bi}_l{li}_w2"] = jnp.transpose(w2).astype(jnp.bfloat16)
        num += nl * cfg.growth
        if bi != len(cfg.blocks) - 1:
            wt = kaiming(next(keys), (1, 1, num, num // 2)).reshape(num, num // 2)
            params[f"trans{bi}_w"] = jnp.transpose(wt).astype(jnp.bfloat16)
            num //= 2
    # Both classifier heads merged into one GEMM; module zero-inits Linear bias.
    bound = float(np.sqrt(1.0 / num))
    hw = jax.random.uniform(next(keys), (num, 2 * cfg.num_classes),
                            jnp.float32, -bound, bound)
    params["head_w"] = jnp.transpose(hw).astype(jnp.bfloat16)   # (2nc, C)
    params["head_b"] = jnp.zeros((2 * cfg.num_classes, 1), jnp.float32)
    return params


def forward(params, x_nchw, drop_mask, cfg):
    n = x_nchw.shape[0]
    x = jnp.transpose(x_nchw, (0, 2, 3, 1)).astype(jnp.float32)     # NHWC
    hi, wi = x.shape[1], x.shape[2]
    ho, wo = hi // 2, wi // 2

    # --- stem: conv0 7x7/s2/p3 + norm0 + relu0 (one fused Pallas call) ---
    # TODO(synk): the one-off strided 7x7 patch extraction (and its transpose to
    # channel-major) stays in XLA; negligible at 32x32, revisit at real sizes.
    xp = jnp.pad(x, ((0, 0), (3, 3), (3, 3), (0, 0)))
    cols = [xp[:, ky:ky + 2 * ho:2, kx:kx + 2 * wo:2, :]
            for ky in range(7) for kx in range(7)]
    pat = jnp.concatenate(cols, axis=-1).reshape(n * ho * wo, 147)
    pat_t = jnp.transpose(pat).astype(jnp.bfloat16)                 # (147, M)
    x = stem_conv_bn_relu(pat_t, params["conv0_w"])                 # (C0, M)

    # --- pool0: 3x3/s2/p1 overlapping max pool ---
    # TODO(synk): overlapping max-pool kept in lax.reduce_window (XLA glue).
    c0 = cfg.init_feat
    x = x.reshape(c0, n, ho, wo)
    x = lax.reduce_window(x, -jnp.inf, lax.max, (1, 1, 3, 3), (1, 1, 2, 2),
                          ((0, 0), (0, 0), (1, 1), (1, 1)))
    h, w = ho // 2, wo // 2
    x = x.reshape(c0, n * h * w)                                    # (C0, M)

    cb = cfg.bn_size * cfg.growth
    for bi, nl in enumerate(cfg.blocks):
        m = n * h * w
        mask_big = _tap_mask_big(n, h, w, cb)
        layer_ws = [(params[f"b{bi}_l{li}_w1"], params[f"b{bi}_l{li}_w2"])
                    for li in range(nl)]
        x = dense_block(x, mask_big, layer_ws, g=cfg.growth, cb=cb,
                        m=m, w=w, n_layers=nl)                      # (C+L*g, M)
        if bi != len(cfg.blocks) - 1:
            pool_t = _avgpool2x2_matrix(n, h, w)
            x = transition(x, pool_t, params[f"trans{bi}_w"])       # (C/2, M/4)
            h, w = h // 2, w // 2

    # --- norm5 + relu + pool + dropout + both classifiers (one fused call) ---
    poolg = _global_pool_matrix(n, h * w)
    out = head(x, poolg, drop_mask, params["head_w"], params["head_b"])
    out = jnp.transpose(out)                                        # (N, 2nc)
    nc = cfg.num_classes
    return out[:, :nc], out[:, nc:2 * nc]


if __name__ == "__main__":
    cfg = Cfg()
    key = jax.random.PRNGKey(0)
    pkey, xkey, dkey = jax.random.split(key, 3)

    params = init_params(pkey, cfg)
    x = jax.random.normal(xkey, (2, 3, 32, 32), jnp.float32)   # NCHW like torch

    # Dropout (p=0.4, training=True) keep-mask, generated with jax.random.
    # TODO(synk): in-kernel pltpu.prng_* has no CPU/interpret lowering, so the
    # mask is produced outside and applied inside the fused head kernel.
    c_final = final_feature_count(cfg)
    keep = jax.random.bernoulli(dkey, 0.6, (c_final, x.shape[0]))
    drop_mask = keep.astype(jnp.float32) / 0.6                 # (C, N)

    fwd = jax.jit(functools.partial(forward, cfg=cfg))
    out1, out2 = fwd(params, x, drop_mask)
    jax.block_until_ready((out1, out2))

    assert out1.shape == (2, cfg.num_classes)
    assert out2.shape == (2, cfg.num_classes)
    assert bool(jnp.all(jnp.isfinite(out1))) and bool(jnp.all(jnp.isfinite(out2)))
    print("KERNEL_OK")
</pallas_src>

<mosaic_0001>
module attributes {stable_mosaic.version = 11 : i64} {
  func.func @_stem_kernel(%arg0: i32, %arg1: memref<147x512xbf16, #tpu.memory_space<vmem>>, %arg2: memref<16x147xbf16, #tpu.memory_space<vmem>>, %arg3: memref<16x512xf32, #tpu.memory_space<vmem>>) attributes {dimension_semantics = [#tpu.dimension_semantics<arbitrary>], iteration_bounds = array<i64: 1>, scalar_prefetch = 0 : i64, scratch_operands = 0 : i64, tpu.core_type = #tpu.core_type<tc>, window_params = [{pipeline_mode = #tpu.pipeline_mode<synchronous>, transform_indices = @transform_0, window_bounds = array<i64: 147, 512>}, {pipeline_mode = #tpu.pipeline_mode<synchronous>, transform_indices = @transform_1, window_bounds = array<i64: 16, 147>}, {pipeline_mode = #tpu.pipeline_mode<synchronous>, transform_indices = @transform_2, window_bounds = array<i64: 16, 512>}]} {
    %c0 = arith.constant 0 : index
    %c0_0 = arith.constant 0 : index
    %0 = vector.load %arg2[%c0, %c0_0] : memref<16x147xbf16, #tpu.memory_space<vmem>>, vector<16x147xbf16>
    %c0_1 = arith.constant 0 : index
    %c0_2 = arith.constant 0 : index
    %1 = vector.load %arg1[%c0_1, %c0_2] : memref<147x512xbf16, #tpu.memory_space<vmem>>, vector<147x512xbf16>
    %cst = arith.constant dense<0.000000e+00> : vector<16x512xf32>
    %2 = tpu.matmul %0, %1, %cst {dimension_numbers = #tpu.dot_dimension_numbers<[1], [0], [0], [1], [0, 0, 1, 1], [], []>} : vector<16x147xbf16>, vector<147x512xbf16>, vector<16x512xf32> -> vector<16x512xf32>
    %cst_3 = arith.constant dense<0.000000e+00> : vector<16xf32>
    %3 = vector.multi_reduction <add>, %2, %cst_3 [1] : vector<16x512xf32> to vector<16xf32>
    %4 = vector.shape_cast %3 : vector<16xf32> to vector<16x1xf32>
    %cst_4 = arith.constant 5.120000e+02 : f32
    %5 = vector.broadcast %cst_4 : f32 to vector<16x1xf32>
    %6 = arith.divf %4, %5 : vector<16x1xf32>
    %7 = vector.broadcast %6 : vector<16x1xf32> to vector<16x512xf32>
    %8 = arith.subf %2, %7 : vector<16x512xf32>
    %9 = arith.mulf %8, %8 : vector<16x512xf32>
    %cst_5 = arith.constant dense<0.000000e+00> : vector<16xf32>
    %10 = vector.multi_reduction <add>, %9, %cst_5 [1] : vector<16x512xf32> to vector<16xf32>
    %11 = vector.shape_cast %10 : vector<16xf32> to vector<16x1xf32>
    %cst_6 = arith.constant 5.120000e+02 : f32
    %12 = vector.broadcast %cst_6 : f32 to vector<16x1xf32>
    %13 = arith.divf %11, %12 : vector<16x1xf32>
    %14 = vector.broadcast %6 : vector<16x1xf32> to vector<16x512xf32>
    %15 = arith.subf %2, %14 : vector<16x512xf32>
    %cst_7 = arith.constant 9.99999974E-6 : f32
    %16 = vector.broadcast %cst_7 : f32 to vector<16x1xf32>
    %17 = arith.addf %13, %16 : vector<16x1xf32>
    %18 = math.rsqrt %17 : vector<16x1xf32>
    %19 = vector.broadcast %18 : vector<16x1xf32> to vector<16x512xf32>
    %20 = arith.mulf %15, %19 : vector<16x512xf32>
    %cst_8 = arith.constant 0.000000e+00 : f32
    %21 = vector.broadcast %cst_8 : f32 to vector<16x512xf32>
    %22 = arith.maximumf %20, %21 : vector<16x512xf32>
    %c0_9 = arith.constant 0 : index
    %c0_10 = arith.constant 0 : index
    %23 = vector.load %arg3[%c0_9, %c0_10] : memref<16x512xf32, #tpu.memory_space<vmem>>, vector<16x512xf32>
    tpu.vector_store %arg3[%c0_9, %c0_10], %22 {strides = array<i32>} : memref<16x512xf32, #tpu.memory_space<vmem>>, vector<16x512xf32>,
    return
  }
  func.func @transform_0(%arg0: i32) -> (i32, i32) {
    %c0_i32 = arith.constant 0 : i32
    %c0_i32_0 = arith.constant 0 : i32
    %c0_i32_1 = arith.constant 0 : i32
    return %c0_i32, %c0_i32_0 : i32, i32
  }
  func.func @transform_1(%arg0: i32) -> (i32, i32) {
    %c0_i32 = arith.constant 0 : i32
    %c0_i32_0 = arith.constant 0 : i32
    %c0_i32_1 = arith.constant 0 : i32
    return %c0_i32, %c0_i32_0 : i32, i32
  }
  func.func @transform_2(%arg0: i32) -> (i32, i32) {
    %c0_i32 = arith.constant 0 : i32
    %c0_i32_0 = arith.constant 0 : i32
    %c0_i32_1 = arith.constant 0 : i32
    return %c0_i32, %c0_i32_0 : i32, i32
  }
}

module attributes {stable_mosaic.version = 11 : i64} {
  func.func @_dense_block_kernel(%arg0: i32, %arg1: memref<16x128xf32, #tpu.memory_space<vmem>>, %arg2: memref<144x128xf32, #tpu.memory_space<vmem>>, %arg3: memref<16x16xbf16, #tpu.memory_space<vmem>>, %arg4: memref<8x144xbf16, #tpu.memory_space<vmem>>, %arg5: memref<16x24xbf16, #tpu.memory_space<vmem>>, %arg6: memref<8x144xbf16, #tpu.memory_space<vmem>>, %arg7: memref<32x128xf32, #tpu.memory_space<vmem>>, %arg8: memref<16x384xf32, #tpu.memory_space<vmem>>) attributes {dimension_semantics = [#tpu.dimension_semantics<arbitrary>], iteration_bounds = array<i64: 1>, scalar_prefetch = 0 : i64, scratch_operands = 1 : i64, tpu.core_type = #tpu.core_type<tc>, window_params = [{pipeline_mode = #tpu.pipeline_mode<synchronous>, transform_indices = @transform_0, window_bounds = array<i64: 16, 128>}, {pipeline_mode = #tpu.pipeline_mode<synchronous>, transform_indices = @transform_1, window_bounds = array<i64: 144, 128>}, {pipeline_mode = #tpu.pipeline_mode<synchronous>, transform_indices = @transform_2, window_bounds = array<i64: 16, 16>}, {pipeline_mode = #tpu.pipeline_mode<synchronous>, transform_indices = @transform_3, window_bounds = array<i64: 8, 144>}, {pipeline_mode = #tpu.pipeline_mode<synchronous>, transform_indices = @transform_4, window_bounds = array<i64: 16, 24>}, {pipeline_mode = #tpu.pipeline_mode<synchronous>, transform_indices = @transform_5, window_bounds = array<i64: 8, 144>}, {pipeline_mode = #tpu.pipeline_mode<synchronous>, transform_indices = @transform_6, window_bounds = array<i64: 32, 128>}]} {
    %c0 = arith.constant 0 : index
    %c0_0 = arith.constant 0 : index
    %0 = vector.load %arg1[%c0, %c0_0] : memref<16x128xf32, #tpu.memory_space<vmem>>, vector<16x128xf32>
    %c0_1 = arith.constant 0 : index
    %c0_2 = arith.constant 0 : index
    %1 = vector.load %arg7[%c0_1, %c0_2] : memref<32x128xf32, #tpu.memory_space<vmem>>, vector<16x128xf32>
    tpu.vector_store %arg7[%c0_1, %c0_2], %0 {strides = array<i32>} : memref<32x128xf32, #tpu.memory_space<vmem>>, vector<16x128xf32>,
    %cst = arith.constant 0.000000e+00 : f32
    %2 = vector.broadcast %cst : f32 to vector<16x384xf32>
    %c0_3 = arith.constant 0 : index
    %c0_4 = arith.constant 0 : index
    %3 = vector.load %arg8[%c0_3, %c0_4] : memref<16x384xf32, #tpu.memory_space<vmem>>, vector<16x384xf32>
    tpu.vector_store %arg8[%c0_3, %c0_4], %2 {strides = array<i32>} : memref<16x384xf32, #tpu.memory_space<vmem>>, vector<16x384xf32>,
    %c0_5 = arith.constant 0 : index
    %c0_6 = arith.constant 0 : index
    %4 = vector.load %arg7[%c0_5, %c0_6] : memref<32x128xf32, #tpu.memory_space<vmem>>, vector<16x128xf32>
    %cst_7 = arith.constant dense<0.000000e+00> : vector<16xf32>
    %5 = vector.multi_reduction <add>, %4, %cst_7 [1] : vector<16x128xf32> to vector<16xf32>
    %6 = vector.shape_cast %5 : vector<16xf32> to vector<16x1xf32>
    %cst_8 = arith.constant 1.280000e+02 : f32
    %7 = vector.broadcast %cst_8 : f32 to vector<16x1xf32>
    %8 = arith.divf %6, %7 : vector<16x1xf32>
    %9 = vector.broadcast %8 : vector<16x1xf32> to vector<16x128xf32>
    %10 = arith.subf %4, %9 : vector<16x128xf32>
    %11 = arith.mulf %10, %10 : vector<16x128xf32>
    %cst_9 = arith.constant dense<0.000000e+00> : vector<16xf32>
    %12 = vector.multi_reduction <add>, %11, %cst_9 [1] : vector<16x128xf32> to vector<16xf32>
    %13 = vector.shape_cast %12 : vector<16xf32> to vector<16x1xf32>
    %cst_10 = arith.constant 1.280000e+02 : f32
    %14 = vector.broadcast %cst_10 : f32 to vector<16x1xf32>
    %15 = arith.divf %13, %14 : vector<16x1xf32>
    %16 = vector.broadcast %8 : vector<16x1xf32> to vector<16x128xf32>
    %17 = arith.subf %4, %16 : vector<16x128xf32>
    %cst_11 = arith.constant 9.99999974E-6 : f32
    %18 = vector.broadcast %cst_11 : f32 to vector<16x1xf32>
    %19 = arith.addf %15, %18 : vector<16x1xf32>
    %20 = math.rsqrt %19 : vector<16x1xf32>
    %21 = vector.broadcast %20 : vector<16x1xf32> to vector<16x128xf32>
    %22 = arith.mulf %17, %21 : vector<16x128xf32>
    %cst_12 = arith.constant 0.000000e+00 : f32
    %23 = vector.broadcast %cst_12 : f32 to vector<16x128xf32>
    %24 = arith.maximumf %22, %23 : vector<16x128xf32>
    %c0_13 = arith.constant 0 : index
    %c0_14 = arith.constant 0 : index
    %25 = vector.load %arg3[%c0_13, %c0_14] : memref<16x16xbf16, #tpu.memory_space<vmem>>, vector<16x16xbf16>
    %26 = arith.truncf %24 : vector<16x128xf32> to vector<16x128xbf16>
    %cst_15 = arith.constant dense<0.000000e+00> : vector<16x128xf32>
    %27 = tpu.matmul %25, %26, %cst_15 {dimension_numbers = #tpu.dot_dimension_numbers<[1], [0], [0], [1], [0, 0, 1, 1], [], []>} : vector<16x16xbf16>, vector<16x128xbf16>, vector<16x128xf32> -> vector<16x128xf32>
    %cst_16 = arith.constant dense<0.000000e+00> : vector<16xf32>
    %28 = vector.multi_reduction <add>, %27, %cst_16 [1] : vector<16x128xf32> to vector<16xf32>
    %29 = vector.shape_cast %28 : vector<16xf32> to vector<16x1xf32>
    %cst_17 = arith.constant 1.280000e+02 : f32
    %30 = vector.broadcast %cst_17 : f32 to vector<16x1xf32>
    %31 = arith.divf %29, %30 : vector<16x1xf32>
    %32 = vector.broadcast %31 : vector<16x1xf32> to vector<16x128xf32>
    %33 = arith.subf %27, %32 : vector<16x128xf32>
    %34 = arith.mulf %33, %33 : vector<16x128xf32>
    %cst_18 = arith.constant dense<0.000000e+00> : vector<16xf32>
    %35 = vector.multi_reduction <add>, %34, %cst_18 [1] : vector<16x128xf32> to vector<16xf32>
    %36 = vector.shape_cast %35 : vector<16xf32> to vector<16x1xf32>
    %cst_19 = arith.constant 1.280000e+02 : f32
    %37 = vector.broadcast %cst_19 : f32 to vector<16x1xf32>
    %38 = arith.divf %36, %37 : vector<16x1xf32>
    %39 = vector.broadcast %31 : vector<16x1xf32> to vector<16x128xf32>
    %40 = arith.subf %27, %39 : vector<16x128xf32>
    %cst_20 = arith.constant 9.99999974E-6 : f32
    %41 = vector.broadcast %cst_20 : f32 to vector<16x1xf32>
    %42 = arith.addf %38, %41 : vector<16x1xf32>
    %43 = math.rsqrt %42 : vector<16x1xf32>
    %44 = vector.broadcast %43 : vector<16x1xf32> to vector<16x128xf32>
    %45 = arith.mulf %40, %44 : vector<16x128xf32>
    %cst_21 = arith.constant 0.000000e+00 : f32
    %46 = vector.broadcast %cst_21 : f32 to vector<16x128xf32>
    %47 = arith.maximumf %45, %46 : vector<16x128xf32>
    %c0_22 = arith.constant 0 : index
    %c128 = arith.constant 128 : index
    %48 = vector.load %arg8[%c0_22, %c128] : memref<16x384xf32, #tpu.memory_space<vmem>>, vector<16x128xf32>
    tpu.vector_store %arg8[%c0_22, %c128], %47 {strides = array<i32>} : memref<16x384xf32, #tpu.memory_space<vmem>>, vector<16x128xf32>,
    %c0_23 = arith.constant 0 : index
    %c119 = arith.constant 119 : index
    %49 = vector.load %arg8[%c0_23, %c119] : memref<16x384xf32, #tpu.memory_space<vmem>>, vector<16x128xf32>
    %c0_24 = arith.constant 0 : index
    %c120 = arith.constant 120 : index
    %50 = vector.load %arg8[%c0_24, %c120] : memref<16x384xf32, #tpu.memory_space<vmem>>, vector<16x128xf32>
    %c0_25 = arith.constant 0 : index
    %c121 = arith.constant 121 : index
    %51 = vector.load %arg8[%c0_25, %c121] : memref<16x384xf32, #tpu.memory_space<vmem>>, vector<16x128xf32>
    %c0_26 = arith.constant 0 : index
    %c127 = arith.constant 127 : index
    %52 = vector.load %arg8[%c0_26, %c127] : memref<16x384xf32, #tpu.memory_space<vmem>>, vector<16x128xf32>
    %c0_27 = arith.constant 0 : index
    %c128_28 = arith.constant 128 : index
    %53 = vector.load %arg8[%c0_27, %c128_28] : memref<16x384xf32, #tpu.memory_space<vmem>>, vector<16x128xf32>
    %c0_29 = arith.constant 0 : index
    %c129 = arith.constant 129 : index
    %54 = vector.load %arg8[%c0_29, %c129] : memref<16x384xf32, #tpu.memory_space<vmem>>, vector<16x128xf32>
    %c0_30 = arith.constant 0 : index
    %c135 = arith.constant 135 : index
    %55 = vector.load %arg8[%c0_30, %c135] : memref<16x384xf32, #tpu.memory_space<vmem>>, vector<16x128xf32>
    %c0_31 = arith.constant 0 : index
    %c136 = arith.constant 136 : index
    %56 = vector.load %arg8[%c0_31, %c136] : memref<16x384xf32, #tpu.memory_space<vmem>>, vector<16x128xf32>
    %c0_32 = arith.constant 0 : index
    %c137 = arith.constant 137 : index
    %57 = vector.load %arg8[%c0_32, %c137] : memref<16x384xf32, #tpu.memory_space<vmem>>, vector<16x128xf32>
    %58 = tpu.concatenate %49, %50, %51, %52, %53, %54, %55, %56, %57 in 0 : vector<16x128xf32>, vector<16x128xf32>, vector<16x128xf32>, vector<16x128xf32>, vector<16x128xf32>, vector<16x128xf32>, vector<16x128xf32>, vector<16x128xf32>, vector<16x128xf32> -> vector<144x128xf32>
    %c0_33 = arith.constant 0 : index
    %c0_34 = arith.constant 0 : index
    %59 = vector.load %arg2[%c0_33, %c0_34] : memref<144x128xf32, #tpu.memory_space<vmem>>, vector<144x128xf32>
    %60 = arith.mulf %58, %59 : vector<144x128xf32>
    %c0_35 = arith.constant 0 : index
    %c0_36 = arith.constant 0 : index
    %61 = vector.load %arg4[%c0_35, %c0_36] : memref<8x144xbf16, #tpu.memory_space<vmem>>, vector<8x144xbf16>
    %62 = arith.truncf %60 : vector<144x128xf32> to vector<144x128xbf16>
    %cst_37 = arith.constant dense<0.000000e+00> : vector<8x128xf32>
    %63 = tpu.matmul %61, %62, %cst_37 {dimension_numbers = #tpu.dot_dimension_numbers<[1], [0], [0], [1], [0, 0, 1, 1], [], []>} : vector<8x144xbf16>, vector<144x128xbf16>, vector<8x128xf32> -> vector<8x128xf32>
    %c16 = arith.constant 16 : index
    %c0_38 = arith.constant 0 : index
    %64 = vector.load %arg7[%c16, %c0_38] : memref<32x128xf32, #tpu.memory_space<vmem>>, vector<8x128xf32>
    tpu.vector_store %arg7[%c16, %c0_38], %63 {strides = array<i32>} : memref<32x128xf32, #tpu.memory_space<vmem>>, vector<8x128xf32>,
    %c0_39 = arith.constant 0 : index
    %c0_40 = arith.constant 0 : index
    %65 = vector.load %arg7[%c0_39, %c0_40] : memref<32x128xf32, #tpu.memory_space<vmem>>, vector<24x128xf32>
    %cst_41 = arith.constant dense<0.000000e+00> : vector<24xf32>
    %66 = vector.multi_reduction <add>, %65, %cst_41 [1] : vector<24x128xf32> to vector<24xf32>
    %67 = vector.shape_cast %66 : vector<24xf32> to vector<24x1xf32>
    %cst_42 = arith.constant 1.280000e+02 : f32
    %68 = vector.broadcast %cst_42 : f32 to vector<24x1xf32>
    %69 = arith.divf %67, %68 : vector<24x1xf32>
    %70 = vector.broadcast %69 : vector<24x1xf32> to vector<24x128xf32>
    %71 = arith.subf %65, %70 : vector<24x128xf32>
    %72 = arith.mulf %71, %71 : vector<24x128xf32>
    %cst_43 = arith.constant dense<0.000000e+00> : vector<24xf32>
    %73 = vector.multi_reduction <add>, %72, %cst_43 [1] : vector<24x128xf32> to vector<24xf32>
    %74 = vector.shape_cast %73 : vector<24xf32> to vector<24x1xf32>
    %cst_44 = arith.constant 1.280000e+02 : f32
    %75 = vector.broadcast %cst_44 : f32 to vector<24x1xf32>
    %76 = arith.divf %74, %75 : vector<24x1xf32>
    %77 = vector.broadcast %69 : vector<24x1xf32> to vector<24x128xf32>
    %78 = arith.subf %65, %77 : vector<24x128xf32>
    %cst_45 = arith.constant 9.99999974E-6 : f32
    %79 = vector.broadcast %cst_45 : f32 to vector<24x1xf32>
    %80 = arith.addf %76, %79 : vector<24x1xf32>
    %81 = math.rsqrt %80 : vector<24x1xf32>
    %82 = vector.broadcast %81 : vector<24x1xf32> to vector<24x128xf32>
    %83 = arith.mulf %78, %82 : vector<24x128xf32>
    %cst_46 = arith.constant 0.000000e+00 : f32
    %84 = vector.broadcast %cst_46 : f32 to vector<24x128xf32>
    %85 = arith.maximumf %83, %84 : vector<24x128xf32>
    %c0_47 = arith.constant 0 : index
    %c0_48 = arith.constant 0 : index
    %86 = vector.load %arg5[%c0_47, %c0_48] : memref<16x24xbf16, #tpu.memory_space<vmem>>, vector<16x24xbf16>
    %87 = arith.truncf %85 : vector<24x128xf32> to vector<24x128xbf16>
    %cst_49 = arith.constant dense<0.000000e+00> : vector<16x128xf32>
    %88 = tpu.matmul %86, %87, %cst_49 {dimension_numbers = #tpu.dot_dimension_numbers<[1], [0], [0], [1], [0, 0, 1, 1], [], []>} : vector<16x24xbf16>, vector<24x128xbf16>, vector<16x128xf32> -> vector<16x128xf32>
    %cst_50 = arith.constant dense<0.000000e+00> : vector<16xf32>
    %89 = vector.multi_reduction <add>, %88, %cst_50 [1] : vector<16x128xf32> to vector<16xf32>
    %90 = vector.shape_cast %89 : vector<16xf32> to vector<16x1xf32>
    %cst_51 = arith.constant 1.280000e+02 : f32
    %91 = vector.broadcast %cst_51 : f32 to vector<16x1xf32>
    %92 = arith.divf %90, %91 : vector<16x1xf32>
    %93 = vector.broadcast %92 : vector<16x1xf32> to vector<16x128xf32>
    %94 = arith.subf %88, %93 : vector<16x128xf32>
    %95 = arith.mulf %94, %94 : vector<16x128xf32>
    %cst_52 = arith.constant dense<0.000000e+00> : vector<16xf32>
    %96 = vector.multi_reduction <add>, %95, %cst_52 [1] : vector<16x128xf32> to vector<16xf32>
    %97 = vector.shape_cast %96 : vector<16xf32> to vector<16x1xf32>
    %cst_53 = arith.constant 1.280000e+02 : f32
    %98 = vector.broadcast %cst_53 : f32 to vector<16x1xf32>
    %99 = arith.divf %97, %98 : vector<16x1xf32>
    %100 = vector.broadcast %92 : vector<16x1xf32> to vector<16x128xf32>
    %101 = arith.subf %88, %100 : vector<16x128xf32>
    %cst_54 = arith.constant 9.99999974E-6 : f32
    %102 = vector.broadcast %cst_54 : f32 to vector<16x1xf32>
    %103 = arith.addf %99, %102 : vector<16x1xf32>
    %104 = math.rsqrt %103 : vector<16x1xf32>
    %105 = vector.broadcast %104 : vector<16x1xf32> to vector<16x128xf32>
    %106 = arith.mulf %101, %105 : vector<16x128xf32>
    %cst_55 = arith.constant 0.000000e+00 : f32
    %107 = vector.broadcast %cst_55 : f32 to vector<16x128xf32>
    %108 = arith.maximumf %106, %107 : vector<16x128xf32>
    %c0_56 = arith.constant 0 : index
    %c128_57 = arith.constant 128 : index
    %109 = vector.load %arg8[%c0_56, %c128_57] : memref<16x384xf32, #tpu.memory_space<vmem>>, vector<16x128xf32>
    tpu.vector_store %arg8[%c0_56, %c128_57], %108 {strides = array<i32>} : memref<16x384xf32, #tpu.memory_space<vmem>>, vector<16x128xf32>,
    %c0_58 = arith.constant 0 : index
    %c119_59 = arith.constant 119 : index
    %110 = vector.load %arg8[%c0_58, %c119_59] : memref<16x384xf32, #tpu.memory_space<vmem>>, vector<16x128xf32>
    %c0_60 = arith.constant 0 : index
    %c120_61 = arith.constant 120 : index
    %111 = vector.load %arg8[%c0_60, %c120_61] : memref<16x384xf32, #tpu.memory_space<vmem>>, vector<16x128xf32>
    %c0_62 = arith.constant 0 : index
    %c121_63 = arith.constant 121 : index
    %112 = vector.load %arg8[%c0_62, %c121_63] : memref<16x384xf32, #tpu.memory_space<vmem>>, vector<16x128xf32>
    %c0_64 = arith.constant 0 : index
    %c127_65 = arith.constant 127 : index
    %113 = vector.load %arg8[%c0_64, %c127_65] : memref<16x384xf32, #tpu.memory_space<vmem>>, vector<16x128xf32>
    %c0_66 = arith.constant 0 : index
    %c128_67 = arith.constant 128 : index
    %114 = vector.load %arg8[%c0_66, %c128_67] : memref<16x384xf32, #tpu.memory_space<vmem>>, vector<16x128xf32>
    %c0_68 = arith.constant 0 : index
    %c129_69 = arith.constant 129 : index
    %115 = vector.load %arg8[%c0_68, %c129_69] : memref<16x384xf32, #tpu.memory_space<vmem>>, vector<16x128xf32>
    %c0_70 = arith.constant 0 : index
    %c135_71 = arith.constant 135 : index
    %116 = vector.load %arg8[%c0_70, %c135_71] : memref<16x384xf32, #tpu.memory_space<vmem>>, vector<16x128xf32>
    %c0_72 = arith.constant 0 : index
    %c136_73 = arith.constant 136 : index
    %117 = vector.load %arg8[%c0_72, %c136_73] : memref<16x384xf32, #tpu.memory_space<vmem>>, vector<16x128xf32>
    %c0_74 = arith.constant 0 : index
    %c137_75 = arith.constant 137 : index
    %118 = vector.load %arg8[%c0_74, %c137_75] : memref<16x384xf32, #tpu.memory_space<vmem>>, vector<16x128xf32>
    %119 = tpu.concatenate %110, %111, %112, %113, %114, %115, %116, %117, %118 in 0 : vector<16x128xf32>, vector<16x128xf32>, vector<16x128xf32>, vector<16x128xf32>, vector<16x128xf32>, vector<16x128xf32>, vector<16x128xf32>, vector<16x128xf32>, vector<16x128xf32> -> vector<144x128xf32>
    %c0_76 = arith.constant 0 : index
    %c0_77 = arith.constant 0 : index
    %120 = vector.load %arg2[%c0_76, %c0_77] : memref<144x128xf32, #tpu.memory_space<vmem>>, vector<144x128xf32>
    %121 = arith.mulf %119, %120 : vector<144x128xf32>
    %c0_78 = arith.constant 0 : index
    %c0_79 = arith.constant 0 : index
    %122 = vector.load %arg6[%c0_78, %c0_79] : memref<8x144xbf16, #tpu.memory_space<vmem>>, vector<8x144xbf16>
    %123 = arith.truncf %121 : vector<144x128xf32> to vector<144x128xbf16>
    %cst_80 = arith.constant dense<0.000000e+00> : vector<8x128xf32>
    %124 = tpu.matmul %122, %123, %cst_80 {dimension_numbers = #tpu.dot_dimension_numbers<[1], [0], [0], [1], [0, 0, 1, 1], [], []>} : vector<8x144xbf16>, vector<144x128xbf16>, vector<8x128xf32> -> vector<8x128xf32>
    %c24 = arith.constant 24 : index
    %c0_81 = arith.constant 0 : index
    %125 = vector.load %arg7[%c24, %c0_81] : memref<32x128xf32, #tpu.memory_space<vmem>>, vector<8x128xf32>
    tpu.vector_store %arg7[%c24, %c0_81], %124 {strides = array<i32>} : memref<32x128xf32, #tpu.memory_space<vmem>>, vector<8x128xf32>,
    return
  }
  func.func @transform_0(%arg0: i32) -> (i32, i32) {
    %c0_i32 = arith.constant 0 : i32
    %c0_i32_0 = arith.constant 0 : i32
    %c0_i32_1 = arith.constant 0 : i32
    return %c0_i32, %c0_i32_0 : i32, i32
  }
  func.func @transform_1(%arg0: i32) -> (i32, i32) {
    %c0_i32 = arith.constant 0 : i32
    %c0_i32_0 = arith.constant 0 : i32
    %c0_i32_1 = arith.constant 0 : i32
    return %c0_i32, %c0_i32_0 : i32, i32
  }
  func.func @transform_2(%arg0: i32) -> (i32, i32) {
    %c0_i32 = arith.constant 0 : i32
    %c0_i32_0 = arith.constant 0 : i32
    %c0_i32_1 = arith.constant 0 : i32
    return %c0_i32, %c0_i32_0 : i32, i32
  }
  func.func @transform_3(%arg0: i32) -> (i32, i32) {
    %c0_i32 = arith.constant 0 : i32
    %c0_i32_0 = arith.constant 0 : i32
    %c0_i32_1 = arith.constant 0 : i32
    return %c0_i32, %c0_i32_0 : i32, i32
  }
  func.func @transform_4(%arg0: i32) -> (i32, i32) {
    %c0_i32 = arith.constant 0 : i32
    %c0_i32_0 = arith.constant 0 : i32
    %c0_i32_1 = arith.constant 0 : i32
    return %c0_i32, %c0_i32_0 : i32, i32
  }
  func.func @transform_5(%arg0: i32) -> (i32, i32) {
    %c0_i32 = arith.constant 0 : i32
    %c0_i32_0 = arith.constant 0 : i32
    %c0_i32_1 = arith.constant 0 : i32
    return %c0_i32, %c0_i32_0 : i32, i32
  }
  func.func @transform_6(%arg0: i32) -> (i32, i32) {
    %c0_i32 = arith.constant 0 : i32
    %c0_i32_0 = arith.constant 0 : i32
    %c0_i32_1 = arith.constant 0 : i32
    return %c0_i32, %c0_i32_0 : i32, i32
  }
}

module attributes {stable_mosaic.version = 11 : i64} {
  func.func @_transition_kernel(%arg0: i32, %arg1: memref<32x128xf32, #tpu.memory_space<vmem>>, %arg2: memref<128x32xbf16, #tpu.memory_space<vmem>>, %arg3: memref<16x32xbf16, #tpu.memory_space<vmem>>, %arg4: memref<16x32xf32, #tpu.memory_space<vmem>>) attributes {dimension_semantics = [#tpu.dimension_semantics<arbitrary>], iteration_bounds = array<i64: 1>, scalar_prefetch = 0 : i64, scratch_operands = 0 : i64, tpu.core_type = #tpu.core_type<tc>, window_params = [{pipeline_mode = #tpu.pipeline_mode<synchronous>, transform_indices = @transform_0, window_bounds = array<i64: 32, 128>}, {pipeline_mode = #tpu.pipeline_mode<synchronous>, transform_indices = @transform_1, window_bounds = array<i64: 128, 32>}, {pipeline_mode = #tpu.pipeline_mode<synchronous>, transform_indices = @transform_2, window_bounds = array<i64: 16, 32>}, {pipeline_mode = #tpu.pipeline_mode<synchronous>, transform_indices = @transform_3, window_bounds = array<i64: 16, 32>}]} {
    %c0 = arith.constant 0 : index
    %c0_0 = arith.constant 0 : index
    %0 = vector.load %arg1[%c0, %c0_0] : memref<32x128xf32, #tpu.memory_space<vmem>>, vector<32x128xf32>
    %cst = arith.constant dense<0.000000e+00> : vector<32xf32>
    %1 = vector.multi_reduction <add>, %0, %cst [1] : vector<32x128xf32> to vector<32xf32>
    %2 = vector.shape_cast %1 : vector<32xf32> to vector<32x1xf32>
    %cst_1 = arith.constant 1.280000e+02 : f32
    %3 = vector.broadcast %cst_1 : f32 to vector<32x1xf32>
    %4 = arith.divf %2, %3 : vector<32x1xf32>
    %5 = vector.broadcast %4 : vector<32x1xf32> to vector<32x128xf32>
    %6 = arith.subf %0, %5 : vector<32x128xf32>
    %7 = arith.mulf %6, %6 : vector<32x128xf32>
    %cst_2 = arith.constant dense<0.000000e+00> : vector<32xf32>
    %8 = vector.multi_reduction <add>, %7, %cst_2 [1] : vector<32x128xf32> to vector<32xf32>
    %9 = vector.shape_cast %8 : vector<32xf32> to vector<32x1xf32>
    %cst_3 = arith.constant 1.280000e+02 : f32
    %10 = vector.broadcast %cst_3 : f32 to vector<32x1xf32>
    %11 = arith.divf %9, %10 : vector<32x1xf32>
    %12 = vector.broadcast %4 : vector<32x1xf32> to vector<32x128xf32>
    %13 = arith.subf %0, %12 : vector<32x128xf32>
    %cst_4 = arith.constant 9.99999974E-6 : f32
    %14 = vector.broadcast %cst_4 : f32 to vector<32x1xf32>
    %15 = arith.addf %11, %14 : vector<32x1xf32>
    %16 = math.rsqrt %15 : vector<32x1xf32>
    %17 = vector.broadcast %16 : vector<32x1xf32> to vector<32x128xf32>
    %18 = arith.mulf %13, %17 : vector<32x128xf32>
    %cst_5 = arith.constant 0.000000e+00 : f32
    %19 = vector.broadcast %cst_5 : f32 to vector<32x128xf32>
    %20 = arith.maximumf %18, %19 : vector<32x128xf32>
    %21 = arith.truncf %20 : vector<32x128xf32> to vector<32x128xbf16>
    %c0_6 = arith.constant 0 : index
    %c0_7 = arith.constant 0 : index
    %22 = vector.load %arg2[%c0_6, %c0_7] : memref<128x32xbf16, #tpu.memory_space<vmem>>, vector<128x32xbf16>
    %cst_8 = arith.constant dense<0.000000e+00> : vector<32x32xf32>
    %23 = tpu.matmul %21, %22, %cst_8 {dimension_numbers = #tpu.dot_dimension_numbers<[1], [0], [0], [1], [0, 0, 1, 1], [], []>} : vector<32x128xbf16>, vector<128x32xbf16>, vector<32x32xf32> -> vector<32x32xf32>
    %c0_9 = arith.constant 0 : index
    %c0_10 = arith.constant 0 : index
    %24 = vector.load %arg3[%c0_9, %c0_10] : memref<16x32xbf16, #tpu.memory_space<vmem>>, vector<16x32xbf16>
    %25 = arith.truncf %23 : vector<32x32xf32> to vector<32x32xbf16>
    %cst_11 = arith.constant dense<0.000000e+00> : vector<16x32xf32>
    %26 = tpu.matmul %24, %25, %cst_11 {dimension_numbers = #tpu.dot_dimension_numbers<[1], [0], [0], [1], [0, 0, 1, 1], [], []>} : vector<16x32xbf16>, vector<32x32xbf16>, vector<16x32xf32> -> vector<16x32xf32>
    %c0_12 = arith.constant 0 : index
    %c0_13 = arith.constant 0 : index
    %27 = vector.load %arg4[%c0_12, %c0_13] : memref<16x32xf32, #tpu.memory_space<vmem>>, vector<16x32xf32>
    tpu.vector_store %arg4[%c0_12, %c0_13], %26 {strides = array<i32>} : memref<16x32xf32, #tpu.memory_space<vmem>>, vector<16x32xf32>,
    return
  }
  func.func @transform_0(%arg0: i32) -> (i32, i32) {
    %c0_i32 = arith.constant 0 : i32
    %c0_i32_0 = arith.constant 0 : i32
    %c0_i32_1 = arith.constant 0 : i32
    return %c0_i32, %c0_i32_0 : i32, i32
  }
  func.func @transform_1(%arg0: i32) -> (i32, i32) {
    %c0_i32 = arith.constant 0 : i32
    %c0_i32_0 = arith.constant 0 : i32
    %c0_i32_1 = arith.constant 0 : i32
    return %c0_i32, %c0_i32_0 : i32, i32
  }
  func.func @transform_2(%arg0: i32) -> (i32, i32) {
    %c0_i32 = arith.constant 0 : i32
    %c0_i32_0 = arith.constant 0 : i32
    %c0_i32_1 = arith.constant 0 : i32
    return %c0_i32, %c0_i32_0 : i32, i32
  }
  func.func @transform_3(%arg0: i32) -> (i32, i32) {
    %c0_i32 = arith.constant 0 : i32
    %c0_i32_0 = arith.constant 0 : i32
    %c0_i32_1 = arith.constant 0 : i32
    return %c0_i32, %c0_i32_0 : i32, i32
  }
}

module attributes {stable_mosaic.version = 11 : i64} {
  func.func @_dense_block_kernel(%arg0: i32, %arg1: memref<16x32xf32, #tpu.memory_space<vmem>>, %arg2: memref<144x32xf32, #tpu.memory_space<vmem>>, %arg3: memref<16x16xbf16, #tpu.memory_space<vmem>>, %arg4: memref<8x144xbf16, #tpu.memory_space<vmem>>, %arg5: memref<16x24xbf16, #tpu.memory_space<vmem>>, %arg6: memref<8x144xbf16, #tpu.memory_space<vmem>>, %arg7: memref<32x32xf32, #tpu.memory_space<vmem>>, %arg8: memref<16x288xf32, #tpu.memory_space<vmem>>) attributes {dimension_semantics = [#tpu.dimension_semantics<arbitrary>], iteration_bounds = array<i64: 1>, scalar_prefetch = 0 : i64, scratch_operands = 1 : i64, tpu.core_type = #tpu.core_type<tc>, window_params = [{pipeline_mode = #tpu.pipeline_mode<synchronous>, transform_indices = @transform_0, window_bounds = array<i64: 16, 32>}, {pipeline_mode = #tpu.pipeline_mode<synchronous>, transform_indices = @transform_1, window_bounds = array<i64: 144, 32>}, {pipeline_mode = #tpu.pipeline_mode<synchronous>, transform_indices = @transform_2, window_bounds = array<i64: 16, 16>}, {pipeline_mode = #tpu.pipeline_mode<synchronous>, transform_indices = @transform_3, window_bounds = array<i64: 8, 144>}, {pipeline_mode = #tpu.pipeline_mode<synchronous>, transform_indices = @transform_4, window_bounds = array<i64: 16, 24>}, {pipeline_mode = #tpu.pipeline_mode<synchronous>, transform_indices = @transform_5, window_bounds = array<i64: 8, 144>}, {pipeline_mode = #tpu.pipeline_mode<synchronous>, transform_indices = @transform_6, window_bounds = array<i64: 32, 32>}]} {
    %c0 = arith.constant 0 : index
    %c0_0 = arith.constant 0 : index
    %0 = vector.load %arg1[%c0, %c0_0] : memref<16x32xf32, #tpu.memory_space<vmem>>, vector<16x32xf32>
    %c0_1 = arith.constant 0 : index
    %c0_2 = arith.constant 0 : index
    %1 = vector.load %arg7[%c0_1, %c0_2] : memref<32x32xf32, #tpu.memory_space<vmem>>, vector<16x32xf32>
    tpu.vector_store %arg7[%c0_1, %c0_2], %0 {strides = array<i32>} : memref<32x32xf32, #tpu.memory_space<vmem>>, vector<16x32xf32>,
    %cst = arith.constant 0.000000e+00 : f32
    %2 = vector.broadcast %cst : f32 to vector<16x288xf32>
    %c0_3 = arith.constant 0 : index
    %c0_4 = arith.constant 0 : index
    %3 = vector.load %arg8[%c0_3, %c0_4] : memref<16x288xf32, #tpu.memory_space<vmem>>, vector<16x288xf32>
    tpu.vector_store %arg8[%c0_3, %c0_4], %2 {strides = array<i32>} : memref<16x288xf32, #tpu.memory_space<vmem>>, vector<16x288xf32>,
    %c0_5 = arith.constant 0 : index
    %c0_6 = arith.constant 0 : index
    %4 = vector.load %arg7[%c0_5, %c0_6] : memref<32x32xf32, #tpu.memory_space<vmem>>, vector<16x32xf32>
    %cst_7 = arith.constant dense<0.000000e+00> : vector<16xf32>
    %5 = vector.multi_reduction <add>, %4, %cst_7 [1] : vector<16x32xf32> to vector<16xf32>
    %6 = vector.shape_cast %5 : vector<16xf32> to vector<16x1xf32>
    %cst_8 = arith.constant 3.200000e+01 : f32
    %7 = vector.broadcast %cst_8 : f32 to vector<16x1xf32>
    %8 = arith.divf %6, %7 : vector<16x1xf32>
    %9 = vector.broadcast %8 : vector<16x1xf32> to vector<16x32xf32>
    %10 = arith.subf %4, %9 : vector<16x32xf32>
    %11 = arith.mulf %10, %10 : vector<16x32xf32>
    %cst_9 = arith.constant dense<0.000000e+00> : vector<16xf32>
    %12 = vector.multi_reduction <add>, %11, %cst_9 [1] : vector<16x32xf32> to vector<16xf32>
    %13 = vector.shape_cast %12 : vector<16xf32> to vector<16x1xf32>
    %cst_10 = arith.constant 3.200000e+01 : f32
    %14 = vector.broadcast %cst_10 : f32 to vector<16x1xf32>
    %15 = arith.divf %13, %14 : vector<16x1xf32>
    %16 = vector.broadcast %8 : vector<16x1xf32> to vector<16x32xf32>
    %17 = arith.subf %4, %16 : vector<16x32xf32>
    %cst_11 = arith.constant 9.99999974E-6 : f32
    %18 = vector.broadcast %cst_11 : f32 to vector<16x1xf32>
    %19 = arith.addf %15, %18 : vector<16x1xf32>
    %20 = math.rsqrt %19 : vector<16x1xf32>
    %21 = vector.broadcast %20 : vector<16x1xf32> to vector<16x32xf32>
    %22 = arith.mulf %17, %21 : vector<16x32xf32>
    %cst_12 = arith.constant 0.000000e+00 : f32
    %23 = vector.broadcast %cst_12 : f32 to vector<16x32xf32>
    %24 = arith.maximumf %22, %23 : vector<16x32xf32>
    %c0_13 = arith.constant 0 : index
    %c0_14 = arith.constant 0 : index
    %25 = vector.load %arg3[%c0_13, %c0_14] : memref<16x16xbf16, #tpu.memory_space<vmem>>, vector<16x16xbf16>
    %26 = arith.truncf %24 : vector<16x32xf32> to vector<16x32xbf16>
    %cst_15 = arith.constant dense<0.000000e+00> : vector<16x32xf32>
    %27 = tpu.matmul %25, %26, %cst_15 {dimension_numbers = #tpu.dot_dimension_numbers<[1], [0], [0], [1], [0, 0, 1, 1], [], []>} : vector<16x16xbf16>, vector<16x32xbf16>, vector<16x32xf32> -> vector<16x32xf32>
    %cst_16 = arith.constant dense<0.000000e+00> : vector<16xf32>
    %28 = vector.multi_reduction <add>, %27, %cst_16 [1] : vector<16x32xf32> to vector<16xf32>
    %29 = vector.shape_cast %28 : vector<16xf32> to vector<16x1xf32>
    %cst_17 = arith.constant 3.200000e+01 : f32
    %30 = vector.broadcast %cst_17 : f32 to vector<16x1xf32>
    %31 = arith.divf %29, %30 : vector<16x1xf32>
    %32 = vector.broadcast %31 : vector<16x1xf32> to vector<16x32xf32>
    %33 = arith.subf %27, %32 : vector<16x32xf32>
    %34 = arith.mulf %33, %33 : vector<16x32xf32>
    %cst_18 = arith.constant dense<0.000000e+00> : vector<16xf32>
    %35 = vector.multi_reduction <add>, %34, %cst_18 [1] : vector<16x32xf32> to vector<16xf32>
    %36 = vector.shape_cast %35 : vector<16xf32> to vector<16x1xf32>
    %cst_19 = arith.constant 3.200000e+01 : f32
    %37 = vector.broadcast %cst_19 : f32 to vector<16x1xf32>
    %38 = arith.divf %36, %37 : vector<16x1xf32>
    %39 = vector.broadcast %31 : vector<16x1xf32> to vector<16x32xf32>
    %40 = arith.subf %27, %39 : vector<16x32xf32>
    %cst_20 = arith.constant 9.99999974E-6 : f32
    %41 = vector.broadcast %cst_20 : f32 to vector<16x1xf32>
    %42 = arith.addf %38, %41 : vector<16x1xf32>
    %43 = math.rsqrt %42 : vector<16x1xf32>
    %44 = vector.broadcast %43 : vector<16x1xf32> to vector<16x32xf32>
    %45 = arith.mulf %40, %44 : vector<16x32xf32>
    %cst_21 = arith.constant 0.000000e+00 : f32
    %46 = vector.broadcast %cst_21 : f32 to vector<16x32xf32>
    %47 = arith.maximumf %45, %46 : vector<16x32xf32>
    %c0_22 = arith.constant 0 : index
    %c128 = arith.constant 128 : index
    %48 = vector.load %arg8[%c0_22, %c128] : memref<16x288xf32, #tpu.memory_space<vmem>>, vector<16x32xf32>
    tpu.vector_store %arg8[%c0_22, %c128], %47 {strides = array<i32>} : memref<16x288xf32, #tpu.memory_space<vmem>>, vector<16x32xf32>,
    %c0_23 = arith.constant 0 : index
    %c123 = arith.constant 123 : index
    %49 = vector.load %arg8[%c0_23, %c123] : memref<16x288xf32, #tpu.memory_space<vmem>>, vector<16x32xf32>
    %c0_24 = arith.constant 0 : index
    %c124 = arith.constant 124 : index
    %50 = vector.load %arg8[%c0_24, %c124] : memref<16x288xf32, #tpu.memory_space<vmem>>, vector<16x32xf32>
    %c0_25 = arith.constant 0 : index
    %c125 = arith.constant 125 : index
    %51 = vector.load %arg8[%c0_25, %c125] : memref<16x288xf32, #tpu.memory_space<vmem>>, vector<16x32xf32>
    %c0_26 = arith.constant 0 : index
    %c127 = arith.constant 127 : index
    %52 = vector.load %arg8[%c0_26, %c127] : memref<16x288xf32, #tpu.memory_space<vmem>>, vector<16x32xf32>
    %c0_27 = arith.constant 0 : index
    %c128_28 = arith.constant 128 : index
    %53 = vector.load %arg8[%c0_27, %c128_28] : memref<16x288xf32, #tpu.memory_space<vmem>>, vector<16x32xf32>
    %c0_29 = arith.constant 0 : index
    %c129 = arith.constant 129 : index
    %54 = vector.load %arg8[%c0_29, %c129] : memref<16x288xf32, #tpu.memory_space<vmem>>, vector<16x32xf32>
    %c0_30 = arith.constant 0 : index
    %c131 = arith.constant 131 : index
    %55 = vector.load %arg8[%c0_30, %c131] : memref<16x288xf32, #tpu.memory_space<vmem>>, vector<16x32xf32>
    %c0_31 = arith.constant 0 : index
    %c132 = arith.constant 132 : index
    %56 = vector.load %arg8[%c0_31, %c132] : memref<16x288xf32, #tpu.memory_space<vmem>>, vector<16x32xf32>
    %c0_32 = arith.constant 0 : index
    %c133 = arith.constant 133 : index
    %57 = vector.load %arg8[%c0_32, %c133] : memref<16x288xf32, #tpu.memory_space<vmem>>, vector<16x32xf32>
    %58 = tpu.concatenate %49, %50, %51, %52, %53, %54, %55, %56, %57 in 0 : vector<16x32xf32>, vector<16x32xf32>, vector<16x32xf32>, vector<16x32xf32>, vector<16x32xf32>, vector<16x32xf32>, vector<16x32xf32>, vector<16x32xf32>, vector<16x32xf32> -> vector<144x32xf32>
    %c0_33 = arith.constant 0 : index
    %c0_34 = arith.constant 0 : index
    %59 = vector.load %arg2[%c0_33, %c0_34] : memref<144x32xf32, #tpu.memory_space<vmem>>, vector<144x32xf32>
    %60 = arith.mulf %58, %59 : vector<144x32xf32>
    %c0_35 = arith.constant 0 : index
    %c0_36 = arith.constant 0 : index
    %61 = vector.load %arg4[%c0_35, %c0_36] : memref<8x144xbf16, #tpu.memory_space<vmem>>, vector<8x144xbf16>
    %62 = arith.truncf %60 : vector<144x32xf32> to vector<144x32xbf16>
    %cst_37 = arith.constant dense<0.000000e+00> : vector<8x32xf32>
    %63 = tpu.matmul %61, %62, %cst_37 {dimension_numbers = #tpu.dot_dimension_numbers<[1], [0], [0], [1], [0, 0, 1, 1], [], []>} : vector<8x144xbf16>, vector<144x32xbf16>, vector<8x32xf32> -> vector<8x32xf32>
    %c16 = arith.constant 16 : index
    %c0_38 = arith.constant 0 : index
    %64 = vector.load %arg7[%c16, %c0_38] : memref<32x32xf32, #tpu.memory_space<vmem>>, vector<8x32xf32>
    tpu.vector_store %arg7[%c16, %c0_38], %63 {strides = array<i32>} : memref<32x32xf32, #tpu.memory_space<vmem>>, vector<8x32xf32>,
    %c0_39 = arith.constant 0 : index
    %c0_40 = arith.constant 0 : index
    %65 = vector.load %arg7[%c0_39, %c0_40] : memref<32x32xf32, #tpu.memory_space<vmem>>, vector<24x32xf32>
    %cst_41 = arith.constant dense<0.000000e+00> : vector<24xf32>
    %66 = vector.multi_reduction <add>, %65, %cst_41 [1] : vector<24x32xf32> to vector<24xf32>
    %67 = vector.shape_cast %66 : vector<24xf32> to vector<24x1xf32>
    %cst_42 = arith.constant 3.200000e+01 : f32
    %68 = vector.broadcast %cst_42 : f32 to vector<24x1xf32>
    %69 = arith.divf %67, %68 : vector<24x1xf32>
    %70 = vector.broadcast %69 : vector<24x1xf32> to vector<24x32xf32>
    %71 = arith.subf %65, %70 : vector<24x32xf32>
    %72 = arith.mulf %71, %71 : vector<24x32xf32>
    %cst_43 = arith.constant dense<0.000000e+00> : vector<24xf32>
    %73 = vector.multi_reduction <add>, %72, %cst_43 [1] : vector<24x32xf32> to vector<24xf32>
    %74 = vector.shape_cast %73 : vector<24xf32> to vector<24x1xf32>
    %cst_44 = arith.constant 3.200000e+01 : f32
    %75 = vector.broadcast %cst_44 : f32 to vector<24x1xf32>
    %76 = arith.divf %74, %75 : vector<24x1xf32>
    %77 = vector.broadcast %69 : vector<24x1xf32> to vector<24x32xf32>
    %78 = arith.subf %65, %77 : vector<24x32xf32>
    %cst_45 = arith.constant 9.99999974E-6 : f32
    %79 = vector.broadcast %cst_45 : f32 to vector<24x1xf32>
    %80 = arith.addf %76, %79 : vector<24x1xf32>
    %81 = math.rsqrt %80 : vector<24x1xf32>
    %82 = vector.broadcast %81 : vector<24x1xf32> to vector<24x32xf32>
    %83 = arith.mulf %78, %82 : vector<24x32xf32>
    %cst_46 = arith.constant 0.000000e+00 : f32
    %84 = vector.broadcast %cst_46 : f32 to vector<24x32xf32>
    %85 = arith.maximumf %83, %84 : vector<24x32xf32>
    %c0_47 = arith.constant 0 : index
    %c0_48 = arith.constant 0 : index
    %86 = vector.load %arg5[%c0_47, %c0_48] : memref<16x24xbf16, #tpu.memory_space<vmem>>, vector<16x24xbf16>
    %87 = arith.truncf %85 : vector<24x32xf32> to vector<24x32xbf16>
    %cst_49 = arith.constant dense<0.000000e+00> : vector<16x32xf32>
    %88 = tpu.matmul %86, %87, %cst_49 {dimension_numbers = #tpu.dot_dimension_numbers<[1], [0], [0], [1], [0, 0, 1, 1], [], []>} : vector<16x24xbf16>, vector<24x32xbf16>, vector<16x32xf32> -> vector<16x32xf32>
    %cst_50 = arith.constant dense<0.000000e+00> : vector<16xf32>
    %89 = vector.multi_reduction <add>, %88, %cst_50 [1] : vector<16x32xf32> to vector<16xf32>
    %90 = vector.shape_cast %89 : vector<16xf32> to vector<16x1xf32>
    %cst_51 = arith.constant 3.200000e+01 : f32
    %91 = vector.broadcast %cst_51 : f32 to vector<16x1xf32>
    %92 = arith.divf %90, %91 : vector<16x1xf32>
    %93 = vector.broadcast %92 : vector<16x1xf32> to vector<16x32xf32>
    %94 = arith.subf %88, %93 : vector<16x32xf32>
    %95 = arith.mulf %94, %94 : vector<16x32xf32>
    %cst_52 = arith.constant dense<0.000000e+00> : vector<16xf32>
    %96 = vector.multi_reduction <add>, %95, %cst_52 [1] : vector<16x32xf32> to vector<16xf32>
    %97 = vector.shape_cast %96 : vector<16xf32> to vector<16x1xf32>
    %cst_53 = arith.constant 3.200000e+01 : f32
    %98 = vector.broadcast %cst_53 : f32 to vector<16x1xf32>
    %99 = arith.divf %97, %98 : vector<16x1xf32>
    %100 = vector.broadcast %92 : vector<16x1xf32> to vector<16x32xf32>
    %101 = arith.subf %88, %100 : vector<16x32xf32>
    %cst_54 = arith.constant 9.99999974E-6 : f32
    %102 = vector.broadcast %cst_54 : f32 to vector<16x1xf32>
    %103 = arith.addf %99, %102 : vector<16x1xf32>
    %104 = math.rsqrt %103 : vector<16x1xf32>
    %105 = vector.broadcast %104 : vector<16x1xf32> to vector<16x32xf32>
    %106 = arith.mulf %101, %105 : vector<16x32xf32>
    %cst_55 = arith.constant 0.000000e+00 : f32
    %107 = vector.broadcast %cst_55 : f32 to vector<16x32xf32>
    %108 = arith.maximumf %106, %107 : vector<16x32xf32>
    %c0_56 = arith.constant 0 : index
    %c128_57 = arith.constant 128 : index
    %109 = vector.load %arg8[%c0_56, %c128_57] : memref<16x288xf32, #tpu.memory_space<vmem>>, vector<16x32xf32>
    tpu.vector_store %arg8[%c0_56, %c128_57], %108 {strides = array<i32>} : memref<16x288xf32, #tpu.memory_space<vmem>>, vector<16x32xf32>,
    %c0_58 = arith.constant 0 : index
    %c123_59 = arith.constant 123 : index
    %110 = vector.load %arg8[%c0_58, %c123_59] : memref<16x288xf32, #tpu.memory_space<vmem>>, vector<16x32xf32>
    %c0_60 = arith.constant 0 : index
    %c124_61 = arith.constant 124 : index
    %111 = vector.load %arg8[%c0_60, %c124_61] : memref<16x288xf32, #tpu.memory_space<vmem>>, vector<16x32xf32>
    %c0_62 = arith.constant 0 : index
    %c125_63 = arith.constant 125 : index
    %112 = vector.load %arg8[%c0_62, %c125_63] : memref<16x288xf32, #tpu.memory_space<vmem>>, vector<16x32xf32>
    %c0_64 = arith.constant 0 : index
    %c127_65 = arith.constant 127 : index
    %113 = vector.load %arg8[%c0_64, %c127_65] : memref<16x288xf32, #tpu.memory_space<vmem>>, vector<16x32xf32>
    %c0_66 = arith.constant 0 : index
    %c128_67 = arith.constant 128 : index
    %114 = vector.load %arg8[%c0_66, %c128_67] : memref<16x288xf32, #tpu.memory_space<vmem>>, vector<16x32xf32>
    %c0_68 = arith.constant 0 : index
    %c129_69 = arith.constant 129 : index
    %115 = vector.load %arg8[%c0_68, %c129_69] : memref<16x288xf32, #tpu.memory_space<vmem>>, vector<16x32xf32>
    %c0_70 = arith.constant 0 : index
    %c131_71 = arith.constant 131 : index
    %116 = vector.load %arg8[%c0_70, %c131_71] : memref<16x288xf32, #tpu.memory_space<vmem>>, vector<16x32xf32>
    %c0_72 = arith.constant 0 : index
    %c132_73 = arith.constant 132 : index
    %117 = vector.load %arg8[%c0_72, %c132_73] : memref<16x288xf32, #tpu.memory_space<vmem>>, vector<16x32xf32>
    %c0_74 = arith.constant 0 : index
    %c133_75 = arith.constant 133 : index
    %118 = vector.load %arg8[%c0_74, %c133_75] : memref<16x288xf32, #tpu.memory_space<vmem>>, vector<16x32xf32>
    %119 = tpu.concatenate %110, %111, %112, %113, %114, %115, %116, %117, %118 in 0 : vector<16x32xf32>, vector<16x32xf32>, vector<16x32xf32>, vector<16x32xf32>, vector<16x32xf32>, vector<16x32xf32>, vector<16x32xf32>, vector<16x32xf32>, vector<16x32xf32> -> vector<144x32xf32>
    %c0_76 = arith.constant 0 : index
    %c0_77 = arith.constant 0 : index
    %120 = vector.load %arg2[%c0_76, %c0_77] : memref<144x32xf32, #tpu.memory_space<vmem>>, vector<144x32xf32>
    %121 = arith.mulf %119, %120 : vector<144x32xf32>
    %c0_78 = arith.constant 0 : index
    %c0_79 = arith.constant 0 : index
    %122 = vector.load %arg6[%c0_78, %c0_79] : memref<8x144xbf16, #tpu.memory_space<vmem>>, vector<8x144xbf16>
    %123 = arith.truncf %121 : vector<144x32xf32> to vector<144x32xbf16>
    %cst_80 = arith.constant dense<0.000000e+00> : vector<8x32xf32>
    %124 = tpu.matmul %122, %123, %cst_80 {dimension_numbers = #tpu.dot_dimension_numbers<[1], [0], [0], [1], [0, 0, 1, 1], [], []>} : vector<8x144xbf16>, vector<144x32xbf16>, vector<8x32xf32> -> vector<8x32xf32>
    %c24 = arith.constant 24 : index
    %c0_81 = arith.constant 0 : index
    %125 = vector.load %arg7[%c24, %c0_81] : memref<32x32xf32, #tpu.memory_space<vmem>>, vector<8x32xf32>
    tpu.vector_store %arg7[%c24, %c0_81], %124 {strides = array<i32>} : memref<32x32xf32, #tpu.memory_space<vmem>>, vector<8x32xf32>,
    return
  }
  func.func @transform_0(%arg0: i32) -> (i32, i32) {
    %c0_i32 = arith.constant 0 : i32
    %c0_i32_0 = arith.constant 0 : i32
    %c0_i32_1 = arith.constant 0 : i32
    return %c0_i32, %c0_i32_0 : i32, i32
  }
  func.func @transform_1(%arg0: i32) -> (i32, i32) {
    %c0_i32 = arith.constant 0 : i32
    %c0_i32_0 = arith.constant 0 : i32
    %c0_i32_1 = arith.constant 0 : i32
    return %c0_i32, %c0_i32_0 : i32, i32
  }
  func.func @transform_2(%arg0: i32) -> (i32, i32) {
    %c0_i32 = arith.constant 0 : i32
    %c0_i32_0 = arith.constant 0 : i32
    %c0_i32_1 = arith.constant 0 : i32
    return %c0_i32, %c0_i32_0 : i32, i32
  }
  func.func @transform_3(%arg0: i32) -> (i32, i32) {
    %c0_i32 = arith.constant 0 : i32
    %c0_i32_0 = arith.constant 0 : i32
    %c0_i32_1 = arith.constant 0 : i32
    return %c0_i32, %c0_i32_0 : i32, i32
  }
  func.func @transform_4(%arg0: i32) -> (i32, i32) {
    %c0_i32 = arith.constant 0 : i32
    %c0_i32_0 = arith.constant 0 : i32
    %c0_i32_1 = arith.constant 0 : i32
    return %c0_i32, %c0_i32_0 : i32, i32
  }
  func.func @transform_5(%arg0: i32) -> (i32, i32) {
    %c0_i32 = arith.constant 0 : i32
    %c0_i32_0 = arith.constant 0 : i32
    %c0_i32_1 = arith.constant 0 : i32
    return %c0_i32, %c0_i32_0 : i32, i32
  }
  func.func @transform_6(%arg0: i32) -> (i32, i32) {
    %c0_i32 = arith.constant 0 : i32
    %c0_i32_0 = arith.constant 0 : i32
    %c0_i32_1 = arith.constant 0 : i32
    return %c0_i32, %c0_i32_0 : i32, i32
  }
}

module attributes {stable_mosaic.version = 11 : i64} {
  func.func @_head_kernel(%arg0: i32, %arg1: memref<32x32xf32, #tpu.memory_space<vmem>>, %arg2: memref<32x2xbf16, #tpu.memory_space<vmem>>, %arg3: memref<32x2xf32, #tpu.memory_space<vmem>>, %arg4: memref<20x32xbf16, #tpu.memory_space<vmem>>, %arg5: memref<20x1xf32, #tpu.memory_space<vmem>>, %arg6: memref<20x2xf32, #tpu.memory_space<vmem>>) attributes {dimension_semantics = [#tpu.dimension_semantics<arbitrary>], iteration_bounds = array<i64: 1>, scalar_prefetch = 0 : i64, scratch_operands = 0 : i64, tpu.core_type = #tpu.core_type<tc>, window_params = [{pipeline_mode = #tpu.pipeline_mode<synchronous>, transform_indices = @transform_0, window_bounds = array<i64: 32, 32>}, {pipeline_mode = #tpu.pipeline_mode<synchronous>, transform_indices = @transform_1, window_bounds = array<i64: 32, 2>}, {pipeline_mode = #tpu.pipeline_mode<synchronous>, transform_indices = @transform_2, window_bounds = array<i64: 32, 2>}, {pipeline_mode = #tpu.pipeline_mode<synchronous>, transform_indices = @transform_3, window_bounds = array<i64: 20, 32>}, {pipeline_mode = #tpu.pipeline_mode<synchronous>, transform_indices = @transform_4, window_bounds = array<i64: 20, 1>}, {pipeline_mode = #tpu.pipeline_mode<synchronous>, transform_indices = @transform_5, window_bounds = array<i64: 20, 2>}]} {
    %c0 = arith.constant 0 : index
    %c0_0 = arith.constant 0 : index
    %0 = vector.load %arg1[%c0, %c0_0] : memref<32x32xf32, #tpu.memory_space<vmem>>, vector<32x32xf32>
    %cst = arith.constant dense<0.000000e+00> : vector<32xf32>
    %1 = vector.multi_reduction <add>, %0, %cst [1] : vector<32x32xf32> to vector<32xf32>
    %2 = vector.shape_cast %1 : vector<32xf32> to vector<32x1xf32>
    %cst_1 = arith.constant 3.200000e+01 : f32
    %3 = vector.broadcast %cst_1 : f32 to vector<32x1xf32>
    %4 = arith.divf %2, %3 : vector<32x1xf32>
    %5 = vector.broadcast %4 : vector<32x1xf32> to vector<32x32xf32>
    %6 = arith.subf %0, %5 : vector<32x32xf32>
    %7 = arith.mulf %6, %6 : vector<32x32xf32>
    %cst_2 = arith.constant dense<0.000000e+00> : vector<32xf32>
    %8 = vector.multi_reduction <add>, %7, %cst_2 [1] : vector<32x32xf32> to vector<32xf32>
    %9 = vector.shape_cast %8 : vector<32xf32> to vector<32x1xf32>
    %cst_3 = arith.constant 3.200000e+01 : f32
    %10 = vector.broadcast %cst_3 : f32 to vector<32x1xf32>
    %11 = arith.divf %9, %10 : vector<32x1xf32>
    %12 = vector.broadcast %4 : vector<32x1xf32> to vector<32x32xf32>
    %13 = arith.subf %0, %12 : vector<32x32xf32>
    %cst_4 = arith.constant 9.99999974E-6 : f32
    %14 = vector.broadcast %cst_4 : f32 to vector<32x1xf32>
    %15 = arith.addf %11, %14 : vector<32x1xf32>
    %16 = math.rsqrt %15 : vector<32x1xf32>
    %17 = vector.broadcast %16 : vector<32x1xf32> to vector<32x32xf32>
    %18 = arith.mulf %13, %17 : vector<32x32xf32>
    %cst_5 = arith.constant 0.000000e+00 : f32
    %19 = vector.broadcast %cst_5 : f32 to vector<32x32xf32>
    %20 = arith.maximumf %18, %19 : vector<32x32xf32>
    %21 = arith.truncf %20 : vector<32x32xf32> to vector<32x32xbf16>
    %c0_6 = arith.constant 0 : index
    %c0_7 = arith.constant 0 : index
    %22 = vector.load %arg2[%c0_6, %c0_7] : memref<32x2xbf16, #tpu.memory_space<vmem>>, vector<32x2xbf16>
    %cst_8 = arith.constant dense<0.000000e+00> : vector<32x2xf32>
    %23 = tpu.matmul %21, %22, %cst_8 {dimension_numbers = #tpu.dot_dimension_numbers<[1], [0], [0], [1], [0, 0, 1, 1], [], []>} : vector<32x32xbf16>, vector<32x2xbf16>, vector<32x2xf32> -> vector<32x2xf32>
    %c0_9 = arith.constant 0 : index
    %c0_10 = arith.constant 0 : index
    %24 = vector.load %arg3[%c0_9, %c0_10] : memref<32x2xf32, #tpu.memory_space<vmem>>, vector<32x2xf32>
    %25 = arith.mulf %23, %24 : vector<32x2xf32>
    %c0_11 = arith.constant 0 : index
    %c0_12 = arith.constant 0 : index
    %26 = vector.load %arg4[%c0_11, %c0_12] : memref<20x32xbf16, #tpu.memory_space<vmem>>, vector<20x32xbf16>
    %27 = arith.truncf %25 : vector<32x2xf32> to vector<32x2xbf16>
    %cst_13 = arith.constant dense<0.000000e+00> : vector<20x2xf32>
    %28 = tpu.matmul %26, %27, %cst_13 {dimension_numbers = #tpu.dot_dimension_numbers<[1], [0], [0], [1], [0, 0, 1, 1], [], []>} : vector<20x32xbf16>, vector<32x2xbf16>, vector<20x2xf32> -> vector<20x2xf32>
    %c0_14 = arith.constant 0 : index
    %c0_15 = arith.constant 0 : index
    %29 = vector.load %arg5[%c0_14, %c0_15] : memref<20x1xf32, #tpu.memory_space<vmem>>, vector<20x1xf32>
    %30 = vector.broadcast %29 : vector<20x1xf32> to vector<20x2xf32>
    %31 = arith.addf %28, %30 : vector<20x2xf32>
    %c0_16 = arith.constant 0 : index
    %c0_17 = arith.constant 0 : index
    %32 = vector.load %arg6[%c0_16, %c0_17] : memref<20x2xf32, #tpu.memory_space<vmem>>, vector<20x2xf32>
    tpu.vector_store %arg6[%c0_16, %c0_17], %31 {strides = array<i32>} : memref<20x2xf32, #tpu.memory_space<vmem>>, vector<20x2xf32>,
    return
  }
  func.func @transform_0(%arg0: i32) -> (i32, i32) {
    %c0_i32 = arith.constant 0 : i32
    %c0_i32_0 = arith.constant 0 : i32
    %c0_i32_1 = arith.constant 0 : i32
    return %c0_i32, %c0_i32_0 : i32, i32
  }
  func.func @transform_1(%arg0: i32) -> (i32, i32) {
    %c0_i32 = arith.constant 0 : i32
    %c0_i32_0 = arith.constant 0 : i32
    %c0_i32_1 = arith.constant 0 : i32
    return %c0_i32, %c0_i32_0 : i32, i32
  }
  func.func @transform_2(%arg0: i32) -> (i32, i32) {
    %c0_i32 = arith.constant 0 : i32
    %c0_i32_0 = arith.constant 0 : i32
    %c0_i32_1 = arith.constant 0 : i32
    return %c0_i32, %c0_i32_0 : i32, i32
  }
  func.func @transform_3(%arg0: i32) -> (i32, i32) {
    %c0_i32 = arith.constant 0 : i32
    %c0_i32_0 = arith.constant 0 : i32
    %c0_i32_1 = arith.constant 0 : i32
    return %c0_i32, %c0_i32_0 : i32, i32
  }
  func.func @transform_4(%arg0: i32) -> (i32, i32) {
    %c0_i32 = arith.constant 0 : i32
    %c0_i32_0 = arith.constant 0 : i32
    %c0_i32_1 = arith.constant 0 : i32
    return %c0_i32, %c0_i32_0 : i32, i32
  }
  func.func @transform_5(%arg0: i32) -> (i32, i32) {
    %c0_i32 = arith.constant 0 : i32
    %c0_i32_0 = arith.constant 0 : i32
    %c0_i32_1 = arith.constant 0 : i32
    return %c0_i32, %c0_i32_0 : i32, i32
  }
}

</mosaic_0001>

<bundles_post_ra>
// kernel: forward.5
= control target key start
LH: loop header
LB: loop body
LE: loop exit
PB: predicated region body
PF: predicated region fallthrough
CT: control target
= control target key end

     0   :  { %vm255_vm0 = vcmask 1040384   ;;  %vm256_vm1 = vcmask 1041408   ;;  %v540_v29 = vmov 65535   ;;  %vm251_vm2 = vcmask 154624   ;;  %s700_s0 = inlined_call_operand.vmem [shape: bf16[147,512], index: 0, kind: input, shape index: {}]   ;;  %s701_s1 = inlined_call_operand.vmem [shape: bf16[16,147], index: 1, kind: input, shape index: {}]   ;;  %s702_s2 = inlined_call_operand.vmem [shape: f32[16,512], index: 2, kind: output, shape index: {}]  }
   0x1   :  { %v475_v0 = vld [vmem:[%s700_s0 + $0xe4] ss:$16 sps:$4 sm:$0xff]   ;;  %v477_v1 = vld [vmem:[%s700_s0 + $0xec] ss:$16 sps:$4 sm:$0xff]   ;;  %v479_v2 = vld [vmem:[%s700_s0 + $0xe0] ss:$16 sps:$4 sm:$0xff]  }
   0x2   :  { %271 = vmatprep.subr.bf16.mxu0 %v475_v0  ;;  %v480_v3 = vld [vmem:[%s700_s0 + $0xe8] ss:$16 sps:$4 sm:$0xff]   ;;  %314 = vmatprep.subr.bf16.mxu1 %v477_v1  ;;  %v481_v4 = vld [vmem:[%s700_s0 + $0xc4] ss:$16 sps:$4 sm:$0xff]   ;;  %v483_v5 = vld [vmem:[%s700_s0 + $0xcc] ss:$16 sps:$4 sm:$0xff]  }
   0x3   :  { %272 = vmatpush1.bf16.msra.mxu0 %v479_v2  ;;  %315 = vmatpush1.bf16.msra.mxu1 %v480_v3  ;;  %v485_v6 = vld [vmem:[%s700_s0 + $0xc0] ss:$16 sps:$4 sm:$0xff]   ;;  %v486_v7 = vld [vmem:[%s700_s0 + $0xc8] ss:$16 sps:$4 sm:$0xff]   ;;  %v487_v8 = vld [vmem:[%s700_s0 + $0xa4] ss:$16 sps:$4 sm:$0xff]  }
   0x4   :  { %273 = vmatprep.subr.bf16.mxu0 %v481_v4  ;;  %316 = vmatprep.subr.bf16.mxu1 %v483_v5  ;;  %v489_v9 = vld [vmem:[%s700_s0 + $0xac] ss:$16 sps:$4 sm:$0xff]   ;;  %v491_v10 = vld [vmem:[%s700_s0 + $0xa0] ss:$16 sps:$4 sm:$0xff]   ;;  %v492_v11 = vld [vmem:[%s700_s0 + $0xa8] ss:$16 sps:$4 sm:$0xff]  }
   0x5   :  { %v493_v12 = vld [vmem:[%s700_s0 + $0x84] ss:$16 sps:$4 sm:$0xff]   ;;  %v495_v13 = vld [vmem:[%s700_s0 + $0x8c] ss:$16 sps:$4 sm:$0xff]   ;;  %v497_v14 = vld [vmem:[%s700_s0 + $0x80] ss:$16 sps:$4 sm:$0xff]  }
   0x6   :  { %v498_v15 = vld [vmem:[%s700_s0 + $0x88] ss:$16 sps:$4 sm:$0xff]   ;;  %v499_v16 = vld [vmem:[%s700_s0 + $0x64] ss:$16 sps:$4 sm:$0xff]   ;;  %v501_v17 = vld [vmem:[%s700_s0 + $0x6c] ss:$16 sps:$4 sm:$0xff]  }
   0x7   :  { %274 = vmatpush1.bf16.msra.mxu0 %v485_v6  ;;  %317 = vmatpush1.bf16.msra.mxu1 %v486_v7  ;;  %v503_v18 = vld [vmem:[%s700_s0 + $0x60] ss:$16 sps:$4 sm:$0xff]   ;;  %v504_v19 = vld [vmem:[%s700_s0 + $0x68] ss:$16 sps:$4 sm:$0xff]   ;;  %v505_v20 = vld [vmem:[%s700_s0 + $0x44] ss:$16 sps:$4 sm:$0xff]  }
   0x8   :  { %275 = vmatprep.subr.bf16.mxu0 %v487_v8  ;;  %318 = vmatprep.subr.bf16.mxu1 %v489_v9  ;;  %v507_v21 = vld [vmem:[%s700_s0 + $0x4c] ss:$16 sps:$4 sm:$0xff]   ;;  %v509_v22 = vld [vmem:[%s700_s0 + $0x40] ss:$16 sps:$4 sm:$0xff]   ;;  %v510_v23 = vld [vmem:[%s700_s0 + $0x48] ss:$16 sps:$4 sm:$0xff]  }
   0x9   :  { %v511_v24 = vld [vmem:[%s700_s0 + $0x24] ss:$16 sps:$4 sm:$0xff]   ;;  %v513_v25 = vld [vmem:[%s700_s0 + $0x2c] ss:$16 sps:$4 sm:$0xff]   ;;  %v515_v28 = vld [vmem:[%s700_s0 + $0x20] ss:$16 sps:$4 sm:$0xff]  }
   0xa   :  { %v50_v26 = vld [vmem:[%s700_s0 + $0x120] sm:$0x33]  ;;  %v51_v27 = vld [vmem:[%s700_s0 + $0x128] sm:$0x33]  ;;  %v257_v30 = vsel %vm255_vm0, 4294967295, %v540_v29 }
   0xb   :  { %276 = vmatpush1.bf16.msra.mxu0 %v491_v10  ;;  %319 = vmatpush1.bf16.msra.mxu1 %v492_v11  ;;  %v516_v31 = vld [vmem:[%s700_s0 + $0x28] ss:$16 sps:$4 sm:$0xff]   ;;  %v517_v32 = vld [vmem:[%s700_s0 + $0x4] ss:$16 sps:$4 sm:$0xff]   ;;  %v519_v33 = vld [vmem:[%s700_s0 + $0xc] ss:$16 sps:$4 sm:$0xff]   ;;  %v469_v34 = vcombine.high %v50_v26, %v50_v26  ;;  %v471_v35 = vcombine.high %v51_v27, %v51_v27  ;;  %v468_v40 = vcombine.low %v50_v26, %v50_v26 }
   0xc   :  { %277 = vmatprep.subr.bf16.mxu0 %v493_v12  ;;  %320 = vmatprep.subr.bf16.mxu1 %v495_v13  ;;  %v535_v36 = vld [vmem:[%s701_s1 + $0x4] ss:$8 sps:$4 sm:$0xff]   ;;  %v258_v37 = vsel %vm256_vm1, %v257_v30, 0  ;;  %v521_v38 = vld [vmem:[%s700_s0] ss:$16 sps:$4 sm:$0xff]   ;;  %v470_v41 = vcombine.low %v51_v27, %v51_v27 }
   0xd   :  { %472 = vmatprep.mubr.msk.bf16.mxu0 %vm251_vm2, %v535_v36  ;;  %473 = vmatprep.mubr.msk.bf16.mxu1 %vm251_vm2, %v535_v36  ;;  %v522_v39 = vld [vmem:[%s700_s0 + $0x8] ss:$16 sps:$4 sm:$0xff]   ;;  %v263_v42 = vand.u32 %v469_v34, %v258_v37  ;;  %v269_v43 = vand.u32 %v471_v35, %v258_v37  ;;  %v260_v44 = vand.u32 %v468_v40, %v258_v37  ;;  %v527_v46 = vld [vmem:[%s700_s0 + $0x104] ss:$16 sps:$4 sm:$0xff]   ;;  %v529_v47 = vld [vmem:[%s700_s0 + $0x10c] ss:$16 sps:$4 sm:$0xff]  }
   0xe   :  { %v266_v45 = vand.u32 %v470_v41, %v258_v37  ;;  %v531_v48 = vld [vmem:[%s700_s0 + $0x100] ss:$16 sps:$4 sm:$0xff]   ;;  %v532_v49 = vld [vmem:[%s700_s0 + $0x108] ss:$16 sps:$4 sm:$0xff]  }
   0xf   :  { %278 = vmatpush1.bf16.msra.mxu0 %v497_v14  ;;  %321 = vmatpush1.bf16.msra.mxu1 %v498_v15  ;;  %v533_v50 = vld [vmem:[%s701_s1] ss:$8 sps:$4 sm:$0xff]  }
  0x10   :  { %279 = vmatprep.subr.bf16.mxu0 %v499_v16  ;;  %322 = vmatprep.subr.bf16.mxu1 %v501_v17 }
  0x13   :  { %280 = vmatpush1.bf16.msra.mxu0 %v503_v18  ;;  %323 = vmatpush1.bf16.msra.mxu1 %v504_v19 }
  0x14   :  { %281 = vmatprep.subr.bf16.mxu0 %v505_v20  ;;  %324 = vmatprep.subr.bf16.mxu1 %v507_v21 }
  0x17   :  { %282 = vmatpush1.bf16.msra.mxu0 %v509_v22  ;;  %325 = vmatpush1.bf16.msra.mxu1 %v510_v23 }
  0x18   :  { %283 = vmatprep.subr.bf16.mxu0 %v511_v24  ;;  %326 = vmatprep.subr.bf16.mxu1 %v513_v25 }
  0x1b   :  { %284 = vmatpush1.bf16.msra.mxu0 %v515_v28  ;;  %327 = vmatpush1.bf16.msra.mxu1 %v516_v31 }
  0x1c   :  { %285 = vmatprep.subr.bf16.mxu0 %v517_v32  ;;  %328 = vmatprep.subr.bf16.mxu1 %v519_v33 }
  0x1f   :  { %286 = vmatpush1.bf16.msra.mxu0 %v521_v38  ;;  %329 = vmatpush1.bf16.msra.mxu1 %v522_v39 }
  0x20   :  { %299 = vmatprep.subr.bf16.mxu0 %v263_v42  ;;  %342 = vmatprep.subr.bf16.mxu1 %v269_v43 }
  0x23   :  { %300 = vmatpush2.bf16.msra.mxu0 %v260_v44  ;;  %343 = vmatpush2.bf16.msra.mxu1 %v266_v45 }
  0x24   :  { %301 = vmatprep.subr.bf16.mxu0 %v527_v46  ;;  %344 = vmatprep.subr.bf16.mxu1 %v529_v47 }
  0x27   :  { %302 = vmatpush2.bf16.msra.mxu0 %v531_v48  ;;  %345 = vmatpush2.bf16.msra.mxu1 %v532_v49 }
  0x2a   :  { %304 = vmatmul.mubr.bf16.vlgmr.msra.gmra.mxu0 %v533_v50  ;;  %347 = vmatmul.mubr.bf16.vlgmr.msra.gmra.mxu1 %v533_v50 }
  0xea   :  { %v305_v51 = vpop.f32.mrf.mxu0  ;;  %v348_v52 = vpop.f32.mrf.mxu1 }
  0xec   :  { %v307_v53 = vpop.f32.mrf.mxu0  ;;  %v350_v54 = vpop.f32.mrf.mxu1 }
  0xed   :  { %v357_v55 = vadd.f32 %v307_v53, %v305_v51 }
  0xee   :  { %v309_v56 = vpop.f32.mrf.mxu0  ;;  %v352_v58 = vpop.f32.mrf.mxu1 }
  0xef   :  { %v358_v57 = vadd.f32 %v357_v55, %v348_v52 }
  0xf0   :  { %v311_v59 = vpop.f32.mrf.mxu0  ;;  %v354_v63 = vpop.f32.mrf.mxu1 }
  0xf1   :  { %v362_v60 = vadd.f32 %v311_v59, %v309_v56  ;;  %v359_v61 = vadd.f32 %v358_v57, %v350_v54 }
  0xf3   :  { %v363_v62 = vadd.f32 %v362_v60, %v352_v58  ;;  %360 = vadd.xlane.f32.xlu0 %v359_v61 }
  0xf5   :  { %v364_v0 = vadd.f32 %v363_v62, %v354_v63 }
  0xf7   :  { %365 = vadd.xlane.f32.xlu0 %v364_v0 }
 0x17c   :  { %v361_v1 = vpop.xlane.xlu0 %360 }
 0x17d   :  { %v368_v2 = vmul.f32 0.001953125, %v361_v1 }
 0x17f   :  { %v370_v3 = vsub.f32 %v305_v51, %v368_v2  ;;  %v371_v4 = vsub.f32 %v307_v53, %v368_v2  ;;  %v372_v5 = vsub.f32 %v348_v52, %v368_v2  ;;  %v373_v7 = vsub.f32 %v350_v54, %v368_v2 }
 0x180   :  { %v366_v6 = vpop.xlane.xlu0 %365 }
 0x181   :  { %v369_v8 = vmul.f32 0.001953125, %v366_v6  ;;  %v378_v9 = vmul.f32 %v370_v3, %v370_v3  ;;  %v379_v10 = vmul.f32 %v371_v4, %v371_v4  ;;  %v380_v11 = vmul.f32 %v372_v5, %v372_v5 }
 0x182   :  { %v381_v16 = vmul.f32 %v373_v7, %v373_v7 }
 0x183   :  { %v374_v12 = vsub.f32 %v309_v56, %v369_v8  ;;  %v375_v13 = vsub.f32 %v311_v59, %v369_v8  ;;  %v386_v14 = vadd.f32 %v379_v10, %v378_v9  ;;  %v376_v15 = vsub.f32 %v352_v58, %v369_v8 }
 0x184   :  { %v377_v18 = vsub.f32 %v354_v63, %v369_v8 }
 0x185   :  { %v387_v17 = vadd.f32 %v386_v14, %v380_v11  ;;  %v382_v19 = vmul.f32 %v374_v12, %v374_v12  ;;  %v383_v20 = vmul.f32 %v375_v13, %v375_v13  ;;  %v384_v22 = vmul.f32 %v376_v15, %v376_v15 }
 0x186   :  { %v385_v24 = vmul.f32 %v377_v18, %v377_v18 }
 0x187   :  { %v388_v21 = vadd.f32 %v387_v17, %v381_v16  ;;  %v391_v23 = vadd.f32 %v383_v20, %v382_v19 }
 0x189   :  { %389 = vadd.xlane.f32.xlu1 %v388_v21  ;;  %v392_v25 = vadd.f32 %v391_v23, %v384_v22 }
 0x18b   :  { %v393_v26 = vadd.f32 %v392_v25, %v385_v24 }
 0x18d   :  { %394 = vadd.xlane.f32.xlu1 %v393_v26 }
 0x212   :  { %v390_v27 = vpop.xlane.xlu1 %389 }
 0x213   :  { %v396_v28 = vmul.f32 0.001953125, %v390_v27 }
 0x215   :  { %v398_v29 = vadd.f32 1e-05, %v396_v28 }
 0x216   :  { %v395_v30 = vpop.xlane.xlu1 %394 }
 0x217   :  { %536 = vrsqrt.f32 %v398_v29  ;;  %v397_v31 = vmul.f32 0.001953125, %v395_v30 }
 0x219   :  { %v399_v32 = vadd.f32 1e-05, %v397_v31 }
 0x21b   :  { %538 = vrsqrt.f32 %v399_v32 }
 0x224   :  { %v537_v33 = vpop.eup %536 }
 0x225   :  { %v402_v34 = vmul.f32 %v537_v33, %v370_v3  ;;  %v403_v35 = vmul.f32 %v537_v33, %v371_v4  ;;  %v404_v36 = vmul.f32 %v537_v33, %v372_v5  ;;  %v405_v37 = vmul.f32 %v537_v33, %v373_v7 }
 0x227   :  { %v410_v38 = vmax.f32 %v402_v34, 0.0  ;;  %v411_v39 = vmax.f32 %v403_v35, 0.0  ;;  %v412_v40 = vmax.f32 %v404_v36, 0.0  ;;  %v413_v41 = vmax.f32 %v405_v37, 0.0 }
 0x228   :  { %v539_v42 = vpop.eup %538 }
 0x229   :  { %418 = vst [vmem:[%s702_s2] sm:$0xff] %v410_v38  ;;  %419 = vst [vmem:[%s702_s2 + $0x8] sm:$0xff] %v411_v39  ;;  %v406_v43 = vmul.f32 %v539_v42, %v374_v12  ;;  %v407_v44 = vmul.f32 %v539_v42, %v375_v13  ;;  %v408_v45 = vmul.f32 %v539_v42, %v376_v15 }
 0x22a   :  { %420 = vst [vmem:[%s702_s2 + $0x10] sm:$0xff] %v412_v40  ;;  %421 = vst [vmem:[%s702_s2 + $0x18] sm:$0xff] %v413_v41  ;;  %v409_v46 = vmul.f32 %v539_v42, %v377_v18 }
 0x22b   :  { %v414_v47 = vmax.f32 %v406_v43, 0.0  ;;  %v415_v48 = vmax.f32 %v407_v44, 0.0  ;;  %v416_v49 = vmax.f32 %v408_v45, 0.0 }
 0x22c   :  { %v417_v50 = vmax.f32 %v409_v46, 0.0 }
 0x22d   :  { %422 = vst [vmem:[%s702_s2 + $0x20] sm:$0xff] %v414_v47  ;;  %423 = vst [vmem:[%s702_s2 + $0x28] sm:$0xff] %v415_v48 }
 0x22e   :  { %424 = vst [vmem:[%s702_s2 + $0x30] sm:$0xff] %v416_v49  ;;  %425 = vst [vmem:[%s702_s2 + $0x38] sm:$0xff] %v417_v50 }

// kernel: forward.7
= control target key start
LH: loop header
LB: loop body
LE: loop exit
PB: predicated region body
PF: predicated region fallthrough
CT: control target
= control target key end

     0   :  { %v313_v54 = vmov 0.0   ;;  %vm314_vm0 = vmmov 0   ;;  %vm192_vm1 = vcmask 261120   ;;  %s385_s0 = inlined_call_operand.vmem [shape: f32[32,128], index: 0, kind: input, shape index: {}]   ;;  %s386_s1 = inlined_call_operand.vmem [shape: bf16[128,32], index: 1, kind: input, shape index: {}]   ;;  %s387_s2 = inlined_call_operand.vmem [shape: bf16[16,32], index: 2, kind: input, shape index: {}]   ;;  %s388_s3 = inlined_call_operand.vmem [shape: f32[16,32], index: 3, kind: output, shape index: {}]  }
   0x1   :  { %v15_v0 = vld [vmem:[%s385_s0] sm:$0xff]  ;;  %v17_v1 = vld [vmem:[%s385_s0 + $0x10] sm:$0xff]  ;;  %v16_v2 = vld [vmem:[%s385_s0 + $0x8] sm:$0xff]  ;;  %286 = vmatprep.subr.bf16.mxu1 %v313_v54  ;;  %290 = vmatprep.mubr.msk.bf16.mxu1 %vm314_vm0, %v313_v54 }
   0x2   :  { %19 = vadd.xlane.f32.xlu0 %v15_v0  ;;  %23 = vadd.xlane.f32.xlu1 %v17_v1  ;;  %v18_v3 = vld [vmem:[%s385_s0 + $0x18] sm:$0xff]  ;;  %v297_v21 = vld [vmem:[%s386_s1 + $0x30] sm:$0xff]   ;;  %v298_v22 = vld [vmem:[%s386_s1 + $0x28] sm:$0xff]  }
   0x3   :  { %v296_v20 = vld [vmem:[%s386_s1 + $0x38] sm:$0xff]   ;;  %v299_v23 = vld [vmem:[%s386_s1 + $0x20] sm:$0xff]   ;;  %v301_v25 = vld [vmem:[%s386_s1 + $0x10] sm:$0xff]  }
   0x4   :  { %266 = vmatprep.subr.bf16.mxu0 %v296_v20  ;;  %v300_v24 = vld [vmem:[%s386_s1 + $0x18] sm:$0xff]   ;;  %v302_v26 = vld [vmem:[%s386_s1 + $0x8] sm:$0xff]   ;;  %v303_v27 = vld [vmem:[%s386_s1] sm:$0xff]  }
   0x5   :  { %267 = vmatpush3.bf16.msra.mxu0 %v296_v20  ;;  %v304_v61 = vld [vmem:[%s387_s2] sm:$0xff]  }
   0x6   :  { %21 = vadd.xlane.f32.xlu0 %v16_v2  ;;  %25 = vadd.xlane.f32.xlu1 %v18_v3 }
   0x7   :  { %268 = vmatprep.subr.bf16.mxu0 %v297_v21 }
   0x9   :  { %269 = vmatpush3.bf16.msra.mxu0 %v297_v21 }
   0xa   :  { %270 = vmatprep.subr.bf16.mxu0 %v298_v22 }
   0xd   :  { %271 = vmatpush3.bf16.msra.mxu0 %v298_v22 }
   0xe   :  { %272 = vmatprep.subr.bf16.mxu0 %v299_v23 }
  0x11   :  { %273 = vmatpush3.bf16.msra.mxu0 %v299_v23 }
  0x12   :  { %274 = vmatprep.subr.bf16.mxu0 %v300_v24 }
  0x15   :  { %275 = vmatpush3.bf16.msra.mxu0 %v300_v24 }
  0x16   :  { %276 = vmatprep.subr.bf16.mxu0 %v301_v25 }
  0x19   :  { %277 = vmatpush3.bf16.msra.mxu0 %v301_v25 }
  0x1a   :  { %278 = vmatprep.subr.bf16.mxu0 %v302_v26 }
  0x1d   :  { %279 = vmatpush3.bf16.msra.mxu0 %v302_v26 }
  0x1e   :  { %280 = vmatprep.subr.bf16.mxu0 %v303_v27 }
  0x21   :  { %281 = vmatpush3.bf16.msra.mxu0 %v303_v27 }
  0x8b   :  { %v20_v4 = vpop.xlane.xlu0 %19  ;;  %v24_v5 = vpop.xlane.xlu1 %23 }
  0x8c   :  { %v28_v6 = vmul.f32 0.0078125, %v20_v4  ;;  %v30_v7 = vmul.f32 0.0078125, %v24_v5 }
  0x8e   :  { %v32_v8 = vsub.f32 %v15_v0, %v28_v6  ;;  %v347_v9 = vsub.f32 %v17_v1, %v30_v7 }
  0x8f   :  { %v22_v10 = vpop.xlane.xlu0 %21  ;;  %v26_v11 = vpop.xlane.xlu1 %25 }
  0x90   :  { %v29_v12 = vmul.f32 0.0078125, %v22_v10  ;;  %v36_v13 = vmul.f32 %v32_v8, %v32_v8  ;;  %v31_v14 = vmul.f32 0.0078125, %v26_v11  ;;  %v38_v17 = vmul.f32 %v347_v9, %v347_v9 }
  0x92   :  { %v33_v15 = vsub.f32 %v16_v2, %v29_v12  ;;  %40 = vadd.xlane.f32.xlu0 %v36_v13  ;;  %v35_v16 = vsub.f32 %v18_v3, %v31_v14 }
  0x94   :  { %v37_v18 = vmul.f32 %v33_v15, %v33_v15  ;;  %v39_v19 = vmul.f32 %v35_v16, %v35_v16 }
  0x96   :  { %44 = vadd.xlane.f32.xlu0 %v38_v17  ;;  %42 = vadd.xlane.f32.xlu1 %v37_v18 }
  0x9a   :  { %46 = vadd.xlane.f32.xlu1 %v39_v19 }
 0x11b   :  { %v41_v28 = vpop.xlane.xlu0 %40 }
 0x11c   :  { %v48_v29 = vmul.f32 0.0078125, %v41_v28 }
 0x11e   :  { %v52_v30 = vadd.f32 1e-05, %v48_v29 }
 0x11f   :  { %v43_v31 = vpop.xlane.xlu1 %42  ;;  %v45_v32 = vpop.xlane.xlu0 %44 }
 0x120   :  { %305 = vrsqrt.f32 %v52_v30  ;;  %v49_v33 = vmul.f32 0.0078125, %v43_v31  ;;  %v50_v34 = vmul.f32 0.0078125, %v45_v32 }
 0x122   :  { %v53_v35 = vadd.f32 1e-05, %v49_v33  ;;  %v54_v36 = vadd.f32 1e-05, %v50_v34 }
 0x123   :  { %v47_v37 = vpop.xlane.xlu1 %46 }
 0x124   :  { %307 = vrsqrt.f32 %v53_v35  ;;  %v51_v38 = vmul.f32 0.0078125, %v47_v37 }
 0x125   :  { %309 = vrsqrt.f32 %v54_v36 }
 0x126   :  { %v55_v39 = vadd.f32 1e-05, %v51_v38 }
 0x128   :  { %311 = vrsqrt.f32 %v55_v39 }
 0x12d   :  { %v306_v40 = vpop.eup %305 }
 0x12e   :  { %v60_v41 = vmul.f32 %v306_v40, %v32_v8 }
 0x130   :  { %v64_v45 = vmax.f32 %v60_v41, 0.0 }
 0x131   :  { %v308_v42 = vpop.eup %307 }
 0x132   :  { %v310_v43 = vpop.eup %309  ;;  %v61_v44 = vmul.f32 %v308_v42, %v33_v15 }
 0x133   :  { %v62_v47 = vmul.f32 %v310_v43, %v347_v9 }
 0x134   :  { %v65_v46 = vmax.f32 %v61_v44, 0.0 }
 0x135   :  { %v312_v48 = vpop.eup %311  ;;  %v66_v51 = vmax.f32 %v62_v47, 0.0 }
 0x136   :  { %v68_v49 = vpack.c.bf16 %v65_v46, %v64_v45  ;;  %v63_v50 = vmul.f32 %v312_v48, %v35_v16 }
 0x138   :  { %282 = vmatprep.mubr.bf16.mxu0 %v68_v49  ;;  %v67_v52 = vmax.f32 %v63_v50, 0.0 }
 0x13a   :  { %v69_v53 = vpack.c.bf16 %v67_v52, %v66_v51 }
 0x13c   :  { %283 = vmatmul.mubr.bf16.vlgmr.msra.gmra.mxu0 %v69_v53 }
 0x1fc   :  { %v284_v55 = vpop.f32.mrf.mxu0 }
 0x1fe   :  { %v168_v56 = vpop.f32.mrf.mxu0 }
 0x200   :  { %v285_v57 = vpop.f32.mrf.mxu0 }
 0x201   :  { %v186_v58 = vpack.c.bf16 %v285_v57, %v284_v55 }
 0x202   :  { %v171_v59 = vpop.f32.mrf.mxu0 }
 0x203   :  { %287 = vmatpush3.bf16.msra.mxu1 %v186_v58  ;;  %v185_v60 = vpack.c.bf16 %v171_v59, %v168_v56 }
 0x204   :  { %288 = vmatprep.subr.bf16.mxu1 %v313_v54 }
 0x207   :  { %289 = vmatpush3.bf16.msra.mxu1 %v185_v60 }
 0x20a   :  { %291 = vmatmul.mubr.msk.bf16.vlgmr.msra.gmra.mxu1 %vm192_vm1, %v304_v61 }
 0x2ca   :  { %v230_v62 = vpop.f32.mrf.mxu1 }
 0x2cb   :  { %237 = vst.msk [vmem:[%s388_s3] sm:$0xff] %vm192_vm1, %v230_v62 }
 0x2cc   :  { %v292_v63 = vpop.f32.mrf.mxu1 }
 0x2ce   :  { %v233_v0 = vpop.f32.mrf.mxu1 }
 0x2cf   :  { %238 = vst.msk [vmem:[%s388_s3 + $0x8] sm:$0xff] %vm192_vm1, %v233_v0 }
 0x2d0   :  { %v293_v1 = vpop.f32.mrf.mxu1 }

// kernel: forward.6
= control target key start
LH: loop header
LB: loop body
LE: loop exit
PB: predicated region body
PF: predicated region fallthrough
CT: control target
= control target key end

     0   :  { %v1170_v10 = vmov 0.0   ;;  %vm1171_vm0 = vmmov 0   ;;  %vm69_vm1 = vcmask 130048   ;;  %s1172_s7 = smov 111   ;;  %s1173_s8 = smov 119   ;;  %vm245_vm2 = vcmask 908288   ;;  %s1709_s0 = inlined_call_operand.vmem [shape: f32[16,128], index: 0, kind: input, shape index: {}]   ;;  %s1710_s6 = inlined_call_operand.vmem [shape: f32[32,128], index: 6, kind: output, shape index: {}]   ;;  %s1711_s2 = inlined_call_operand.vmem [shape: bf16[16,16], index: 2, kind: input, shape index: {}]   ;;  %s1712_s1 = inlined_call_operand.vmem [shape: f32[144,128], index: 1, kind: input, shape index: {}]   ;;  %s1713_s3 = inlined_call_operand.vmem [shape: bf16[8,144], index: 3, kind: input, shape index: {}]   ;;  %s1714_s4 = inlined_call_operand.vmem [shape: bf16[16,24], index: 4, kind: input, shape index: {}]   ;;  %s1715_s5 = inlined_call_operand.vmem [shape: bf16[8,144], index: 5, kind: input, shape index: {}]  }
   0x1   :  { %v1220_v0 = vld [vmem:[%s1709_s0] sm:$0xff]  ;;  %v1225_v1 = vld [vmem:[%s1709_s0 + $0x8] sm:$0xff]  ;;  %1050 = vmatprep.subr.bf16.mxu1 %v1170_v10  ;;  %1056 = vmatprep.subr.bf16.mxu0 %v1170_v10  ;;  %v1250_v37 = vld [vmem:[%s1712_s1 + $0x78] sm:$0xff]  ;;  %s1174_s11 = smov 112   ;;  %s1175_s18 = smov 118   ;;  %vm230_vm3 = vcmask 916480  }
   0x2   :  { %26 = vst [vmem:[%s1710_s6] sm:$0xff] %v1220_v0  ;;  %36 = vadd.xlane.f32.xlu0 %v1220_v0  ;;  %27 = vst [vmem:[%s1710_s6 + $0x8] sm:$0xff] %v1225_v1  ;;  %1052 = vmatprep.mubr.msk.bf16.mxu1 %vm1171_vm0, %v1170_v10  ;;  %v1146_v24 = vld [vmem:[%s1711_s2] sm:$0xff]   ;;  %v1259_v38 = vld [vmem:[%s1712_s1 + $0x70] sm:$0xff]  ;;  %s1176_s27 = smov 120   ;;  %s1177_s28 = smov 126   ;;  %vm215_vm4 = vcmask 965632  }
   0x3   :  { %1060 = vmatprep.mubr.msk.bf16.mxu0 %vm1171_vm0, %v1170_v10  ;;  %v1268_v39 = vld [vmem:[%s1712_s1 + $0x68] sm:$0xff]  ;;  %v1273_v40 = vld [vmem:[%s1712_s1 + $0x60] sm:$0xff]  ;;  %v1282_v41 = vld [vmem:[%s1712_s1 + $0x58] sm:$0xff]  ;;  %s1178_s9 = smov 127   ;;  %s1179_s22 = smov 110   ;;  %vm190_vm5 = vcmask 982016  }
   0x4   :  { %v1291_v42 = vld [vmem:[%s1712_s1 + $0x50] sm:$0xff]  ;;  %v1296_v43 = vld [vmem:[%s1712_s1 + $0x48] sm:$0xff]  ;;  %v1305_v44 = vld [vmem:[%s1712_s1 + $0x40] sm:$0xff]  ;;  %vm175_vm6 = vcmask 1031168   ;;  %vm160_vm7 = vcmask 1039360   ;;  %vm260_vm8 = vcmask 900096  }
   0x5   :  { %v1310_v45 = vld [vmem:[%s1712_s1 + $0x30] sm:$0xff]  ;;  %v1323_v46 = vld [vmem:[%s1712_s1 + $0x38] sm:$0xff]  ;;  %v1344_v58 = vld [vmem:[%s1712_s1 + $0x28] sm:$0xff]  ;;  %vm466_vm9 = vcmask 72704   ;;  %vm580_vm10 = vcmask 1043456   ;;  %vm576_vm11 = vcmask 195584  }
   0x6   :  { %38 = vadd.xlane.f32.xlu0 %v1225_v1  ;;  %v1359_v60 = vld [vmem:[%s1712_s1 + $0x20] sm:$0xff]  ;;  %v1368_v61 = vld [vmem:[%s1712_s1 + $0x10] sm:$0xff]  ;;  %v1381_v62 = vld [vmem:[%s1712_s1 + $0x18] sm:$0xff] }
   0x7   :  { %v1390_v63 = vld [vmem:[%s1712_s1] sm:$0xff] }
  0x8b   :  { %v37_v2 = vpop.xlane.xlu0 %36 }
  0x8c   :  { %v41_v3 = vmul.f32 0.0078125, %v37_v2  ;;  %v1399_v2 = vld [vmem:[%s1712_s1 + $0x8] sm:$0xff] }
  0x8e   :  { %v43_v4 = vsub.f32 %v1220_v0, %v41_v3  ;;  %v1412_v3 = vld [vmem:[%s1712_s1 + $0x88] sm:$0xff] }
  0x8f   :  { %v39_v5 = vpop.xlane.xlu0 %38 }
  0x90   :  { %v42_v6 = vmul.f32 0.0078125, %v39_v5  ;;  %v45_v7 = vmul.f32 %v43_v4, %v43_v4 }
  0x92   :  { %47 = vadd.xlane.f32.xlu1 %v45_v7  ;;  %v44_v8 = vsub.f32 %v1225_v1, %v42_v6 }
  0x94   :  { %v46_v9 = vmul.f32 %v44_v8, %v44_v8 }
  0x96   :  { %49 = vadd.xlane.f32.xlu1 %v46_v9 }
 0x11b   :  { %v48_v11 = vpop.xlane.xlu1 %47 }
 0x11c   :  { %v51_v12 = vmul.f32 0.0078125, %v48_v11 }
 0x11e   :  { %v53_v13 = vadd.f32 1e-05, %v51_v12 }
 0x11f   :  { %v50_v14 = vpop.xlane.xlu1 %49 }
 0x120   :  { %1152 = vrsqrt.f32 %v53_v13  ;;  %v52_v15 = vmul.f32 0.0078125, %v50_v14 }
 0x122   :  { %v54_v16 = vadd.f32 1e-05, %v52_v15 }
 0x124   :  { %1154 = vrsqrt.f32 %v54_v16 }
 0x12d   :  { %v1153_v17 = vpop.eup %1152 }
 0x12e   :  { %v57_v18 = vmul.f32 %v1153_v17, %v43_v4  ;;  %v1417_v4 = vld [vmem:[%s1712_s1 + $0x80] sm:$0xff]  ;;  %s1181_s1 = smov 9  }
 0x130   :  { %v59_v21 = vmax.f32 %v57_v18, 0.0 }
 0x131   :  { %v1155_v19 = vpop.eup %1154 }
 0x132   :  { %v58_v20 = vmul.f32 %v1155_v19, %v44_v8 }
 0x134   :  { %v60_v22 = vmax.f32 %v58_v20, 0.0 }
 0x136   :  { %v63_v23 = vpack.c.bf16 %v60_v22, %v59_v21 }
 0x138   :  { %1051 = vmatpush3.bf16.msra.mxu1 %v63_v23 }
 0x13b   :  { %1053 = vmatmul.mubr.msk.bf16.vlgmr.msra.gmra.mxu1 %vm69_vm1, %v1146_v24 }
 0x1fb   :  { %v107_v25 = vpop.f32.mrf.mxu1 }
 0x1fc   :  { %114 = vadd.xlane.f32.xlu0 %v107_v25 }
 0x1fd   :  { %v1054_v26 = vpop.f32.mrf.mxu1 }
 0x1ff   :  { %v110_v27 = vpop.f32.mrf.mxu1 }
 0x200   :  { %116 = vadd.xlane.f32.xlu1 %v110_v27 }
 0x201   :  { %v1055_v28 = vpop.f32.mrf.mxu1 }
 0x285   :  { %v115_v29 = vpop.xlane.xlu0 %114 }
 0x286   :  { %v118_v30 = vmul.f32 0.0078125, %v115_v29 }
 0x288   :  { %v120_v31 = vsub.f32 %v107_v25, %v118_v30  ;;  %v1180_v25 = vmov 0  }
 0x289   :  { %v117_v32 = vpop.xlane.xlu1 %116  ;;  %487 = vmatprep.subr.bf16.mxu1 %v1180_v25 }
 0x28a   :  { %v119_v33 = vmul.f32 0.0078125, %v117_v32  ;;  %v122_v34 = vmul.f32 %v120_v31, %v120_v31 }
 0x28c   :  { %124 = vadd.xlane.f32.xlu0 %v122_v34  ;;  %v121_v35 = vsub.f32 %v110_v27, %v119_v33 }
 0x28e   :  { %v123_v36 = vmul.f32 %v121_v35, %v121_v35 }
 0x290   :  { %126 = vadd.xlane.f32.xlu1 %v123_v36 }
 0x2a1   :  { %1077 = vrot.lane.b32.xlu1 %v1170_v10, %s1172_s7 }
 0x2a2   :  { %333 = vrot.lane.b32.xlu0 %v1250_v37, %s1173_s8 }
 0x2a5   :  { %331 = vrot.lane.b32.xlu1 %v1259_v38, %s1173_s8 }
 0x2a6   :  { %1082 = vrot.lane.b32.xlu0 %v1170_v10, %s1174_s11 }
 0x2a9   :  { %329 = vrot.lane.b32.xlu1 %v1268_v39, %s1173_s8 }
 0x2aa   :  { %327 = vrot.lane.b32.xlu0 %v1273_v40, %s1173_s8 }
 0x2ad   :  { %1087 = vrot.lane.b32.xlu1 %v1170_v10, %s1175_s18 }
 0x2ae   :  { %325 = vrot.lane.b32.xlu0 %v1282_v41, %s1173_s8 }
 0x2b1   :  { %323 = vrot.lane.b32.xlu1 %v1291_v42, %s1173_s8 }
 0x2b2   :  { %321 = vrot.lane.b32.xlu0 %v1296_v43, %s1173_s8 }
 0x2b5   :  { %319 = vrot.lane.b32.xlu1 %v1305_v44, %s1173_s8 }
 0x2b6   :  { %315 = vrot.lane.b32.xlu0 %v1310_v45, %s1173_s8 }
 0x2b9   :  { %1092 = vrot.lane.b32.xlu1 %v1170_v10, %s1176_s27 }
 0x2ba   :  { %1097 = vrot.lane.b32.xlu0 %v1170_v10, %s1177_s28 }
 0x2bd   :  { %317 = vrot.lane.b32.xlu1 %v1323_v46, %s1173_s8 }
 0x315   :  { %v125_v47 = vpop.xlane.xlu0 %124 }
 0x316   :  { %v128_v48 = vmul.f32 0.0078125, %v125_v47 }
 0x318   :  { %v130_v49 = vadd.f32 1e-05, %v128_v48 }
 0x319   :  { %v127_v50 = vpop.xlane.xlu1 %126  ;;  %v334_v6 = vpop.permute.xlu0 %333 }
 0x31a   :  { %1156 = vrsqrt.f32 %v130_v49  ;;  %v129_v51 = vmul.f32 0.0078125, %v127_v50 }
 0x31c   :  { %v131_v52 = vadd.f32 1e-05, %v129_v51 }
 0x31d   :  { %v1078_v5 = vpop.permute.xlu1 %1077  ;;  %v1083_v8 = vpop.permute.xlu0 %1082 }
 0x31e   :  { %1158 = vrsqrt.f32 %v131_v52  ;;  %v1079_v28 = vunpack.i.l.bf16 %v1078_v5  ;;  %v1080_v29 = vunpack.i.h.bf16 %v1078_v5  ;;  %v1084_v33 = vunpack.i.l.bf16 %v1083_v8 }
 0x31f   :  { %v1085_v49 = vunpack.i.h.bf16 %v1083_v8 }
 0x321   :  { %v332_v7 = vpop.permute.xlu1 %331  ;;  %v328_v11 = vpop.permute.xlu0 %327 }
 0x325   :  { %v330_v9 = vpop.permute.xlu1 %329  ;;  %v326_v13 = vpop.permute.xlu0 %325 }
 0x327   :  { %v1157_v53 = vpop.eup %1156 }
 0x328   :  { %v134_v54 = vmul.f32 %v1157_v53, %v120_v31 }
 0x329   :  { %v1088_v12 = vpop.permute.xlu1 %1087  ;;  %v1423_v15 = vpop.permute.xlu0 %321 }
 0x32a   :  { %v1327_v55 = vmax.f32 %v134_v54, 0.0 }
 0x32b   :  { %v1159_v56 = vpop.eup %1158 }
 0x32c   :  { %237 = vrot.lane.b32.xlu0 %v1327_v55, %s1172_s7  ;;  %222 = vrot.lane.b32.xlu1 %v1327_v55, %s1174_s11  ;;  %v135_v57 = vmul.f32 %v1159_v56, %v121_v35  ;;  %v1089_v56 = vunpack.i.l.bf16 %v1088_v12 }
 0x32d   :  { %v324_v14 = vpop.permute.xlu1 %323  ;;  %v1427_v17 = vpop.permute.xlu0 %315 }
 0x32e   :  { %v1346_v59 = vmax.f32 %v135_v57, 0.0 }
 0x330   :  { %207 = vrot.lane.b32.xlu0 %v1327_v55, %s1175_s18  ;;  %197 = vrot.lane.b32.xlu1 %v1327_v55, %s1173_s8 }
 0x331   :  { %v1425_v16 = vpop.permute.xlu1 %319  ;;  %v1431_v19 = vpop.permute.xlu0 %1097 }
 0x334   :  { %184 = vrot.lane.b32.xlu0 %v1327_v55, %s1176_s27  ;;  %169 = vrot.lane.b32.xlu1 %v1327_v55, %s1177_s28 }
 0x335   :  { %v1429_v18 = vpop.permute.xlu1 %1092 }
 0x338   :  { %313 = vrot.lane.b32.xlu0 %v1344_v58, %s1173_s8  ;;  %241 = vrot.lane.b32.xlu1 %v1346_v59, %s1172_s7 }
 0x339   :  { %v1433_v20 = vpop.permute.xlu1 %317 }
 0x33c   :  { %154 = vrot.lane.b32.xlu0 %v1327_v55, %s1178_s9  ;;  %226 = vrot.lane.b32.xlu1 %v1346_v59, %s1174_s11 }
 0x340   :  { %211 = vrot.lane.b32.xlu0 %v1346_v59, %s1175_s18  ;;  %311 = vrot.lane.b32.xlu1 %v1359_v60, %s1173_s8 }
 0x344   :  { %307 = vrot.lane.b32.xlu0 %v1368_v61, %s1173_s8  ;;  %1102 = vrot.lane.b32.xlu1 %v1170_v10, %s1178_s9 }
 0x348   :  { %199 = vrot.lane.b32.xlu0 %v1346_v59, %s1173_s8  ;;  %188 = vrot.lane.b32.xlu1 %v1346_v59, %s1176_s27 }
 0x34c   :  { %173 = vrot.lane.b32.xlu0 %v1346_v59, %s1177_s28  ;;  %309 = vrot.lane.b32.xlu1 %v1381_v62, %s1173_s8 }
 0x350   :  { %303 = vrot.lane.b32.xlu0 %v1390_v63, %s1173_s8  ;;  %158 = vrot.lane.b32.xlu1 %v1346_v59, %s1178_s9 }
 0x354   :  { %252 = vrot.lane.b32.xlu0 %v1327_v55, %s1179_s22  ;;  %305 = vrot.lane.b32.xlu1 %v1399_v2, %s1173_s8 }
 0x358   :  { %256 = vrot.lane.b32.xlu0 %v1346_v59, %s1179_s22  ;;  %1107 = vrot.lane.b32.xlu1 %v1170_v10, %s1179_s22 }
 0x35c   :  { %337 = vrot.lane.b32.xlu0 %v1412_v3, %s1173_s8  ;;  %335 = vrot.lane.b32.xlu1 %v1417_v4, %s1173_s8 }
 0x39e   :  { %v238_v21 = vpop.permute.xlu0 %237  ;;  %v223_v22 = vpop.permute.xlu1 %222 }
 0x39f   :  { %v246_v30 = vsel %vm245_vm2, %v238_v21, %v1079_v28  ;;  %v383_v34 = vmul.f32 %v332_v7, %v238_v21  ;;  %v231_v50 = vsel %vm230_vm3, %v223_v22, %v1084_v33  ;;  %v379_v57 = vmul.f32 %v328_v11, %v223_v22 }
 0x3a0   :  { %v384_v47 = vmul.f32 %v332_v7, %v246_v30  ;;  %v380_v21 = vmul.f32 %v328_v11, %v231_v50 }
 0x3a2   :  { %v208_v23 = vpop.permute.xlu0 %207  ;;  %v198_v24 = vpop.permute.xlu1 %197 }
 0x3a3   :  { %v216_v8 = vsel %vm215_vm4, %v208_v23, %v1089_v56  ;;  %v1100_v56 = vunpack.i.h.bf16 %v1431_v19 }
 0x3a6   :  { %v1436_v26 = vpop.permute.xlu0 %184  ;;  %v1438_v27 = vpop.permute.xlu1 %169 }
 0x3aa   :  { %v1441_v31 = vpop.permute.xlu0 %313  ;;  %v242_v32 = vpop.permute.xlu1 %241 }
 0x3ab   :  { %v247_v35 = vsel %vm245_vm2, %v242_v32, %v1080_v29  ;;  %v385_v36 = vmul.f32 %v334_v6, %v242_v32 }
 0x3ac   :  { %v386_v48 = vmul.f32 %v334_v6, %v247_v35  ;;  %v1090_v6 = vunpack.i.h.bf16 %v1088_v12 }
 0x3ad   :  { %v405_v51 = vpack.c.bf16 %v385_v36, %v383_v34  ;;  %v375_v34 = vmul.f32 %v324_v14, %v208_v23  ;;  %v376_v36 = vmul.f32 %v324_v14, %v216_v8  ;;  %v1095_v23 = vunpack.i.h.bf16 %v1429_v18 }
 0x3ae   :  { %v1445_v52 = vpop.permute.xlu0 %154  ;;  %v227_v53 = vpop.permute.xlu1 %226  ;;  %v406_v54 = vpack.c.bf16 %v386_v48, %v384_v47 }
 0x3af   :  { %v232_v5 = vsel %vm230_vm3, %v227_v53, %v1085_v49  ;;  %v381_v28 = vmul.f32 %v330_v9, %v227_v53  ;;  %458 = vrot.lane.b32.xlu1 %v405_v51, %s1181_s1  ;;  %v1094_v49 = vunpack.i.l.bf16 %v1429_v18  ;;  %v373_v51 = vmul.f32 %v1425_v16, %v198_v24 }
 0x3b0   :  { %v382_v7 = vmul.f32 %v330_v9, %v232_v5  ;;  %460 = vrot.lane.b32.xlu0 %v406_v54, %s1181_s1  ;;  %v1099_v18 = vunpack.i.l.bf16 %v1431_v19 }
 0x3b1   :  { %v403_v29 = vpack.c.bf16 %v381_v28, %v379_v57  ;;  %v191_v50 = vsel %vm190_vm5, %v1094_v49, %v1436_v26 }
 0x3b2   :  { %v212_v30 = vpop.permute.xlu0 %211  ;;  %v312_v32 = vpop.permute.xlu1 %311  ;;  %v404_v33 = vpack.c.bf16 %v382_v7, %v380_v21  ;;  %v369_v57 = vmul.f32 %v1427_v17, %v191_v50  ;;  %v176_v24 = vsel %vm175_vm6, %v1099_v18, %v1438_v27 }
 0x3b3   :  { %v217_v22 = vsel %vm215_vm4, %v212_v30, %v1090_v6  ;;  %v377_v35 = vmul.f32 %v326_v13, %v212_v30  ;;  %454 = vrot.lane.b32.xlu1 %v403_v29, %s1181_s1  ;;  %v365_v30 = vmul.f32 %v312_v32, %v176_v24 }
 0x3b4   :  { %v378_v47 = vmul.f32 %v326_v13, %v217_v22  ;;  %456 = vrot.lane.b32.xlu0 %v404_v33, %s1181_s1 }
 0x3b5   :  { %v401_v9 = vpack.c.bf16 %v377_v35, %v375_v34 }
 0x3b6   :  { %v308_v11 = vpop.permute.xlu0 %307  ;;  %v1103_v12 = vpop.permute.xlu1 %1102  ;;  %v402_v48 = vpack.c.bf16 %v378_v47, %v376_v36  ;;  %v366_v36 = vmul.f32 %v312_v32, %v1438_v27 }
 0x3b7   :  { %450 = vrot.lane.b32.xlu1 %v401_v9, %s1181_s1  ;;  %v1104_v28 = vunpack.i.l.bf16 %v1103_v12  ;;  %v362_v27 = vmul.f32 %v308_v11, %v1445_v52 }
 0x3b8   :  { %452 = vrot.lane.b32.xlu0 %v402_v48, %s1181_s1 }
 0x3b9   :  { %v161_v22 = vsel %vm160_vm7, %v1104_v28, %v1445_v52 }
 0x3ba   :  { %v200_v14 = vpop.permute.xlu0 %199  ;;  %v189_v13 = vpop.permute.xlu1 %188  ;;  %v361_v48 = vmul.f32 %v308_v11, %v161_v22 }
 0x3bb   :  { %v374_v53 = vmul.f32 %v1423_v15, %v200_v14  ;;  %v192_v54 = vsel %vm190_vm5, %v1095_v23, %v189_v13  ;;  %v372_v7 = vmul.f32 %v1433_v20, %v189_v13  ;;  %v370_v15 = vmul.f32 %v1427_v17, %v1436_v26  ;;  %v1486_v14 = vld [vmem:[%s1713_s3] sm:$0xff] }
 0x3bc   :  { %v371_v5 = vmul.f32 %v1433_v20, %v192_v54  ;;  %v1105_v20 = vunpack.i.h.bf16 %v1103_v12 }
 0x3bd   :  { %v400_v21 = vpack.c.bf16 %v374_v53, %v373_v51  ;;  %v399_v33 = vpack.c.bf16 %v372_v7, %v370_v15  ;;  %v1038_v51 = vcombine.high %v1486_v14, %v1486_v14 }
 0x3be   :  { %v174_v6 = vpop.permute.xlu0 %173  ;;  %v310_v8 = vpop.permute.xlu1 %309  ;;  %v398_v16 = vpack.c.bf16 %v371_v5, %v369_v57 }
 0x3bf   :  { %v177_v29 = vsel %vm175_vm6, %v1100_v56, %v174_v6  ;;  %448 = vrot.lane.b32.xlu1 %v400_v21, %s1181_s1  ;;  %v368_v34 = vmul.f32 %v1441_v31, %v174_v6  ;;  %1039 = vmatprep.mubr.msk.bf16.mxu1 %vm69_vm1, %v1038_v51 }
 0x3c0   :  { %v367_v19 = vmul.f32 %v1441_v31, %v177_v29  ;;  %444 = vrot.lane.b32.xlu0 %v398_v16, %s1181_s1 }
 0x3c1   :  { %v397_v12 = vpack.c.bf16 %v368_v34, %v366_v36 }
 0x3c2   :  { %v304_v17 = vpop.permute.xlu0 %303  ;;  %v159_v26 = vpop.permute.xlu1 %158  ;;  %v396_v35 = vpack.c.bf16 %v367_v19, %v365_v30 }
 0x3c3   :  { %v162_v47 = vsel %vm160_vm7, %v1105_v20, %v159_v26  ;;  %446 = vrot.lane.b32.xlu1 %v399_v33, %s1181_s1  ;;  %v364_v49 = vmul.f32 %v310_v8, %v159_v26  ;;  %v357_v32 = vmul.f32 0.0, %v304_v17  ;;  %v358_v52 = vmul.f32 %v304_v17, %v1327_v55 }
 0x3c4   :  { %v363_v9 = vmul.f32 %v310_v8, %v162_v47  ;;  %440 = vrot.lane.b32.xlu0 %v396_v35, %s1181_s1 }
 0x3c5   :  { %v395_v53 = vpack.c.bf16 %v364_v49, %v362_v27 }
 0x3c6   :  { %v253_v23 = vpop.permute.xlu0 %252  ;;  %v306_v31 = vpop.permute.xlu1 %305  ;;  %v394_v50 = vpack.c.bf16 %v363_v9, %v361_v48 }
 0x3c7   :  { %v359_v13 = vmul.f32 0.0, %v306_v31  ;;  %442 = vrot.lane.b32.xlu1 %v397_v12, %s1181_s1  ;;  %v360_v54 = vmul.f32 %v306_v31, %v1346_v59 }
 0x3c8   :  { %436 = vrot.lane.b32.xlu0 %v394_v50, %s1181_s1 }
 0x3c9   :  { %v392_v56 = vpack.c.bf16 %v359_v13, %v357_v32  ;;  %v393_v28 = vpack.c.bf16 %v360_v54, %v358_v52 }
 0x3ca   :  { %v257_v57 = vpop.permute.xlu0 %256  ;;  %v1108_v5 = vpop.permute.xlu1 %1107 }
 0x3cb   :  { %v1110_v11 = vunpack.i.h.bf16 %v1108_v5  ;;  %v1109_v18 = vunpack.i.l.bf16 %v1108_v5  ;;  %438 = vrot.lane.b32.xlu1 %v395_v53, %s1181_s1 }
 0x3cc   :  { %432 = vrot.lane.b32.xlu0 %v392_v56, %s1181_s1 }
 0x3cd   :  { %v262_v21 = vsel %vm260_vm8, %v257_v57, %v1110_v11  ;;  %v261_v7 = vsel %vm260_vm8, %v253_v23, %v1109_v18 }
 0x3ce   :  { %v338_v59 = vpop.permute.xlu0 %337  ;;  %v336_v6 = vpop.permute.xlu1 %335 }
 0x3cf   :  { %v389_v8 = vmul.f32 %v338_v59, %v257_v57  ;;  %v390_v16 = vmul.f32 %v338_v59, %v262_v21  ;;  %v387_v15 = vmul.f32 %v336_v6, %v253_v23  ;;  %v388_v24 = vmul.f32 %v336_v6, %v261_v7  ;;  %434 = vrot.lane.b32.xlu1 %v393_v28, %s1181_s1 }
 0x3d0   :  { %v1037_v57 = vcombine.low %v1486_v14, %v1486_v14 }
 0x3d1   :  { %v407_v55 = vpack.c.bf16 %v389_v8, %v387_v15  ;;  %v408_v29 = vpack.c.bf16 %v390_v16, %v388_v24 }
 0x3d3   :  { %464 = vrot.lane.b32.xlu1 %v408_v29, %s1181_s1  ;;  %462 = vrot.lane.b32.xlu0 %v407_v55, %s1181_s1 }
 0x3f7   :  { %531 = vadd.xlane.f32.xlu1 %v1220_v0 }
 0x421   :  { %v459_v30 = vpop.permute.xlu1 %458 }
 0x422   :  { %v461_v19 = vpop.permute.xlu0 %460 }
 0x423   :  { %v473_v20 = vsel %vm466_vm9, %v459_v30, %v461_v19 }
 0x424   :  { %488 = vmatpush1.bf16.msra.mxu1 %v473_v20 }
 0x425   :  { %v455_v33 = vpop.permute.xlu1 %454  ;;  %489 = vmatprep.subr.bf16.mxu1 %v1180_v25 }
 0x426   :  { %v457_v34 = vpop.permute.xlu0 %456 }
 0x427   :  { %v472_v22 = vsel %vm466_vm9, %v455_v33, %v457_v34 }
 0x428   :  { %490 = vmatpush1.bf16.msra.mxu1 %v472_v22 }
 0x429   :  { %v451_v17 = vpop.permute.xlu1 %450  ;;  %491 = vmatprep.subr.bf16.mxu1 %v1180_v25 }
 0x42a   :  { %v453_v26 = vpop.permute.xlu0 %452 }
 0x42b   :  { %v471_v35 = vsel %vm466_vm9, %v451_v17, %v453_v26 }
 0x42c   :  { %492 = vmatpush1.bf16.msra.mxu1 %v471_v35 }
 0x42d   :  { %493 = vmatprep.subr.bf16.mxu1 %v1180_v25 }
 0x431   :  { %v449_v36 = vpop.permute.xlu1 %448 }
 0x432   :  { %494 = vmatpush1.bf16.msra.mxu1 %v449_v36  ;;  %v445_v47 = vpop.permute.xlu0 %444 }
 0x433   :  { %495 = vmatprep.subr.bf16.mxu1 %v1180_v25 }
 0x435   :  { %v447_v9 = vpop.permute.xlu1 %446 }
 0x436   :  { %v470_v48 = vsel %vm466_vm9, %v445_v47, %v447_v9  ;;  %v441_v12 = vpop.permute.xlu0 %440 }
 0x437   :  { %496 = vmatpush1.bf16.msra.mxu1 %v470_v48 }
 0x438   :  { %497 = vmatprep.subr.bf16.mxu1 %v1180_v25 }
 0x439   :  { %v443_v49 = vpop.permute.xlu1 %442 }
 0x43a   :  { %v469_v23 = vsel %vm466_vm9, %v441_v12, %v443_v49  ;;  %v437_v31 = vpop.permute.xlu0 %436 }
 0x43b   :  { %498 = vmatpush1.bf16.msra.mxu1 %v469_v23 }
 0x43c   :  { %499 = vmatprep.subr.bf16.mxu1 %v1180_v25 }
 0x43d   :  { %v439_v50 = vpop.permute.xlu1 %438 }
 0x43e   :  { %v468_v27 = vsel %vm466_vm9, %v437_v31, %v439_v50  ;;  %v433_v32 = vpop.permute.xlu0 %432 }
 0x43f   :  { %500 = vmatpush1.bf16.msra.mxu1 %v468_v27 }
 0x440   :  { %501 = vmatprep.subr.bf16.mxu1 %v1180_v25 }
 0x441   :  { %v435_v13 = vpop.permute.xlu1 %434 }
 0x442   :  { %v467_v51 = vsel %vm466_vm9, %v433_v32, %v435_v13  ;;  %v1149_v32 = vld [vmem:[%s1714_s4] sm:$0xff]  }
 0x443   :  { %502 = vmatpush1.bf16.msra.mxu1 %v467_v51 }
 0x444   :  { %517 = vmatprep.subr.bf16.mxu1 %v1180_v25 }
 0x445   :  { %v465_v53 = vpop.permute.xlu1 %464  ;;  %v463_v54 = vpop.permute.xlu0 %462 }
 0x446   :  { %v474_v56 = vsel %vm466_vm9, %v463_v54, %v465_v53 }
 0x447   :  { %518 = vmatpush2.bf16.msra.mxu1 %v474_v56 }
 0x44a   :  { %520 = vmatmul.mubr.bf16.vlgmr.msra.gmra.mxu1 %v1037_v57 }
 0x480   :  { %v532_v28 = vpop.xlane.xlu1 %531 }
 0x481   :  { %v537_v21 = vmul.f32 0.0078125, %v532_v28 }
 0x483   :  { %v540_v14 = vsub.f32 %v1220_v0, %v537_v21 }
 0x485   :  { %v543_v55 = vmul.f32 %v540_v14, %v540_v14 }
 0x50a   :  { %v521_v5 = vpop.f32.mrf.mxu1 }
 0x50b   :  { %527 = vst [vmem:[%s1710_s6 + $0x10] sm:$0xff] %v521_v5  ;;  %535 = vadd.xlane.f32.xlu0 %v521_v5 }
 0x50c   :  { %v523_v52 = vpop.f32.mrf.mxu1 }
 0x50e   :  { %v524_v11 = vpop.f32.mrf.mxu1 }
 0x50f   :  { %533 = vadd.xlane.f32.xlu0 %v1225_v1 }
 0x510   :  { %v525_v18 = vpop.f32.mrf.mxu1 }
 0x594   :  { %v536_v7 = vpop.xlane.xlu0 %535 }
 0x595   :  { %v539_v59 = vmul.f32 0.0078125, %v536_v7 }
 0x597   :  { %v542_v6 = vsub.f32 %v521_v5, %v539_v59 }
 0x598   :  { %v534_v8 = vpop.xlane.xlu0 %533 }
 0x599   :  { %v538_v16 = vmul.f32 0.0078125, %v534_v8  ;;  %v545_v15 = vmul.f32 %v542_v6, %v542_v6 }
 0x59b   :  { %v541_v24 = vsub.f32 %v1225_v1, %v538_v16  ;;  %550 = vadd.xlane.f32.xlu0 %v545_v15 }
 0x59d   :  { %v544_v29 = vmul.f32 %v541_v24, %v541_v24 }
 0x59f   :  { %546 = vadd.xlane.f32.xlu0 %v543_v55  ;;  %548 = vadd.xlane.f32.xlu1 %v544_v29 }
 0x624   :  { %v551_v30 = vpop.xlane.xlu0 %550 }
 0x625   :  { %v554_v19 = vmul.f32 0.0078125, %v551_v30 }
 0x627   :  { %v557_v20 = vadd.f32 1e-05, %v554_v19 }
 0x628   :  { %v549_v33 = vpop.xlane.xlu1 %548  ;;  %v547_v34 = vpop.xlane.xlu0 %546 }
 0x629   :  { %1160 = vrsqrt.f32 %v557_v20  ;;  %v553_v22 = vmul.f32 0.0078125, %v549_v33  ;;  %v552_v17 = vmul.f32 0.0078125, %v547_v34 }
 0x62b   :  { %v556_v26 = vadd.f32 1e-05, %v553_v22  ;;  %v555_v0 = vadd.f32 1e-05, %v552_v17 }
 0x62d   :  { %1162 = vrsqrt.f32 %v556_v26 }
 0x62e   :  { %1164 = vrsqrt.f32 %v555_v0 }
 0x636   :  { %v1161_v35 = vpop.eup %1160 }
 0x637   :  { %v563_v36 = vmul.f32 %v1161_v35, %v542_v6 }
 0x639   :  { %v566_v1 = vmax.f32 %v563_v36, 0.0 }
 0x63a   :  { %v1163_v47 = vpop.eup %1162 }
 0x63b   :  { %v1165_v9 = vpop.eup %1164  ;;  %v570_v48 = vpack.c.bf16 %v566_v1, %v566_v1  ;;  %v562_v12 = vmul.f32 %v1163_v47, %v541_v24 }
 0x63c   :  { %v561_v49 = vmul.f32 %v1165_v9, %v540_v14 }
 0x63d   :  { %v582_v23 = vsel %vm580_vm10, %v570_v48, 0  ;;  %v565_v31 = vmax.f32 %v562_v12, 0.0 }
 0x63e   :  { %1057 = vmatpush3.bf16.msra.mxu0 %v582_v23  ;;  %v564_v50 = vmax.f32 %v561_v49, 0.0 }
 0x63f   :  { %1058 = vmatprep.subr.bf16.mxu0 %v1170_v10 }
 0x640   :  { %v569_v27 = vpack.c.bf16 %v565_v31, %v564_v50 }
 0x642   :  { %1059 = vmatpush3.bf16.msra.mxu0 %v569_v27 }
 0x643   :  { %990 = vmatprep.subr.bf16.mxu0 %v1180_v25 }
 0x645   :  { %1061 = vmatmul.mubr.msk.bf16.vlgmr.msra.gmra.mxu0 %vm576_vm11, %v1149_v32 }
 0x705   :  { %v618_v13 = vpop.f32.mrf.mxu0 }
 0x706   :  { %625 = vadd.xlane.f32.xlu0 %v618_v13 }
 0x707   :  { %v1062_v51 = vpop.f32.mrf.mxu0 }
 0x709   :  { %v621_v53 = vpop.f32.mrf.mxu0 }
 0x70a   :  { %627 = vadd.xlane.f32.xlu1 %v621_v53 }
 0x70b   :  { %v1063_v54 = vpop.f32.mrf.mxu0 }
 0x78f   :  { %v626_v56 = vpop.xlane.xlu0 %625 }
 0x790   :  { %v629_v57 = vmul.f32 0.0078125, %v626_v56 }
 0x792   :  { %v631_v5 = vsub.f32 %v618_v13, %v629_v57 }
 0x793   :  { %v628_v52 = vpop.xlane.xlu1 %627 }
 0x794   :  { %v630_v11 = vmul.f32 0.0078125, %v628_v52  ;;  %v633_v18 = vmul.f32 %v631_v5, %v631_v5 }
 0x796   :  { %v632_v28 = vsub.f32 %v621_v53, %v630_v11  ;;  %635 = vadd.xlane.f32.xlu0 %v633_v18 }
 0x798   :  { %v634_v21 = vmul.f32 %v632_v28, %v632_v28 }
 0x79a   :  { %637 = vadd.xlane.f32.xlu1 %v634_v21 }
 0x7ab   :  { %1112 = vrot.lane.b32.xlu1 %v1170_v10, %s1172_s7 }
 0x7ac   :  { %837 = vrot.lane.b32.xlu0 %v1250_v37, %s1173_s8 }
 0x7af   :  { %835 = vrot.lane.b32.xlu1 %v1259_v38, %s1173_s8 }
 0x7b0   :  { %1117 = vrot.lane.b32.xlu0 %v1170_v10, %s1174_s11 }
 0x7b3   :  { %833 = vrot.lane.b32.xlu1 %v1268_v39, %s1173_s8 }
 0x7b4   :  { %831 = vrot.lane.b32.xlu0 %v1273_v40, %s1173_s8 }
 0x7b7   :  { %1122 = vrot.lane.b32.xlu1 %v1170_v10, %s1175_s18 }
 0x7b8   :  { %829 = vrot.lane.b32.xlu0 %v1282_v41, %s1173_s8 }
 0x7bb   :  { %827 = vrot.lane.b32.xlu1 %v1291_v42, %s1173_s8 }
 0x7bc   :  { %825 = vrot.lane.b32.xlu0 %v1296_v43, %s1173_s8 }
 0x7bf   :  { %823 = vrot.lane.b32.xlu1 %v1305_v44, %s1173_s8 }
 0x7c0   :  { %819 = vrot.lane.b32.xlu0 %v1310_v45, %s1173_s8 }
 0x7c3   :  { %1127 = vrot.lane.b32.xlu1 %v1170_v10, %s1176_s27 }
 0x7c4   :  { %1132 = vrot.lane.b32.xlu0 %v1170_v10, %s1177_s28 }
 0x7c7   :  { %821 = vrot.lane.b32.xlu1 %v1323_v46, %s1173_s8 }
 0x81f   :  { %v636_v37 = vpop.xlane.xlu0 %635 }
 0x820   :  { %v639_v38 = vmul.f32 0.0078125, %v636_v37 }
 0x822   :  { %v641_v39 = vadd.f32 1e-05, %v639_v38 }
 0x823   :  { %v638_v40 = vpop.xlane.xlu1 %637 }
 0x824   :  { %1166 = vrsqrt.f32 %v641_v39  ;;  %v640_v41 = vmul.f32 0.0078125, %v638_v40 }
 0x826   :  { %v642_v42 = vadd.f32 1e-05, %v640_v41 }
 0x828   :  { %1168 = vrsqrt.f32 %v642_v42 }
 0x831   :  { %v1167_v43 = vpop.eup %1166 }
 0x832   :  { %v645_v44 = vmul.f32 %v1167_v43, %v631_v5 }
 0x834   :  { %v1563_v45 = vmax.f32 %v645_v44, 0.0 }
 0x835   :  { %v1169_v7 = vpop.eup %1168 }
 0x836   :  { %743 = vrot.lane.b32.xlu0 %v1563_v45, %s1172_s7  ;;  %729 = vrot.lane.b32.xlu1 %v1563_v45, %s1174_s11  ;;  %v646_v46 = vmul.f32 %v1169_v7, %v632_v28 }
 0x838   :  { %v1577_v59 = vmax.f32 %v646_v46, 0.0 }
 0x83a   :  { %715 = vrot.lane.b32.xlu0 %v1563_v45, %s1175_s18  ;;  %705 = vrot.lane.b32.xlu1 %v1563_v45, %s1173_s8 }
 0x83e   :  { %693 = vrot.lane.b32.xlu0 %v1563_v45, %s1176_s27  ;;  %679 = vrot.lane.b32.xlu1 %v1563_v45, %s1177_s28 }
 0x842   :  { %817 = vrot.lane.b32.xlu0 %v1344_v58, %s1173_s8  ;;  %747 = vrot.lane.b32.xlu1 %v1577_v59, %s1172_s7  ;;  %v1113_v58 = vpop.permute.xlu1 %1112 }
 0x843   :  { %v1114_v34 = vunpack.i.l.bf16 %v1113_v58  ;;  %v1115_v22 = vunpack.i.h.bf16 %v1113_v58 }
 0x846   :  { %665 = vrot.lane.b32.xlu0 %v1563_v45, %s1178_s9  ;;  %733 = vrot.lane.b32.xlu1 %v1577_v59, %s1174_s11 }
 0x84a   :  { %719 = vrot.lane.b32.xlu0 %v1577_v59, %s1175_s18  ;;  %815 = vrot.lane.b32.xlu1 %v1359_v60, %s1173_s8  ;;  %v838_v60 = vpop.permute.xlu0 %837 }
 0x84e   :  { %811 = vrot.lane.b32.xlu0 %v1368_v61, %s1173_s8  ;;  %1137 = vrot.lane.b32.xlu1 %v1170_v10, %s1178_s9  ;;  %v836_v61 = vpop.permute.xlu1 %835 }
 0x852   :  { %707 = vrot.lane.b32.xlu0 %v1577_v59, %s1173_s8  ;;  %697 = vrot.lane.b32.xlu1 %v1577_v59, %s1176_s27 }
 0x856   :  { %683 = vrot.lane.b32.xlu0 %v1577_v59, %s1177_s28  ;;  %813 = vrot.lane.b32.xlu1 %v1381_v62, %s1173_s8  ;;  %v1118_v62 = vpop.permute.xlu0 %1117 }
 0x857   :  { %v1119_v35 = vunpack.i.l.bf16 %v1118_v62  ;;  %v1120_v12 = vunpack.i.h.bf16 %v1118_v62 }
 0x85a   :  { %807 = vrot.lane.b32.xlu0 %v1390_v63, %s1173_s8  ;;  %669 = vrot.lane.b32.xlu1 %v1577_v59, %s1178_s9  ;;  %v834_v63 = vpop.permute.xlu1 %833  ;;  %v832_v6 = vpop.permute.xlu0 %831 }
 0x85e   :  { %757 = vrot.lane.b32.xlu0 %v1563_v45, %s1179_s22  ;;  %809 = vrot.lane.b32.xlu1 %v1399_v2, %s1173_s8  ;;  %v1123_v14 = vpop.permute.xlu1 %1122  ;;  %v830_v2 = vpop.permute.xlu0 %829 }
 0x85f   :  { %v1124_v32 = vunpack.i.l.bf16 %v1123_v14  ;;  %v1125_v57 = vunpack.i.h.bf16 %v1123_v14 }
 0x862   :  { %761 = vrot.lane.b32.xlu0 %v1577_v59, %s1179_s22  ;;  %1142 = vrot.lane.b32.xlu1 %v1170_v10, %s1179_s22  ;;  %v828_v8 = vpop.permute.xlu1 %827  ;;  %v826_v16 = vpop.permute.xlu0 %825 }
 0x866   :  { %841 = vrot.lane.b32.xlu0 %v1412_v3, %s1173_s8  ;;  %839 = vrot.lane.b32.xlu1 %v1417_v4, %s1173_s8  ;;  %v824_v15 = vpop.permute.xlu1 %823  ;;  %v1619_v24 = vpop.permute.xlu0 %819 }
 0x86a   :  { %v1128_v10 = vpop.permute.xlu1 %1127  ;;  %v1621_v55 = vpop.permute.xlu0 %1132 }
 0x86b   :  { %v1129_v7 = vunpack.i.l.bf16 %v1128_v10  ;;  %v1130_v46 = vunpack.i.h.bf16 %v1128_v10  ;;  %v1135_v14 = vunpack.i.h.bf16 %v1621_v55 }
 0x86e   :  { %v1623_v3 = vpop.permute.xlu1 %821 }
 0x8a8   :  { %v744_v29 = vpop.permute.xlu0 %743  ;;  %v730_v4 = vpop.permute.xlu1 %729 }
 0x8a9   :  { %v751_v17 = vsel %vm245_vm2, %v744_v29, %v1114_v34  ;;  %v887_v36 = vmul.f32 %v836_v61, %v744_v29  ;;  %v737_v49 = vsel %vm230_vm3, %v730_v4, %v1119_v35  ;;  %v883_v13 = vmul.f32 %v832_v6, %v730_v4 }
 0x8aa   :  { %v888_v9 = vmul.f32 %v836_v61, %v751_v17  ;;  %v884_v54 = vmul.f32 %v832_v6, %v737_v49  ;;  %v1134_v29 = vunpack.i.l.bf16 %v1621_v55 }
 0x8ac   :  { %v716_v30 = vpop.permute.xlu0 %715  ;;  %v706_v19 = vpop.permute.xlu1 %705 }
 0x8ad   :  { %v723_v5 = vsel %vm215_vm4, %v716_v30, %v1124_v32  ;;  %v879_v21 = vmul.f32 %v828_v8, %v716_v30  ;;  %v877_v62 = vmul.f32 %v824_v15, %v706_v19 }
 0x8ae   :  { %v880_v39 = vmul.f32 %v828_v8, %v723_v5 }
 0x8b0   :  { %v1625_v20 = vpop.permute.xlu0 %693  ;;  %v1627_v33 = vpop.permute.xlu1 %679 }
 0x8b1   :  { %v699_v58 = vsel %vm190_vm5, %v1129_v7, %v1625_v20  ;;  %v685_v15 = vsel %vm175_vm6, %v1134_v29, %v1627_v33 }
 0x8b4   :  { %v1630_v26 = vpop.permute.xlu0 %817  ;;  %v748_v0 = vpop.permute.xlu1 %747 }
 0x8b5   :  { %v752_v1 = vsel %vm245_vm2, %v748_v0, %v1115_v22  ;;  %v889_v47 = vmul.f32 %v838_v60, %v748_v0 }
 0x8b6   :  { %v890_v48 = vmul.f32 %v838_v60, %v752_v1 }
 0x8b7   :  { %v909_v23 = vpack.c.bf16 %v889_v47, %v887_v36 }
 0x8b8   :  { %v910_v31 = vpack.c.bf16 %v890_v48, %v888_v9  ;;  %v1634_v50 = vpop.permute.xlu0 %665  ;;  %v734_v27 = vpop.permute.xlu1 %733 }
 0x8b9   :  { %v738_v51 = vsel %vm230_vm3, %v734_v27, %v1120_v12  ;;  %v885_v53 = vmul.f32 %v834_v63, %v734_v27  ;;  %962 = vrot.lane.b32.xlu1 %v909_v23, %s1181_s1 }
 0x8ba   :  { %v886_v56 = vmul.f32 %v834_v63, %v738_v51  ;;  %964 = vrot.lane.b32.xlu0 %v910_v31, %s1181_s1 }
 0x8bb   :  { %v907_v52 = vpack.c.bf16 %v885_v53, %v883_v13 }
 0x8bc   :  { %v908_v11 = vpack.c.bf16 %v886_v56, %v884_v54  ;;  %v720_v18 = vpop.permute.xlu0 %719  ;;  %v816_v28 = vpop.permute.xlu1 %815 }
 0x8bd   :  { %v724_v37 = vsel %vm215_vm4, %v720_v18, %v1125_v57  ;;  %v881_v38 = vmul.f32 %v830_v2, %v720_v18  ;;  %958 = vrot.lane.b32.xlu1 %v907_v52, %s1181_s1  ;;  %v869_v0 = vmul.f32 %v816_v28, %v685_v15  ;;  %v870_v9 = vmul.f32 %v816_v28, %v1627_v33  ;;  %v1673_v33 = vld [vmem:[%s1715_s5] sm:$0xff] }
 0x8be   :  { %v882_v40 = vmul.f32 %v830_v2, %v724_v37  ;;  %960 = vrot.lane.b32.xlu0 %v908_v11, %s1181_s1  ;;  %v873_v2 = vmul.f32 %v1619_v24, %v699_v58  ;;  %v1043_v54 = vcombine.high %v1673_v33, %v1673_v33 }
 0x8bf   :  { %v905_v41 = vpack.c.bf16 %v881_v38, %v879_v21 }
 0x8c0   :  { %v906_v42 = vpack.c.bf16 %v882_v40, %v880_v39  ;;  %v812_v43 = vpop.permute.xlu0 %811  ;;  %v1138_v44 = vpop.permute.xlu1 %1137  ;;  %1044 = vmatprep.mubr.msk.bf16.mxu0 %vm69_vm1, %v1043_v54 }
 0x8c1   :  { %954 = vrot.lane.b32.xlu1 %v905_v41, %s1181_s1  ;;  %v1139_v4 = vunpack.i.l.bf16 %v1138_v44  ;;  %v1140_v35 = vunpack.i.h.bf16 %v1138_v44 }
 0x8c2   :  { %956 = vrot.lane.b32.xlu0 %v906_v42, %s1181_s1 }
 0x8c4   :  { %v708_v60 = vpop.permute.xlu0 %707  ;;  %v698_v61 = vpop.permute.xlu1 %697 }
 0x8c5   :  { %v878_v63 = vmul.f32 %v826_v16, %v708_v60  ;;  %v700_v6 = vsel %vm190_vm5, %v1130_v46, %v698_v61  ;;  %v876_v10 = vmul.f32 %v1623_v3, %v698_v61  ;;  %v874_v16 = vmul.f32 %v1619_v24, %v1625_v20 }
 0x8c6   :  { %v875_v8 = vmul.f32 %v1623_v3, %v700_v6  ;;  %v671_v3 = vsel %vm160_vm7, %v1139_v4, %v1634_v50 }
 0x8c7   :  { %v904_v30 = vpack.c.bf16 %v878_v63, %v877_v62  ;;  %v903_v36 = vpack.c.bf16 %v876_v10, %v874_v16  ;;  %v865_v12 = vmul.f32 %v812_v43, %v671_v3 }
 0x8c8   :  { %v902_v34 = vpack.c.bf16 %v875_v8, %v873_v2  ;;  %v684_v22 = vpop.permute.xlu0 %683  ;;  %v814_v17 = vpop.permute.xlu1 %813 }
 0x8c9   :  { %v686_v19 = vsel %vm175_vm6, %v1135_v14, %v684_v22  ;;  %952 = vrot.lane.b32.xlu1 %v904_v30, %s1181_s1  ;;  %v872_v1 = vmul.f32 %v1630_v26, %v684_v22 }
 0x8ca   :  { %v871_v55 = vmul.f32 %v1630_v26, %v686_v19  ;;  %948 = vrot.lane.b32.xlu0 %v902_v34, %s1181_s1  ;;  %v866_v26 = vmul.f32 %v812_v43, %v1634_v50 }
 0x8cb   :  { %v901_v23 = vpack.c.bf16 %v872_v1, %v870_v9 }
 0x8cc   :  { %v900_v24 = vpack.c.bf16 %v871_v55, %v869_v0  ;;  %v808_v20 = vpop.permute.xlu0 %807  ;;  %v670_v47 = vpop.permute.xlu1 %669 }
 0x8cd   :  { %v672_v48 = vsel %vm160_vm7, %v1140_v35, %v670_v47  ;;  %950 = vrot.lane.b32.xlu1 %v903_v36, %s1181_s1  ;;  %v868_v31 = vmul.f32 %v814_v17, %v670_v47  ;;  %v861_v51 = vmul.f32 0.0, %v808_v20  ;;  %v862_v11 = vmul.f32 %v808_v20, %v1563_v45 }
 0x8ce   :  { %v867_v49 = vmul.f32 %v814_v17, %v672_v48  ;;  %944 = vrot.lane.b32.xlu0 %v900_v24, %s1181_s1  ;;  %v1042_v36 = vcombine.low %v1673_v33, %v1673_v33 }
 0x8cf   :  { %v899_v56 = vpack.c.bf16 %v868_v31, %v866_v26 }
 0x8d0   :  { %v898_v27 = vpack.c.bf16 %v867_v49, %v865_v12  ;;  %v758_v32 = vpop.permute.xlu0 %757  ;;  %v810_v13 = vpop.permute.xlu1 %809 }
 0x8d1   :  { %v863_v53 = vmul.f32 0.0, %v810_v13  ;;  %946 = vrot.lane.b32.xlu1 %v901_v23, %s1181_s1  ;;  %v864_v57 = vmul.f32 %v810_v13, %v1577_v59 }
 0x8d2   :  { %940 = vrot.lane.b32.xlu0 %v898_v27, %s1181_s1 }
 0x8d3   :  { %v896_v5 = vpack.c.bf16 %v863_v53, %v861_v51  ;;  %v897_v21 = vpack.c.bf16 %v864_v57, %v862_v11 }
 0x8d4   :  { %v762_v52 = vpop.permute.xlu0 %761  ;;  %v1143_v50 = vpop.permute.xlu1 %1142 }
 0x8d5   :  { %v1145_v18 = vunpack.i.h.bf16 %v1143_v50  ;;  %v1144_v28 = vunpack.i.l.bf16 %v1143_v50  ;;  %942 = vrot.lane.b32.xlu1 %v899_v56, %s1181_s1 }
 0x8d6   :  { %936 = vrot.lane.b32.xlu0 %v896_v5, %s1181_s1 }
 0x8d7   :  { %v766_v37 = vsel %vm260_vm8, %v762_v52, %v1145_v18  ;;  %v765_v38 = vsel %vm260_vm8, %v758_v32, %v1144_v28 }
 0x8d8   :  { %v842_v39 = vpop.permute.xlu0 %841  ;;  %v840_v59 = vpop.permute.xlu1 %839 }
 0x8d9   :  { %v893_v40 = vmul.f32 %v842_v39, %v762_v52  ;;  %v894_v41 = vmul.f32 %v842_v39, %v766_v37  ;;  %v891_v42 = vmul.f32 %v840_v59, %v758_v32  ;;  %v892_v43 = vmul.f32 %v840_v59, %v765_v38  ;;  %938 = vrot.lane.b32.xlu1 %v897_v21, %s1181_s1 }
 0x8db   :  { %v911_v45 = vpack.c.bf16 %v893_v40, %v891_v42  ;;  %v912_v44 = vpack.c.bf16 %v894_v41, %v892_v43 }
 0x8dd   :  { %968 = vrot.lane.b32.xlu1 %v912_v44, %s1181_s1  ;;  %966 = vrot.lane.b32.xlu0 %v911_v45, %s1181_s1 }
 0x92b   :  { %v963_v7 = vpop.permute.xlu1 %962 }
 0x92c   :  { %v965_v46 = vpop.permute.xlu0 %964 }
 0x92d   :  { %v976_v58 = vsel %vm466_vm9, %v963_v7, %v965_v46 }
 0x92e   :  { %991 = vmatpush1.bf16.msra.mxu0 %v976_v58 }
 0x92f   :  { %v959_v60 = vpop.permute.xlu1 %958  ;;  %992 = vmatprep.subr.bf16.mxu0 %v1180_v25 }
 0x930   :  { %v961_v61 = vpop.permute.xlu0 %960 }
 0x931   :  { %v975_v62 = vsel %vm466_vm9, %v959_v60, %v961_v61 }
 0x932   :  { %993 = vmatpush1.bf16.msra.mxu0 %v975_v62 }
 0x933   :  { %v955_v63 = vpop.permute.xlu1 %954  ;;  %994 = vmatprep.subr.bf16.mxu0 %v1180_v25 }
 0x934   :  { %v957_v6 = vpop.permute.xlu0 %956 }
 0x935   :  { %v974_v14 = vsel %vm466_vm9, %v955_v63, %v957_v6 }
 0x936   :  { %995 = vmatpush1.bf16.msra.mxu0 %v974_v14 }
 0x937   :  { %996 = vmatprep.subr.bf16.mxu0 %v1180_v25 }
 0x93b   :  { %v953_v2 = vpop.permute.xlu1 %952 }
 0x93c   :  { %997 = vmatpush1.bf16.msra.mxu0 %v953_v2  ;;  %v949_v8 = vpop.permute.xlu0 %948 }
 0x93d   :  { %998 = vmatprep.subr.bf16.mxu0 %v1180_v25 }
 0x93f   :  { %v951_v29 = vpop.permute.xlu1 %950 }
 0x940   :  { %v973_v4 = vsel %vm466_vm9, %v949_v8, %v951_v29  ;;  %v945_v30 = vpop.permute.xlu0 %944 }
 0x941   :  { %999 = vmatpush1.bf16.msra.mxu0 %v973_v4 }
 0x942   :  { %1000 = vmatprep.subr.bf16.mxu0 %v1180_v25 }
 0x943   :  { %v947_v10 = vpop.permute.xlu1 %946 }
 0x944   :  { %v972_v34 = vsel %vm466_vm9, %v945_v30, %v947_v10  ;;  %v941_v22 = vpop.permute.xlu0 %940 }
 0x945   :  { %1001 = vmatpush1.bf16.msra.mxu0 %v972_v34 }
 0x946   :  { %1002 = vmatprep.subr.bf16.mxu0 %v1180_v25 }
 0x947   :  { %v943_v17 = vpop.permute.xlu1 %942 }
 0x948   :  { %v971_v16 = vsel %vm466_vm9, %v941_v22, %v943_v17  ;;  %v937_v15 = vpop.permute.xlu0 %936 }
 0x949   :  { %1003 = vmatpush1.bf16.msra.mxu0 %v971_v16 }
 0x94a   :  { %1004 = vmatprep.subr.bf16.mxu0 %v1180_v25 }
 0x94b   :  { %v939_v19 = vpop.permute.xlu1 %938 }
 0x94c   :  { %v970_v0 = vsel %vm466_vm9, %v937_v15, %v939_v19 }
 0x94d   :  { %1005 = vmatpush1.bf16.msra.mxu0 %v970_v0 }
 0x94e   :  { %1020 = vmatprep.subr.bf16.mxu0 %v1180_v25 }
 0x94f   :  { %v969_v55 = vpop.permute.xlu1 %968  ;;  %v967_v35 = vpop.permute.xlu0 %966 }
 0x950   :  { %v977_v3 = vsel %vm466_vm9, %v967_v35, %v969_v55 }
 0x951   :  { %1021 = vmatpush2.bf16.msra.mxu0 %v977_v3 }
 0x954   :  { %1023 = vmatmul.mubr.bf16.vlgmr.msra.gmra.mxu0 %v1042_v36 }
 0xa14   :  { %v1024_v1 = vpop.f32.mrf.mxu0 }
 0xa15   :  { %1030 = vst [vmem:[%s1710_s6 + $0x18] sm:$0xff] %v1024_v1 }
 0xa16   :  { %v1026_v24 = vpop.f32.mrf.mxu0 }
 0xa18   :  { %v1027_v20 = vpop.f32.mrf.mxu0 }
 0xa1a   :  { %v1028_v47 = vpop.f32.mrf.mxu0 }

// kernel: forward.9
= control target key start
LH: loop header
LB: loop body
LE: loop exit
PB: predicated region body
PF: predicated region fallthrough
CT: control target
= control target key end

     0   :  { %vm25_vm0 = vcmask 261120   ;;  %v305_v57 = vmov 0   ;;  %vm252_vm1 = vcmask 11264   ;;  %vm249_vm2 = vcmask 15360   ;;  %s402_s0 = inlined_call_operand.vmem [shape: f32[32,32], index: 0, kind: input, shape index: {}]   ;;  %s403_s1 = inlined_call_operand.vmem [shape: bf16[32,2], index: 1, kind: input, shape index: {}]   ;;  %s404_s3 = inlined_call_operand.vmem [shape: bf16[20,32], index: 3, kind: input, shape index: {}]   ;;  %s405_s4 = inlined_call_operand.vmem [shape: f32[20,1], index: 4, kind: input, shape index: {}]   ;;  %s406_s2 = inlined_call_operand.vmem [shape: f32[32,2], index: 2, kind: input, shape index: {}]   ;;  %s407_s5 = inlined_call_operand.vmem [shape: f32[20,2], index: 5, kind: output, shape index: {}]  }
   0x1   :  { %v21_v0 = vld [vmem:[%s402_s0] sm:$0xff]  ;;  %v23_v1 = vld [vmem:[%s402_s0 + $0x10] sm:$0xff]  ;;  %v22_v2 = vld [vmem:[%s402_s0 + $0x8] sm:$0xff]  ;;  %292 = vset.pattern.permute.xlu1 %v305_v57  ;;  %291 = vset.pattern.permute.xlu0 %v305_v57 }
   0x2   :  { %v26_v3 = vsel %vm25_vm0, %v21_v0, 0.0  ;;  %v32_v4 = vsel %vm25_vm0, %v23_v1, 0.0  ;;  %v24_v5 = vld [vmem:[%s402_s0 + $0x18] sm:$0xff]  ;;  %v29_v6 = vsel %vm25_vm0, %v22_v2, 0.0  ;;  %v293_v28 = vld [vmem:[%s403_s1 + $0x8] sm:$0xff]   ;;  %v294_v29 = vld [vmem:[%s403_s1] sm:$0xff]  }
   0x3   :  { %27 = vadd.xlane.f32.xlu0 %v26_v3  ;;  %33 = vadd.xlane.f32.xlu1 %v32_v4  ;;  %v35_v7 = vsel %vm25_vm0, %v24_v5, 0.0  ;;  %v295_v56 = vld [vmem:[%s404_s3] sm:$0xff]   ;;  %v170_v58 = vld [vmem:[%s405_s4 + $0x8] sm:$0xff]  ;;  %v171_v60 = vld [vmem:[%s405_s4 + $0x10] sm:$0xf] }
   0x4   :  { %274 = vmatprep.subr.bf16.mxu0 %v293_v28  ;;  %286 = vmatprep.mubr.msk.bf16.mxu1 %vm25_vm0, %v295_v56  ;;  %v169_v59 = vld [vmem:[%s405_s4] sm:$0xff]  ;;  %v158_v62 = vld [vmem:[%s406_s2 + $0x10] sm:$0xff]  ;;  %v157_v3 = vld [vmem:[%s406_s2 + $0x8] sm:$0xff] }
   0x5   :  { %275 = vmatpush3.bf16.msra.mxu0 %v293_v28 }
   0x6   :  { %276 = vmatprep.subr.bf16.mxu0 %v294_v29 }
   0x7   :  { %30 = vadd.xlane.f32.xlu0 %v29_v6  ;;  %36 = vadd.xlane.f32.xlu1 %v35_v7 }
   0x9   :  { %277 = vmatpush3.bf16.msra.mxu0 %v294_v29 }
  0x8c   :  { %v28_v8 = vpop.xlane.xlu0 %27  ;;  %v34_v9 = vpop.xlane.xlu1 %33 }
  0x8d   :  { %v39_v10 = vmul.f32 0.03125, %v28_v8  ;;  %v41_v11 = vmul.f32 0.03125, %v34_v9 }
  0x8f   :  { %v43_v12 = vsub.f32 %v21_v0, %v39_v10  ;;  %v45_v13 = vsub.f32 %v23_v1, %v41_v11  ;;  %v159_v0 = vld [vmem:[%s406_s2 + $0x18] sm:$0xff]  ;;  %v156_v1 = vld [vmem:[%s406_s2] sm:$0xff]  ;;  %v296_v11 = vld [vmem:[%s404_s3 + $0x8] ss:$0 sps:$4 sm:$0x33]  }
  0x90   :  { %v31_v14 = vpop.xlane.xlu0 %30  ;;  %v37_v15 = vpop.xlane.xlu1 %36 }
  0x91   :  { %v40_v16 = vmul.f32 0.03125, %v31_v14  ;;  %v42_v17 = vmul.f32 0.03125, %v37_v15  ;;  %v47_v18 = vmul.f32 %v43_v12, %v43_v12  ;;  %v49_v19 = vmul.f32 %v45_v13, %v45_v13 }
  0x93   :  { %v44_v20 = vsub.f32 %v22_v2, %v40_v16  ;;  %v46_v21 = vsub.f32 %v24_v5, %v42_v17  ;;  %v51_v22 = vsel %vm25_vm0, %v47_v18, 0.0  ;;  %v57_v23 = vsel %vm25_vm0, %v49_v19, 0.0 }
  0x94   :  { %52 = vadd.xlane.f32.xlu0 %v51_v22 }
  0x95   :  { %v48_v24 = vmul.f32 %v44_v20, %v44_v20  ;;  %v50_v25 = vmul.f32 %v46_v21, %v46_v21 }
  0x97   :  { %v54_v26 = vsel %vm25_vm0, %v48_v24, 0.0  ;;  %v60_v27 = vsel %vm25_vm0, %v50_v25, 0.0 }
  0x98   :  { %58 = vadd.xlane.f32.xlu0 %v57_v23  ;;  %55 = vadd.xlane.f32.xlu1 %v54_v26 }
  0x9c   :  { %61 = vadd.xlane.f32.xlu1 %v60_v27 }
  0xad   :  { %179 = vperm.xlu1 %292, %v170_v58  }
  0xae   :  { %174 = vperm.xlu0 %291, %v169_v59  }
  0xb1   :  { %184 = vperm.xlu1 %292, %v171_v60  }
 0x11d   :  { %v53_v30 = vpop.xlane.xlu0 %52 }
 0x11e   :  { %v63_v31 = vmul.f32 0.03125, %v53_v30 }
 0x120   :  { %v67_v32 = vadd.f32 1e-05, %v63_v31 }
 0x121   :  { %v56_v33 = vpop.xlane.xlu1 %55  ;;  %v59_v34 = vpop.xlane.xlu0 %58 }
 0x122   :  { %297 = vrsqrt.f32 %v67_v32  ;;  %v64_v35 = vmul.f32 0.03125, %v56_v33  ;;  %v65_v36 = vmul.f32 0.03125, %v59_v34 }
 0x124   :  { %v68_v37 = vadd.f32 1e-05, %v64_v35  ;;  %v69_v38 = vadd.f32 1e-05, %v65_v36 }
 0x125   :  { %v62_v39 = vpop.xlane.xlu1 %61 }
 0x126   :  { %299 = vrsqrt.f32 %v68_v37  ;;  %v66_v40 = vmul.f32 0.03125, %v62_v39 }
 0x127   :  { %301 = vrsqrt.f32 %v69_v38 }
 0x128   :  { %v70_v41 = vadd.f32 1e-05, %v66_v40 }
 0x129   :  { %v175_v15 = vpop.permute.xlu0 %174 }
 0x12a   :  { %303 = vrsqrt.f32 %v70_v41 }
 0x12f   :  { %v298_v42 = vpop.eup %297 }
 0x130   :  { %v75_v43 = vmul.f32 %v298_v42, %v43_v12  ;;  %v180_v12 = vpop.permute.xlu1 %179 }
 0x132   :  { %v79_v47 = vmax.f32 %v75_v43, 0.0 }
 0x133   :  { %v300_v44 = vpop.eup %299 }
 0x134   :  { %v302_v45 = vpop.eup %301  ;;  %v76_v46 = vmul.f32 %v300_v44, %v44_v20 }
 0x135   :  { %v77_v49 = vmul.f32 %v302_v45, %v45_v13  ;;  %v185_v13 = vpop.permute.xlu1 %184 }
 0x136   :  { %v80_v48 = vmax.f32 %v76_v46, 0.0 }
 0x137   :  { %v304_v50 = vpop.eup %303  ;;  %v81_v53 = vmax.f32 %v77_v49, 0.0 }
 0x138   :  { %v83_v51 = vpack.c.bf16 %v80_v48, %v79_v47  ;;  %v78_v52 = vmul.f32 %v304_v50, %v46_v21 }
 0x13a   :  { %278 = vmatprep.mubr.msk.bf16.mxu0 %vm25_vm0, %v83_v51  ;;  %v82_v54 = vmax.f32 %v78_v52, 0.0 }
 0x13c   :  { %v84_v55 = vpack.c.bf16 %v82_v54, %v81_v53 }
 0x13e   :  { %279 = vmatmul.mubr.msk.bf16.vlgmr.msra.gmra.mxu0 %vm25_vm0, %v84_v55 }
 0x1fe   :  { %v280_v61 = vpop.f32.mrf.mxu0 }
 0x1ff   :  { %v162_v4 = vmul.f32 %v280_v61, %v158_v62 }
 0x200   :  { %v141_v63 = vpop.f32.mrf.mxu0 }
 0x201   :  { %v160_v7 = vmul.f32 %v156_v1, %v141_v63 }
 0x202   :  { %v281_v2 = vpop.f32.mrf.mxu0 }
 0x203   :  { %v163_v5 = vmul.f32 %v281_v2, %v159_v0 }
 0x204   :  { %v144_v6 = vpop.f32.mrf.mxu0 }
 0x205   :  { %v161_v8 = vmul.f32 %v157_v3, %v144_v6  ;;  %v168_v9 = vpack.c.bf16 %v163_v5, %v162_v4 }
 0x207   :  { %v167_v10 = vpack.c.bf16 %v161_v8, %v160_v7  ;;  %282 = vmatprep.subr.bf16.mxu1 %v168_v9 }
 0x208   :  { %283 = vmatpush3.bf16.msra.mxu1 %v168_v9 }
 0x209   :  { %284 = vmatprep.subr.bf16.mxu1 %v167_v10 }
 0x20c   :  { %285 = vmatpush3.bf16.msra.mxu1 %v167_v10 }
 0x20f   :  { %287 = vmatmul.mubr.msk.bf16.vlgmr.msra.gmra.mxu1 %vm25_vm0, %v296_v11 }
 0x2cf   :  { %v288_v14 = vpop.f32.mrf.mxu1 }
 0x2d0   :  { %v244_v16 = vadd.f32 %v288_v14, %v185_v13 }
 0x2d1   :  { %v235_v17 = vpop.f32.mrf.mxu1 }
 0x2d2   :  { %253 = vst.msk [vmem:[%s407_s5 + $0x10] sm:$0xf] %vm252_vm1, %v244_v16  ;;  %v236_v18 = vadd.f32 %v235_v17, %v175_v15 }
 0x2d3   :  { %v289_v19 = vpop.f32.mrf.mxu1 }
 0x2d4   :  { %250 = vst.msk [vmem:[%s407_s5] sm:$0xff] %vm249_vm2, %v236_v18 }
 0x2d5   :  { %v238_v20 = vpop.f32.mrf.mxu1 }
 0x2d6   :  { %v239_v21 = vadd.f32 %v238_v20, %v180_v12 }
 0x2d8   :  { %251 = vst.msk [vmem:[%s407_s5 + $0x8] sm:$0xff] %vm249_vm2, %v239_v21 }

// kernel: forward.8
= control target key start
LH: loop header
LB: loop body
LE: loop exit
PB: predicated region body
PF: predicated region fallthrough
CT: control target
= control target key end

     0   :  { %vm26_vm0 = vcmask 261120   ;;  %v1009_v16 = vmov 0.0   ;;  %vm1010_vm1 = vmmov 0   ;;  %vm74_vm2 = vcmask 130048   ;;  %s1011_s13 = smov 123   ;;  %s1012_s24 = smov 124   ;;  %s1469_s0 = inlined_call_operand.vmem [shape: f32[16,32], index: 0, kind: input, shape index: {}]   ;;  %s1470_s6 = inlined_call_operand.vmem [shape: f32[32,32], index: 6, kind: output, shape index: {}]   ;;  %s1471_s2 = inlined_call_operand.vmem [shape: bf16[16,16], index: 2, kind: input, shape index: {}]   ;;  %s1472_s1 = inlined_call_operand.vmem [shape: f32[144,32], index: 1, kind: input, shape index: {}]   ;;  %s1473_s3 = inlined_call_operand.vmem [shape: bf16[8,144], index: 3, kind: input, shape index: {}]   ;;  %s1474_s4 = inlined_call_operand.vmem [shape: bf16[16,24], index: 4, kind: input, shape index: {}]   ;;  %s1475_s5 = inlined_call_operand.vmem [shape: bf16[8,144], index: 5, kind: input, shape index: {}]  }
   0x1   :  { %v24_v0 = vld [vmem:[%s1469_s0] sm:$0xff]  ;;  %v25_v1 = vld [vmem:[%s1469_s0 + $0x8] sm:$0xff]  ;;  %929 = vmatprep.subr.bf16.mxu1 %v1009_v16  ;;  %30 = vst [vmem:[#allocation2 + $0x8] sm:$0xff] %v1009_v16  ;;  %33 = vst [vmem:[#allocation2 + $0x20] sm:$0xff] %v1009_v16  ;;  %935 = vmatprep.subr.bf16.mxu0 %v1009_v16  ;;  %s1013_s0 = smov 126   ;;  %s1014_s9 = smov 127  }
   0x2   :  { %27 = vst.msk [vmem:[%s1470_s6] sm:$0xff] %vm26_vm0, %v24_v0  ;;  %28 = vst.msk [vmem:[%s1470_s6 + $0x8] sm:$0xff] %vm26_vm0, %v25_v1  ;;  %931 = vmatprep.mubr.msk.bf16.mxu1 %vm1010_vm1, %v1009_v16  ;;  %939 = vmatprep.mubr.msk.bf16.mxu0 %vm1010_vm1, %v1009_v16  ;;  %v985_v30 = vld [vmem:[%s1471_s2] sm:$0xff]   ;;  %v1111_v47 = vld [vmem:[%s1472_s1 + $0x70] sm:$0xff]  ;;  %s1015_s11 = smov 119   ;;  %s1016_s12 = smov 120  }
   0x3   :  { %v1116_v48 = vld [vmem:[%s1472_s1 + $0x60] sm:$0xff]  ;;  %v1125_v49 = vld [vmem:[%s1472_s1 + $0x78] sm:$0xff]  ;;  %v1130_v50 = vld [vmem:[%s1472_s1 + $0x50] sm:$0xff]  ;;  %s1017_s14 = smov 122   ;;  %s1019_s23 = smov 118   ;;  %vm195_vm3 = vcmask 1014784  }
   0x4   :  { %v1139_v51 = vld [vmem:[%s1472_s1 + $0x68] sm:$0xff]  ;;  %v1144_v52 = vld [vmem:[%s1472_s1 + $0x40] sm:$0xff]  ;;  %v1153_v53 = vld [vmem:[%s1472_s1 + $0x58] sm:$0xff]  ;;  %vm180_vm4 = vcmask 1031168   ;;  %vm165_vm5 = vcmask 1039360   ;;  %vm407_vm6 = vcmask 39936  }
   0x5   :  { %v1162_v54 = vld [vmem:[%s1472_s1 + $0x48] sm:$0xff]  ;;  %v1167_v55 = vld [vmem:[%s1472_s1 + $0x38] sm:$0xff]  ;;  %v1176_v56 = vld [vmem:[%s1472_s1 + $0x30] sm:$0xff]  ;;  %vm523_vm7 = vcmask 1043456   ;;  %vm519_vm8 = vcmask 195584  }
   0x6   :  { %v1181_v57 = vld [vmem:[%s1472_s1 + $0x20] sm:$0xff]  ;;  %v1194_v58 = vld [vmem:[%s1472_s1 + $0x28] sm:$0xff] }
   0x9   :  { %v1073_v2 = vld [vmem:[%s1470_s6] sm:$0xff]  ;;  %v1078_v3 = vld [vmem:[%s1470_s6 + $0x8] sm:$0xff] }
   0xa   :  { %v1082_v4 = vsel %vm26_vm0, %v1073_v2, 0.0  ;;  %v1087_v5 = vsel %vm26_vm0, %v1078_v3, 0.0 }
   0xb   :  { %38 = vadd.xlane.f32.xlu0 %v1082_v4 }
   0xf   :  { %41 = vadd.xlane.f32.xlu0 %v1087_v5 }
  0x94   :  { %v39_v6 = vpop.xlane.xlu0 %38 }
  0x95   :  { %v44_v7 = vmul.f32 0.03125, %v39_v6 }
  0x97   :  { %v46_v8 = vsub.f32 %v1073_v2, %v44_v7 }
  0x98   :  { %v42_v9 = vpop.xlane.xlu0 %41 }
  0x99   :  { %v45_v10 = vmul.f32 0.03125, %v42_v9  ;;  %v48_v11 = vmul.f32 %v46_v8, %v46_v8 }
  0x9b   :  { %v47_v12 = vsub.f32 %v1078_v3, %v45_v10  ;;  %v50_v13 = vsel %vm26_vm0, %v48_v11, 0.0 }
  0x9c   :  { %51 = vadd.xlane.f32.xlu1 %v50_v13  ;;  %v1231_v13 = vld [vmem:[%s1472_s1 + $0x18] sm:$0xff] }
  0x9d   :  { %v49_v14 = vmul.f32 %v47_v12, %v47_v12 }
  0x9f   :  { %v53_v15 = vsel %vm26_vm0, %v49_v14, 0.0  ;;  %v1240_v14 = vld [vmem:[%s1472_s1 + $0x10] sm:$0xff] }
  0xa0   :  { %54 = vadd.xlane.f32.xlu1 %v53_v15  ;;  %v1249_v15 = vld [vmem:[%s1472_s1 + $0x8] sm:$0xff] }
 0x125   :  { %v52_v17 = vpop.xlane.xlu1 %51 }
 0x126   :  { %v56_v18 = vmul.f32 0.03125, %v52_v17  ;;  %v1254_v17 = vld [vmem:[%s1472_s1] sm:$0xff] }
 0x128   :  { %v58_v19 = vadd.f32 1e-05, %v56_v18  ;;  %v1018_v18 = vmov 0  }
 0x129   :  { %v55_v20 = vpop.xlane.xlu1 %54 }
 0x12a   :  { %991 = vrsqrt.f32 %v58_v19  ;;  %v57_v21 = vmul.f32 0.03125, %v55_v20  ;;  %v1268_v19 = vld [vmem:[%s1472_s1 + $0x88] sm:$0xff]  ;;  %v1273_v20 = vld [vmem:[%s1472_s1 + $0x80] sm:$0xff]  ;;  %s1020_s1 = smov 5  }
 0x12c   :  { %v59_v22 = vadd.f32 1e-05, %v57_v21 }
 0x12e   :  { %993 = vrsqrt.f32 %v59_v22 }
 0x137   :  { %v992_v23 = vpop.eup %991 }
 0x138   :  { %v62_v24 = vmul.f32 %v992_v23, %v46_v8 }
 0x13a   :  { %v64_v27 = vmax.f32 %v62_v24, 0.0 }
 0x13b   :  { %v994_v25 = vpop.eup %993 }
 0x13c   :  { %v63_v26 = vmul.f32 %v994_v25, %v47_v12 }
 0x13e   :  { %v65_v28 = vmax.f32 %v63_v26, 0.0 }
 0x140   :  { %v68_v29 = vpack.c.bf16 %v65_v28, %v64_v27 }
 0x142   :  { %930 = vmatpush3.bf16.msra.mxu1 %v68_v29 }
 0x143   :  { %424 = vmatprep.subr.bf16.mxu1 %v1018_v18 }
 0x145   :  { %932 = vmatmul.mubr.msk.bf16.vlgmr.msra.gmra.mxu1 %vm74_vm2, %v985_v30 }
 0x205   :  { %v112_v31 = vpop.f32.mrf.mxu1 }
 0x206   :  { %v119_v32 = vsel %vm26_vm0, %v112_v31, 0.0 }
 0x207   :  { %120 = vadd.xlane.f32.xlu0 %v119_v32  ;;  %v933_v33 = vpop.f32.mrf.mxu1 }
 0x209   :  { %v115_v34 = vpop.f32.mrf.mxu1 }
 0x20a   :  { %v122_v35 = vsel %vm26_vm0, %v115_v34, 0.0 }
 0x20b   :  { %123 = vadd.xlane.f32.xlu1 %v122_v35  ;;  %v934_v36 = vpop.f32.mrf.mxu1 }
 0x290   :  { %v121_v37 = vpop.xlane.xlu0 %120 }
 0x291   :  { %v125_v38 = vmul.f32 0.03125, %v121_v37 }
 0x293   :  { %v127_v39 = vsub.f32 %v112_v31, %v125_v38 }
 0x294   :  { %v124_v40 = vpop.xlane.xlu1 %123 }
 0x295   :  { %v126_v41 = vmul.f32 0.03125, %v124_v40  ;;  %v129_v42 = vmul.f32 %v127_v39, %v127_v39 }
 0x297   :  { %v128_v43 = vsub.f32 %v115_v34, %v126_v41  ;;  %v131_v44 = vsel %vm26_vm0, %v129_v42, 0.0 }
 0x298   :  { %132 = vadd.xlane.f32.xlu0 %v131_v44 }
 0x299   :  { %v130_v45 = vmul.f32 %v128_v43, %v128_v43 }
 0x29b   :  { %v134_v46 = vsel %vm26_vm0, %v130_v45, 0.0 }
 0x29c   :  { %135 = vadd.xlane.f32.xlu1 %v134_v46 }
 0x2ad   :  { %296 = vrot.lane.b32.xlu1 %v1111_v47, %s1011_s13 }
 0x2ae   :  { %292 = vrot.lane.b32.xlu0 %v1116_v48, %s1011_s13 }
 0x2b1   :  { %298 = vrot.lane.b32.xlu1 %v1125_v49, %s1011_s13 }
 0x2b2   :  { %288 = vrot.lane.b32.xlu0 %v1130_v50, %s1011_s13 }
 0x2b5   :  { %294 = vrot.lane.b32.xlu1 %v1139_v51, %s1011_s13 }
 0x2b6   :  { %284 = vrot.lane.b32.xlu0 %v1144_v52, %s1011_s13 }
 0x2b9   :  { %290 = vrot.lane.b32.xlu1 %v1153_v53, %s1011_s13 }
 0x2ba   :  { %956 = vrot.lane.b32.xlu0 %v1009_v16, %s1012_s24 }
 0x2bd   :  { %286 = vrot.lane.b32.xlu1 %v1162_v54, %s1011_s13 }
 0x2be   :  { %282 = vrot.lane.b32.xlu0 %v1167_v55, %s1011_s13 }
 0x2c1   :  { %280 = vrot.lane.b32.xlu1 %v1176_v56, %s1011_s13 }
 0x2c2   :  { %276 = vrot.lane.b32.xlu0 %v1181_v57, %s1011_s13 }
 0x2c5   :  { %961 = vrot.lane.b32.xlu1 %v1009_v16, %s1013_s0 }
 0x2c6   :  { %966 = vrot.lane.b32.xlu0 %v1009_v16, %s1014_s9 }
 0x2c9   :  { %278 = vrot.lane.b32.xlu1 %v1194_v58, %s1011_s13 }
 0x321   :  { %v133_v59 = vpop.xlane.xlu0 %132 }
 0x322   :  { %v137_v60 = vmul.f32 0.03125, %v133_v59 }
 0x324   :  { %v139_v61 = vadd.f32 1e-05, %v137_v60 }
 0x325   :  { %v136_v62 = vpop.xlane.xlu1 %135  ;;  %v293_v22 = vpop.permute.xlu0 %292 }
 0x326   :  { %995 = vrsqrt.f32 %v139_v61  ;;  %v138_v63 = vmul.f32 0.03125, %v136_v62 }
 0x328   :  { %v140_v0 = vadd.f32 1e-05, %v138_v63 }
 0x329   :  { %v297_v21 = vpop.permute.xlu1 %296  ;;  %v289_v24 = vpop.permute.xlu0 %288 }
 0x32a   :  { %997 = vrsqrt.f32 %v140_v0 }
 0x32d   :  { %v299_v23 = vpop.permute.xlu1 %298  ;;  %v285_v26 = vpop.permute.xlu0 %284 }
 0x331   :  { %v295_v25 = vpop.permute.xlu1 %294  ;;  %v957_v28 = vpop.permute.xlu0 %956 }
 0x332   :  { %v958_v0 = vunpack.i.l.bf16 %v957_v28 }
 0x333   :  { %v996_v1 = vpop.eup %995 }
 0x334   :  { %v143_v6 = vmul.f32 %v996_v1, %v127_v39 }
 0x335   :  { %v291_v27 = vpop.permute.xlu1 %290  ;;  %v283_v30 = vpop.permute.xlu0 %282 }
 0x336   :  { %v145_v7 = vmax.f32 %v143_v6, 0.0 }
 0x337   :  { %v998_v8 = vpop.eup %997 }
 0x338   :  { %147 = vst.msk [vmem:[#allocation2 + $0x8] sm:$0xff] %vm26_vm0, %v145_v7  ;;  %v144_v9 = vmul.f32 %v998_v8, %v128_v43  ;;  %v959_v7 = vunpack.i.h.bf16 %v957_v28 }
 0x339   :  { %v287_v29 = vpop.permute.xlu1 %286  ;;  %v277_v32 = vpop.permute.xlu0 %276 }
 0x33a   :  { %v146_v10 = vmax.f32 %v144_v9, 0.0 }
 0x33c   :  { %148 = vst.msk [vmem:[#allocation2 + $0x20] sm:$0xff] %vm26_vm0, %v146_v10 }
 0x33d   :  { %v281_v31 = vpop.permute.xlu1 %280  ;;  %v1279_v34 = vpop.permute.xlu0 %966 }
 0x33f   :  { %v1200_v11 = vld [vmem:[#allocation2 + $0x8] sm:$0xff] }
 0x340   :  { %220 = vrot.lane.b32.xlu0 %v1200_v11, %s1015_s11  ;;  %189 = vrot.lane.b32.xlu1 %v1200_v11, %s1012_s24 }
 0x341   :  { %v962_v33 = vpop.permute.xlu1 %961 }
 0x343   :  { %v1210_v12 = vld [vmem:[#allocation2 + $0x20] sm:$0xff] }
 0x344   :  { %214 = vrot.lane.b32.xlu0 %v1200_v11, %s1016_s12  ;;  %159 = vrot.lane.b32.xlu1 %v1200_v11, %s1014_s9 }
 0x345   :  { %v279_v35 = vpop.permute.xlu1 %278 }
 0x348   :  { %208 = vrot.lane.b32.xlu0 %v1200_v11, %s1017_s14  ;;  %222 = vrot.lane.b32.xlu1 %v1210_v12, %s1015_s11 }
 0x34c   :  { %202 = vrot.lane.b32.xlu0 %v1200_v11, %s1011_s13  ;;  %216 = vrot.lane.b32.xlu1 %v1210_v12, %s1016_s12 }
 0x350   :  { %174 = vrot.lane.b32.xlu0 %v1200_v11, %s1013_s0  ;;  %210 = vrot.lane.b32.xlu1 %v1210_v12, %s1017_s14 }
 0x354   :  { %193 = vrot.lane.b32.xlu0 %v1210_v12, %s1012_s24  ;;  %204 = vrot.lane.b32.xlu1 %v1210_v12, %s1011_s13 }
 0x358   :  { %274 = vrot.lane.b32.xlu0 %v1231_v13, %s1011_s13  ;;  %178 = vrot.lane.b32.xlu1 %v1210_v12, %s1013_s0 }
 0x35c   :  { %163 = vrot.lane.b32.xlu0 %v1210_v12, %s1014_s9  ;;  %272 = vrot.lane.b32.xlu1 %v1240_v14, %s1011_s13 }
 0x360   :  { %270 = vrot.lane.b32.xlu0 %v1249_v15, %s1011_s13  ;;  %268 = vrot.lane.b32.xlu1 %v1254_v17, %s1011_s13 }
 0x364   :  { %228 = vrot.lane.b32.xlu0 %v1210_v12, %s1019_s23  ;;  %226 = vrot.lane.b32.xlu1 %v1200_v11, %s1019_s23 }
 0x368   :  { %302 = vrot.lane.b32.xlu0 %v1268_v19, %s1011_s13  ;;  %300 = vrot.lane.b32.xlu1 %v1273_v20, %s1011_s13 }
 0x3b2   :  { %v221_v36 = vpop.permute.xlu0 %220  ;;  %v190_v37 = vpop.permute.xlu1 %189 }
 0x3b3   :  { %v344_v42 = vmul.f32 %v297_v21, %v221_v36  ;;  %v196_v8 = vsel %vm195_vm3, %v958_v0, %v190_v37 }
 0x3b6   :  { %v215_v38 = vpop.permute.xlu0 %214  ;;  %v1281_v39 = vpop.permute.xlu1 %159 }
 0x3b7   :  { %v342_v59 = vmul.f32 %v293_v22, %v215_v38  ;;  %v963_v22 = vunpack.i.l.bf16 %v962_v33  ;;  %v334_v38 = vmul.f32 %v281_v31, %v196_v8 }
 0x3ba   :  { %v209_v40 = vpop.permute.xlu0 %208  ;;  %v223_v41 = vpop.permute.xlu1 %222 }
 0x3bb   :  { %v345_v43 = vmul.f32 %v299_v23, %v223_v41  ;;  %v340_v1 = vmul.f32 %v289_v24, %v209_v40  ;;  %v964_v24 = vunpack.i.h.bf16 %v962_v33  ;;  %v969_v33 = vunpack.i.h.bf16 %v1279_v34 }
 0x3bd   :  { %v360_v44 = vpack.c.bf16 %v345_v43, %v344_v42 }
 0x3be   :  { %v203_v45 = vpop.permute.xlu0 %202  ;;  %v217_v46 = vpop.permute.xlu1 %216 }
 0x3bf   :  { %v343_v60 = vmul.f32 %v295_v25, %v217_v46  ;;  %403 = vrot.lane.b32.xlu1 %v360_v44, %s1020_s1  ;;  %v338_v23 = vmul.f32 %v285_v26, %v203_v45  ;;  %v335_v46 = vmul.f32 %v281_v31, %v190_v37  ;;  %v968_v26 = vunpack.i.l.bf16 %v1279_v34 }
 0x3c1   :  { %v359_v61 = vpack.c.bf16 %v343_v60, %v342_v59 }
 0x3c2   :  { %v175_v62 = vpop.permute.xlu0 %174  ;;  %v211_v63 = vpop.permute.xlu1 %210 }
 0x3c3   :  { %v341_v6 = vmul.f32 %v291_v27, %v211_v63  ;;  %401 = vrot.lane.b32.xlu0 %v359_v61, %s1020_s1  ;;  %v181_v27 = vsel %vm180_vm4, %v963_v22, %v175_v62  ;;  %v166_v61 = vsel %vm165_vm5, %v968_v26, %v1281_v39  ;;  %v331_v0 = vmul.f32 %v277_v32, %v175_v62  ;;  %v348_v22 = vld [vmem:[%s1473_s3] sm:$0xff] }
 0x3c5   :  { %v358_v9 = vpack.c.bf16 %v341_v6, %v340_v1 }
 0x3c6   :  { %v194_v10 = vpop.permute.xlu0 %193  ;;  %v205_v21 = vpop.permute.xlu1 %204 }
 0x3c7   :  { %v197_v25 = vsel %vm195_vm3, %v959_v7, %v194_v10  ;;  %v339_v36 = vmul.f32 %v287_v29, %v205_v21  ;;  %399 = vrot.lane.b32.xlu1 %v358_v9, %s1020_s1  ;;  %v337_v40 = vmul.f32 %v283_v30, %v194_v10  ;;  %v330_v29 = vmul.f32 %v277_v32, %v181_v27 }
 0x3c8   :  { %v336_v41 = vmul.f32 %v283_v30, %v197_v25 }
 0x3c9   :  { %v357_v28 = vpack.c.bf16 %v339_v36, %v338_v23  ;;  %v356_v60 = vpack.c.bf16 %v337_v40, %v335_v46  ;;  %v917_v23 = vcombine.high %v348_v22, %v348_v22 }
 0x3ca   :  { %v275_v42 = vpop.permute.xlu0 %274  ;;  %v179_v43 = vpop.permute.xlu1 %178  ;;  %v355_v44 = vpack.c.bf16 %v336_v41, %v334_v38 }
 0x3cb   :  { %v182_v59 = vsel %vm180_vm4, %v964_v24, %v179_v43  ;;  %397 = vrot.lane.b32.xlu0 %v357_v28, %s1020_s1  ;;  %v333_v30 = vmul.f32 %v279_v35, %v179_v43  ;;  %918 = vmatprep.mubr.msk.bf16.mxu1 %vm74_vm2, %v917_v23 }
 0x3cc   :  { %v332_v45 = vmul.f32 %v279_v35, %v182_v59  ;;  %393 = vrot.lane.b32.xlu1 %v355_v44, %s1020_s1 }
 0x3cd   :  { %v354_v8 = vpack.c.bf16 %v333_v30, %v331_v0 }
 0x3ce   :  { %v164_v63 = vpop.permute.xlu0 %163  ;;  %v273_v31 = vpop.permute.xlu1 %272  ;;  %v353_v37 = vpack.c.bf16 %v332_v45, %v330_v29 }
 0x3cf   :  { %v167_v1 = vsel %vm165_vm5, %v969_v33, %v164_v63  ;;  %v326_v6 = vmul.f32 %v273_v31, %v166_v61  ;;  %395 = vrot.lane.b32.xlu0 %v356_v60, %s1020_s1  ;;  %v329_v9 = vmul.f32 %v275_v42, %v164_v63  ;;  %v327_v34 = vmul.f32 %v273_v31, %v1281_v39 }
 0x3d0   :  { %v328_v7 = vmul.f32 %v275_v42, %v167_v1  ;;  %389 = vrot.lane.b32.xlu1 %v353_v37, %s1020_s1 }
 0x3d1   :  { %v352_v25 = vpack.c.bf16 %v329_v9, %v327_v34 }
 0x3d2   :  { %v351_v35 = vpack.c.bf16 %v328_v7, %v326_v6  ;;  %v271_v10 = vpop.permute.xlu0 %270  ;;  %v269_v21 = vpop.permute.xlu1 %268  ;;  %v916_v6 = vcombine.low %v348_v22, %v348_v22 }
 0x3d3   :  { %v324_v32 = vmul.f32 0.0, %v271_v10  ;;  %v322_v62 = vmul.f32 0.0, %v269_v21  ;;  %391 = vrot.lane.b32.xlu0 %v354_v8, %s1020_s1  ;;  %v325_v36 = vmul.f32 %v271_v10, %v1210_v12  ;;  %v323_v38 = vmul.f32 %v269_v21, %v1200_v11 }
 0x3d4   :  { %385 = vrot.lane.b32.xlu1 %v351_v35, %s1020_s1 }
 0x3d5   :  { %v349_v39 = vpack.c.bf16 %v324_v32, %v322_v62  ;;  %v350_v27 = vpack.c.bf16 %v325_v36, %v323_v38 }
 0x3d6   :  { %v229_v41 = vpop.permute.xlu0 %228  ;;  %v227_v24 = vpop.permute.xlu1 %226 }
 0x3d7   :  { %387 = vrot.lane.b32.xlu0 %v352_v25, %s1020_s1 }
 0x3d8   :  { %381 = vrot.lane.b32.xlu1 %v349_v39, %s1020_s1 }
 0x3da   :  { %v303_v40 = vpop.permute.xlu0 %302  ;;  %v301_v28 = vpop.permute.xlu1 %300 }
 0x3db   :  { %v347_v42 = vmul.f32 %v303_v40, %v229_v41  ;;  %v346_v43 = vmul.f32 %v301_v28, %v227_v24  ;;  %383 = vrot.lane.b32.xlu0 %v350_v27, %s1020_s1 }
 0x3dd   :  { %v361_v44 = vpack.c.bf16 %v347_v42, %v346_v43 }
 0x3df   :  { %405 = vrot.lane.b32.xlu1 %v361_v44, %s1020_s1 }
 0x403   :  { %469 = vadd.xlane.f32.xlu1 %v1082_v4 }
 0x431   :  { %v404_v11 = vpop.permute.xlu1 %403 }
 0x432   :  { %425 = vmatpush1.bf16.msra.mxu1 %v404_v11 }
 0x433   :  { %426 = vmatprep.subr.bf16.mxu1 %v1018_v18 }
 0x435   :  { %v402_v12 = vpop.permute.xlu0 %401 }
 0x436   :  { %427 = vmatpush1.bf16.msra.mxu1 %v402_v12 }
 0x437   :  { %428 = vmatprep.subr.bf16.mxu1 %v1018_v18 }
 0x439   :  { %v400_v46 = vpop.permute.xlu1 %399 }
 0x43a   :  { %429 = vmatpush1.bf16.msra.mxu1 %v400_v46 }
 0x43b   :  { %430 = vmatprep.subr.bf16.mxu1 %v1018_v18 }
 0x43d   :  { %v398_v59 = vpop.permute.xlu0 %397 }
 0x43e   :  { %431 = vmatpush1.bf16.msra.mxu1 %v398_v59  ;;  %v394_v26 = vpop.permute.xlu1 %393 }
 0x43f   :  { %432 = vmatprep.subr.bf16.mxu1 %v1018_v18 }
 0x441   :  { %v396_v29 = vpop.permute.xlu0 %395 }
 0x442   :  { %v411_v4 = vsel %vm407_vm6, %v394_v26, %v396_v29  ;;  %v390_v45 = vpop.permute.xlu1 %389 }
 0x443   :  { %433 = vmatpush1.bf16.msra.mxu1 %v411_v4 }
 0x444   :  { %434 = vmatprep.subr.bf16.mxu1 %v1018_v18 }
 0x445   :  { %v392_v33 = vpop.permute.xlu0 %391 }
 0x446   :  { %v410_v60 = vsel %vm407_vm6, %v390_v45, %v392_v33  ;;  %v386_v30 = vpop.permute.xlu1 %385 }
 0x447   :  { %435 = vmatpush1.bf16.msra.mxu1 %v410_v60 }
 0x448   :  { %436 = vmatprep.subr.bf16.mxu1 %v1018_v18 }
 0x449   :  { %v388_v61 = vpop.permute.xlu0 %387 }
 0x44a   :  { %v409_v63 = vsel %vm407_vm6, %v386_v30, %v388_v61  ;;  %v382_v31 = vpop.permute.xlu1 %381 }
 0x44b   :  { %437 = vmatpush1.bf16.msra.mxu1 %v409_v63 }
 0x44c   :  { %438 = vmatprep.subr.bf16.mxu1 %v1018_v18 }
 0x44d   :  { %v384_v37 = vpop.permute.xlu0 %383 }
 0x44e   :  { %v408_v0 = vsel %vm407_vm6, %v382_v31, %v384_v37 }
 0x44f   :  { %439 = vmatpush1.bf16.msra.mxu1 %v408_v0 }
 0x450   :  { %454 = vmatprep.subr.bf16.mxu1 %v1018_v18 }
 0x451   :  { %v406_v1 = vpop.permute.xlu1 %405 }
 0x453   :  { %455 = vmatpush2.bf16.msra.mxu1 %v406_v1  ;;  %v988_v1 = vld [vmem:[%s1474_s4] sm:$0xff]  }
 0x456   :  { %457 = vmatmul.mubr.bf16.vlgmr.msra.gmra.mxu1 %v916_v6 }
 0x48c   :  { %v470_v21 = vpop.xlane.xlu1 %469 }
 0x48d   :  { %v477_v22 = vmul.f32 0.03125, %v470_v21 }
 0x48f   :  { %v480_v23 = vsub.f32 %v1073_v2, %v477_v22 }
 0x491   :  { %v483_v41 = vmul.f32 %v480_v23, %v480_v23 }
 0x493   :  { %v486_v40 = vsel %vm26_vm0, %v483_v41, 0.0 }
 0x516   :  { %v458_v7 = vpop.f32.mrf.mxu1 }
 0x517   :  { %464 = vst.msk [vmem:[%s1470_s6 + $0x10] sm:$0xff] %vm26_vm0, %v458_v7 }
 0x518   :  { %v460_v8 = vpop.f32.mrf.mxu1 }
 0x51a   :  { %v461_v9 = vpop.f32.mrf.mxu1 }
 0x51c   :  { %v462_v34 = vpop.f32.mrf.mxu1 }
 0x51e   :  { %v467_v35 = vld [vmem:[%s1470_s6 + $0x10] sm:$0xff] }
 0x51f   :  { %v474_v10 = vsel %vm26_vm0, %v467_v35, 0.0 }
 0x520   :  { %475 = vadd.xlane.f32.xlu0 %v474_v10 }
 0x524   :  { %472 = vadd.xlane.f32.xlu0 %v1087_v5 }
 0x5a9   :  { %v476_v32 = vpop.xlane.xlu0 %475 }
 0x5aa   :  { %v479_v62 = vmul.f32 0.03125, %v476_v32 }
 0x5ac   :  { %v482_v25 = vsub.f32 %v467_v35, %v479_v62 }
 0x5ad   :  { %v473_v36 = vpop.xlane.xlu0 %472 }
 0x5ae   :  { %v478_v38 = vmul.f32 0.03125, %v473_v36  ;;  %v485_v39 = vmul.f32 %v482_v25, %v482_v25 }
 0x5b0   :  { %v481_v24 = vsub.f32 %v1078_v3, %v478_v38  ;;  %v492_v27 = vsel %vm26_vm0, %v485_v39, 0.0 }
 0x5b1   :  { %493 = vadd.xlane.f32.xlu0 %v492_v27 }
 0x5b2   :  { %v484_v28 = vmul.f32 %v481_v24, %v481_v24 }
 0x5b4   :  { %v489_v5 = vsel %vm26_vm0, %v484_v28, 0.0 }
 0x5b5   :  { %487 = vadd.xlane.f32.xlu0 %v486_v40  ;;  %490 = vadd.xlane.f32.xlu1 %v489_v5 }
 0x63a   :  { %v494_v42 = vpop.xlane.xlu0 %493 }
 0x63b   :  { %v497_v43 = vmul.f32 0.03125, %v494_v42 }
 0x63d   :  { %v500_v2 = vadd.f32 1e-05, %v497_v43 }
 0x63e   :  { %v491_v44 = vpop.xlane.xlu1 %490  ;;  %v488_v11 = vpop.xlane.xlu0 %487 }
 0x63f   :  { %999 = vrsqrt.f32 %v500_v2  ;;  %v496_v12 = vmul.f32 0.03125, %v491_v44  ;;  %v495_v46 = vmul.f32 0.03125, %v488_v11 }
 0x641   :  { %v499_v59 = vadd.f32 1e-05, %v496_v12  ;;  %v498_v3 = vadd.f32 1e-05, %v495_v46 }
 0x643   :  { %1001 = vrsqrt.f32 %v499_v59 }
 0x644   :  { %1003 = vrsqrt.f32 %v498_v3 }
 0x64c   :  { %v1000_v26 = vpop.eup %999 }
 0x64d   :  { %v506_v29 = vmul.f32 %v1000_v26, %v482_v25 }
 0x64f   :  { %v509_v4 = vmax.f32 %v506_v29, 0.0 }
 0x650   :  { %v1002_v45 = vpop.eup %1001 }
 0x651   :  { %v1004_v33 = vpop.eup %1003  ;;  %v513_v60 = vpack.c.bf16 %v509_v4, %v509_v4  ;;  %v505_v30 = vmul.f32 %v1002_v45, %v481_v24 }
 0x652   :  { %v504_v61 = vmul.f32 %v1004_v33, %v480_v23 }
 0x653   :  { %v525_v63 = vsel %vm523_vm7, %v513_v60, 0  ;;  %v508_v31 = vmax.f32 %v505_v30, 0.0 }
 0x654   :  { %936 = vmatpush3.bf16.msra.mxu0 %v525_v63  ;;  %v507_v37 = vmax.f32 %v504_v61, 0.0 }
 0x655   :  { %937 = vmatprep.subr.bf16.mxu0 %v1009_v16 }
 0x656   :  { %v512_v0 = vpack.c.bf16 %v508_v31, %v507_v37 }
 0x658   :  { %938 = vmatpush3.bf16.msra.mxu0 %v512_v0 }
 0x659   :  { %869 = vmatprep.subr.bf16.mxu0 %v1018_v18 }
 0x65b   :  { %940 = vmatmul.mubr.msk.bf16.vlgmr.msra.gmra.mxu0 %vm519_vm8, %v988_v1 }
 0x71b   :  { %v561_v6 = vpop.f32.mrf.mxu0 }
 0x71c   :  { %v568_v7 = vsel %vm26_vm0, %v561_v6, 0.0 }
 0x71d   :  { %569 = vadd.xlane.f32.xlu0 %v568_v7  ;;  %v941_v8 = vpop.f32.mrf.mxu0 }
 0x71f   :  { %v564_v9 = vpop.f32.mrf.mxu0 }
 0x720   :  { %v571_v34 = vsel %vm26_vm0, %v564_v9, 0.0 }
 0x721   :  { %572 = vadd.xlane.f32.xlu1 %v571_v34  ;;  %v942_v35 = vpop.f32.mrf.mxu0 }
 0x7a6   :  { %v570_v10 = vpop.xlane.xlu0 %569 }
 0x7a7   :  { %v574_v21 = vmul.f32 0.03125, %v570_v10 }
 0x7a9   :  { %v576_v22 = vsub.f32 %v561_v6, %v574_v21 }
 0x7aa   :  { %v573_v32 = vpop.xlane.xlu1 %572 }
 0x7ab   :  { %v575_v62 = vmul.f32 0.03125, %v573_v32  ;;  %v578_v23 = vmul.f32 %v576_v22, %v576_v22 }
 0x7ad   :  { %v577_v25 = vsub.f32 %v564_v9, %v575_v62  ;;  %v580_v36 = vsel %vm26_vm0, %v578_v23, 0.0 }
 0x7ae   :  { %581 = vadd.xlane.f32.xlu0 %v580_v36 }
 0x7af   :  { %v579_v38 = vmul.f32 %v577_v25, %v577_v25 }
 0x7b1   :  { %v583_v39 = vsel %vm26_vm0, %v579_v38, 0.0 }
 0x7b2   :  { %584 = vadd.xlane.f32.xlu1 %v583_v39 }
 0x7c3   :  { %742 = vrot.lane.b32.xlu1 %v1111_v47, %s1011_s13 }
 0x7c4   :  { %738 = vrot.lane.b32.xlu0 %v1116_v48, %s1011_s13 }
 0x7c7   :  { %744 = vrot.lane.b32.xlu1 %v1125_v49, %s1011_s13 }
 0x7c8   :  { %734 = vrot.lane.b32.xlu0 %v1130_v50, %s1011_s13 }
 0x7cb   :  { %740 = vrot.lane.b32.xlu1 %v1139_v51, %s1011_s13 }
 0x7cc   :  { %730 = vrot.lane.b32.xlu0 %v1144_v52, %s1011_s13 }
 0x7cf   :  { %736 = vrot.lane.b32.xlu1 %v1153_v53, %s1011_s13 }
 0x7d0   :  { %971 = vrot.lane.b32.xlu0 %v1009_v16, %s1012_s24 }
 0x7d3   :  { %732 = vrot.lane.b32.xlu1 %v1162_v54, %s1011_s13 }
 0x7d4   :  { %728 = vrot.lane.b32.xlu0 %v1167_v55, %s1011_s13 }
 0x7d7   :  { %726 = vrot.lane.b32.xlu1 %v1176_v56, %s1011_s13 }
 0x7d8   :  { %722 = vrot.lane.b32.xlu0 %v1181_v57, %s1011_s13 }
 0x7db   :  { %976 = vrot.lane.b32.xlu1 %v1009_v16, %s1013_s0 }
 0x7dc   :  { %981 = vrot.lane.b32.xlu0 %v1009_v16, %s1014_s9 }
 0x7df   :  { %724 = vrot.lane.b32.xlu1 %v1194_v58, %s1011_s13 }
 0x837   :  { %v582_v47 = vpop.xlane.xlu0 %581 }
 0x838   :  { %v586_v48 = vmul.f32 0.03125, %v582_v47 }
 0x83a   :  { %v588_v49 = vadd.f32 1e-05, %v586_v48 }
 0x83b   :  { %v585_v50 = vpop.xlane.xlu1 %584 }
 0x83c   :  { %1005 = vrsqrt.f32 %v588_v49  ;;  %v587_v51 = vmul.f32 0.03125, %v585_v50 }
 0x83e   :  { %v589_v52 = vadd.f32 1e-05, %v587_v51 }
 0x840   :  { %1007 = vrsqrt.f32 %v589_v52 }
 0x849   :  { %v1006_v53 = vpop.eup %1005 }
 0x84a   :  { %v592_v54 = vmul.f32 %v1006_v53, %v576_v22 }
 0x84c   :  { %v594_v55 = vmax.f32 %v592_v54, 0.0 }
 0x84d   :  { %v1008_v56 = vpop.eup %1007 }
 0x84e   :  { %596 = vst.msk [vmem:[#allocation2 + $0x8] sm:$0xff] %vm26_vm0, %v594_v55  ;;  %v593_v57 = vmul.f32 %v1008_v56, %v577_v25 }
 0x850   :  { %v595_v41 = vmax.f32 %v593_v57, 0.0 }
 0x852   :  { %597 = vst.msk [vmem:[#allocation2 + $0x20] sm:$0xff] %vm26_vm0, %v595_v41 }
 0x855   :  { %v1380_v16 = vld [vmem:[#allocation2 + $0x8] sm:$0xff] }
 0x856   :  { %666 = vrot.lane.b32.xlu0 %v1380_v16, %s1015_s11  ;;  %636 = vrot.lane.b32.xlu1 %v1380_v16, %s1012_s24 }
 0x859   :  { %v1390_v58 = vld [vmem:[#allocation2 + $0x20] sm:$0xff] }
 0x85a   :  { %660 = vrot.lane.b32.xlu0 %v1380_v16, %s1016_s12  ;;  %608 = vrot.lane.b32.xlu1 %v1380_v16, %s1014_s9 }
 0x85e   :  { %654 = vrot.lane.b32.xlu0 %v1380_v16, %s1017_s14  ;;  %668 = vrot.lane.b32.xlu1 %v1390_v58, %s1015_s11 }
 0x862   :  { %648 = vrot.lane.b32.xlu0 %v1380_v16, %s1011_s13  ;;  %662 = vrot.lane.b32.xlu1 %v1390_v58, %s1016_s12 }
 0x866   :  { %622 = vrot.lane.b32.xlu0 %v1380_v16, %s1013_s0  ;;  %656 = vrot.lane.b32.xlu1 %v1390_v58, %s1017_s14 }
 0x86a   :  { %640 = vrot.lane.b32.xlu0 %v1390_v58, %s1012_s24  ;;  %650 = vrot.lane.b32.xlu1 %v1390_v58, %s1011_s13 }
 0x86e   :  { %720 = vrot.lane.b32.xlu0 %v1231_v13, %s1011_s13  ;;  %626 = vrot.lane.b32.xlu1 %v1390_v58, %s1013_s0  ;;  %v743_v13 = vpop.permute.xlu1 %742 }
 0x872   :  { %612 = vrot.lane.b32.xlu0 %v1390_v58, %s1014_s9  ;;  %718 = vrot.lane.b32.xlu1 %v1240_v14, %s1011_s13  ;;  %v739_v14 = vpop.permute.xlu0 %738  ;;  %v745_v24 = vpop.permute.xlu1 %744 }
 0x876   :  { %716 = vrot.lane.b32.xlu0 %v1249_v15, %s1011_s13  ;;  %714 = vrot.lane.b32.xlu1 %v1254_v17, %s1011_s13  ;;  %v735_v27 = vpop.permute.xlu0 %734  ;;  %v741_v15 = vpop.permute.xlu1 %740 }
 0x87a   :  { %674 = vrot.lane.b32.xlu0 %v1390_v58, %s1019_s23  ;;  %672 = vrot.lane.b32.xlu1 %v1380_v16, %s1019_s23  ;;  %v731_v40 = vpop.permute.xlu0 %730  ;;  %v737_v28 = vpop.permute.xlu1 %736 }
 0x87e   :  { %748 = vrot.lane.b32.xlu0 %v1268_v19, %s1011_s13  ;;  %746 = vrot.lane.b32.xlu1 %v1273_v20, %s1011_s13  ;;  %v972_v17 = vpop.permute.xlu0 %971  ;;  %v733_v5 = vpop.permute.xlu1 %732 }
 0x87f   :  { %v973_v0 = vunpack.i.l.bf16 %v972_v17  ;;  %v974_v7 = vunpack.i.h.bf16 %v972_v17 }
 0x882   :  { %v729_v42 = vpop.permute.xlu0 %728  ;;  %v727_v43 = vpop.permute.xlu1 %726 }
 0x886   :  { %v723_v2 = vpop.permute.xlu0 %722  ;;  %v977_v44 = vpop.permute.xlu1 %976 }
 0x887   :  { %v978_v10 = vunpack.i.l.bf16 %v977_v44  ;;  %v979_v25 = vunpack.i.h.bf16 %v977_v44 }
 0x88a   :  { %v982_v11 = vpop.permute.xlu0 %981  ;;  %v725_v12 = vpop.permute.xlu1 %724 }
 0x88b   :  { %v983_v52 = vunpack.i.l.bf16 %v982_v11  ;;  %v984_v55 = vunpack.i.h.bf16 %v982_v11 }
 0x8c8   :  { %v667_v46 = vpop.permute.xlu0 %666  ;;  %v637_v19 = vpop.permute.xlu1 %636 }
 0x8c9   :  { %v790_v29 = vmul.f32 %v743_v13, %v667_v46  ;;  %v642_v8 = vsel %vm195_vm3, %v973_v0, %v637_v19  ;;  %v781_v50 = vmul.f32 %v727_v43, %v637_v19 }
 0x8ca   :  { %v780_v62 = vmul.f32 %v727_v43, %v642_v8 }
 0x8cc   :  { %v661_v59 = vpop.permute.xlu0 %660  ;;  %v609_v3 = vpop.permute.xlu1 %608 }
 0x8cd   :  { %v788_v30 = vmul.f32 %v739_v14, %v661_v59  ;;  %v614_v41 = vsel %vm165_vm5, %v983_v52, %v609_v3 }
 0x8d0   :  { %v655_v20 = vpop.permute.xlu0 %654  ;;  %v669_v26 = vpop.permute.xlu1 %668 }
 0x8d1   :  { %v791_v4 = vmul.f32 %v745_v24, %v669_v26  ;;  %v786_v1 = vmul.f32 %v735_v27, %v655_v20 }
 0x8d3   :  { %v806_v45 = vpack.c.bf16 %v791_v4, %v790_v29 }
 0x8d4   :  { %v649_v33 = vpop.permute.xlu0 %648  ;;  %v663_v60 = vpop.permute.xlu1 %662 }
 0x8d5   :  { %v789_v61 = vmul.f32 %v741_v15, %v663_v60  ;;  %849 = vrot.lane.b32.xlu1 %v806_v45, %s1020_s1  ;;  %v784_v21 = vmul.f32 %v731_v40, %v649_v33 }
 0x8d7   :  { %v805_v63 = vpack.c.bf16 %v789_v61, %v788_v30 }
 0x8d8   :  { %v623_v31 = vpop.permute.xlu0 %622  ;;  %v657_v37 = vpop.permute.xlu1 %656 }
 0x8d9   :  { %v787_v6 = vmul.f32 %v737_v28, %v657_v37  ;;  %847 = vrot.lane.b32.xlu0 %v805_v63, %s1020_s1  ;;  %v628_v36 = vsel %vm180_vm4, %v978_v10, %v623_v31  ;;  %v777_v27 = vmul.f32 %v723_v2, %v623_v31 }
 0x8da   :  { %v776_v53 = vmul.f32 %v723_v2, %v628_v36  ;;  %v794_v2 = vld [vmem:[%s1475_s5] sm:$0xff] }
 0x8db   :  { %v804_v9 = vpack.c.bf16 %v787_v6, %v786_v1  ;;  %v922_v19 = vcombine.high %v794_v2, %v794_v2 }
 0x8dc   :  { %v641_v34 = vpop.permute.xlu0 %640  ;;  %v651_v35 = vpop.permute.xlu1 %650 }
 0x8dd   :  { %v643_v22 = vsel %vm195_vm3, %v974_v7, %v641_v34  ;;  %v785_v32 = vmul.f32 %v733_v5, %v651_v35  ;;  %845 = vrot.lane.b32.xlu1 %v804_v9, %s1020_s1  ;;  %v783_v38 = vmul.f32 %v729_v42, %v641_v34  ;;  %923 = vmatprep.mubr.msk.bf16.mxu0 %vm74_vm2, %v922_v19 }
 0x8de   :  { %v782_v23 = vmul.f32 %v729_v42, %v643_v22 }
 0x8df   :  { %v803_v39 = vpack.c.bf16 %v785_v32, %v784_v21  ;;  %v802_v56 = vpack.c.bf16 %v783_v38, %v781_v50 }
 0x8e0   :  { %v801_v47 = vpack.c.bf16 %v782_v23, %v780_v62  ;;  %v721_v48 = vpop.permute.xlu0 %720  ;;  %v627_v49 = vpop.permute.xlu1 %626  ;;  %v921_v23 = vcombine.low %v794_v2, %v794_v2 }
 0x8e1   :  { %v629_v51 = vsel %vm180_vm4, %v979_v25, %v627_v49  ;;  %843 = vrot.lane.b32.xlu0 %v803_v39, %s1020_s1  ;;  %v779_v57 = vmul.f32 %v725_v12, %v627_v49 }
 0x8e2   :  { %v778_v54 = vmul.f32 %v725_v12, %v629_v51  ;;  %839 = vrot.lane.b32.xlu1 %v801_v47, %s1020_s1 }
 0x8e3   :  { %v800_v17 = vpack.c.bf16 %v779_v57, %v777_v27 }
 0x8e4   :  { %v799_v13 = vpack.c.bf16 %v778_v54, %v776_v53  ;;  %v613_v14 = vpop.permute.xlu0 %612  ;;  %v719_v24 = vpop.permute.xlu1 %718 }
 0x8e5   :  { %v615_v15 = vsel %vm165_vm5, %v984_v55, %v613_v14  ;;  %v772_v40 = vmul.f32 %v719_v24, %v614_v41  ;;  %841 = vrot.lane.b32.xlu0 %v802_v56, %s1020_s1  ;;  %v775_v5 = vmul.f32 %v721_v48, %v613_v14  ;;  %v773_v42 = vmul.f32 %v719_v24, %v609_v3 }
 0x8e6   :  { %v774_v28 = vmul.f32 %v721_v48, %v615_v15  ;;  %835 = vrot.lane.b32.xlu1 %v799_v13, %s1020_s1 }
 0x8e7   :  { %v798_v59 = vpack.c.bf16 %v775_v5, %v773_v42 }
 0x8e8   :  { %v797_v43 = vpack.c.bf16 %v774_v28, %v772_v40  ;;  %v717_v44 = vpop.permute.xlu0 %716  ;;  %v715_v11 = vpop.permute.xlu1 %714 }
 0x8e9   :  { %v770_v12 = vmul.f32 0.0, %v717_v44  ;;  %v768_v46 = vmul.f32 0.0, %v715_v11  ;;  %837 = vrot.lane.b32.xlu0 %v800_v17, %s1020_s1  ;;  %v771_v20 = vmul.f32 %v717_v44, %v1390_v58  ;;  %v769_v26 = vmul.f32 %v715_v11, %v1380_v16 }
 0x8ea   :  { %831 = vrot.lane.b32.xlu1 %v797_v43, %s1020_s1 }
 0x8eb   :  { %v795_v3 = vpack.c.bf16 %v770_v12, %v768_v46  ;;  %v796_v45 = vpack.c.bf16 %v771_v20, %v769_v26 }
 0x8ec   :  { %v675_v29 = vpop.permute.xlu0 %674  ;;  %v673_v4 = vpop.permute.xlu1 %672 }
 0x8ed   :  { %833 = vrot.lane.b32.xlu0 %v798_v59, %s1020_s1 }
 0x8ee   :  { %827 = vrot.lane.b32.xlu1 %v795_v3, %s1020_s1 }
 0x8f0   :  { %v749_v33 = vpop.permute.xlu0 %748  ;;  %v747_v60 = vpop.permute.xlu1 %746 }
 0x8f1   :  { %v793_v30 = vmul.f32 %v749_v33, %v675_v29  ;;  %v792_v61 = vmul.f32 %v747_v60, %v673_v4  ;;  %829 = vrot.lane.b32.xlu0 %v796_v45, %s1020_s1 }
 0x8f3   :  { %v807_v63 = vpack.c.bf16 %v793_v30, %v792_v61 }
 0x8f5   :  { %851 = vrot.lane.b32.xlu1 %v807_v63, %s1020_s1 }
 0x947   :  { %v850_v16 = vpop.permute.xlu1 %849 }
 0x948   :  { %870 = vmatpush1.bf16.msra.mxu0 %v850_v16 }
 0x949   :  { %871 = vmatprep.subr.bf16.mxu0 %v1018_v18 }
 0x94b   :  { %v848_v58 = vpop.permute.xlu0 %847 }
 0x94c   :  { %872 = vmatpush1.bf16.msra.mxu0 %v848_v58 }
 0x94d   :  { %873 = vmatprep.subr.bf16.mxu0 %v1018_v18 }
 0x94f   :  { %v846_v31 = vpop.permute.xlu1 %845 }
 0x950   :  { %874 = vmatpush1.bf16.msra.mxu0 %v846_v31 }
 0x951   :  { %875 = vmatprep.subr.bf16.mxu0 %v1018_v18 }
 0x953   :  { %v844_v37 = vpop.permute.xlu0 %843 }
 0x954   :  { %876 = vmatpush1.bf16.msra.mxu0 %v844_v37  ;;  %v840_v0 = vpop.permute.xlu1 %839 }
 0x955   :  { %877 = vmatprep.subr.bf16.mxu0 %v1018_v18 }
 0x957   :  { %v842_v1 = vpop.permute.xlu0 %841 }
 0x958   :  { %v856_v6 = vsel %vm407_vm6, %v840_v0, %v842_v1  ;;  %v836_v7 = vpop.permute.xlu1 %835 }
 0x959   :  { %878 = vmatpush1.bf16.msra.mxu0 %v856_v6 }
 0x95a   :  { %879 = vmatprep.subr.bf16.mxu0 %v1018_v18 }
 0x95b   :  { %v838_v8 = vpop.permute.xlu0 %837 }
 0x95c   :  { %v855_v9 = vsel %vm407_vm6, %v836_v7, %v838_v8  ;;  %v832_v34 = vpop.permute.xlu1 %831 }
 0x95d   :  { %880 = vmatpush1.bf16.msra.mxu0 %v855_v9 }
 0x95e   :  { %881 = vmatprep.subr.bf16.mxu0 %v1018_v18 }
 0x95f   :  { %v834_v35 = vpop.permute.xlu0 %833 }
 0x960   :  { %v854_v10 = vsel %vm407_vm6, %v832_v34, %v834_v35  ;;  %v828_v21 = vpop.permute.xlu1 %827 }
 0x961   :  { %882 = vmatpush1.bf16.msra.mxu0 %v854_v10 }
 0x962   :  { %883 = vmatprep.subr.bf16.mxu0 %v1018_v18 }
 0x963   :  { %v830_v22 = vpop.permute.xlu0 %829 }
 0x964   :  { %v853_v32 = vsel %vm407_vm6, %v828_v21, %v830_v22 }
 0x965   :  { %884 = vmatpush1.bf16.msra.mxu0 %v853_v32 }
 0x966   :  { %899 = vmatprep.subr.bf16.mxu0 %v1018_v18 }
 0x967   :  { %v852_v62 = vpop.permute.xlu1 %851 }
 0x969   :  { %900 = vmatpush2.bf16.msra.mxu0 %v852_v62 }
 0x96c   :  { %902 = vmatmul.mubr.bf16.vlgmr.msra.gmra.mxu0 %v921_v23 }
 0xa2c   :  { %v903_v25 = vpop.f32.mrf.mxu0 }
 0xa2d   :  { %909 = vst.msk [vmem:[%s1470_s6 + $0x18] sm:$0xff] %vm26_vm0, %v903_v25 }
 0xa2e   :  { %v905_v36 = vpop.f32.mrf.mxu0 }
 0xa30   :  { %v906_v38 = vpop.f32.mrf.mxu0 }
 0xa32   :  { %v907_v39 = vpop.f32.mrf.mxu0 }

</bundles_post_ra>
